<compile_context>
chip_gen: v7x
topology: tpu7x:2x2x1
jax: 0.10.0
libtpu: 0.0.40
codegen_flags: <defaults>
</compile_context>

<pallas_src>
import functools
import math

import jax
import jax.numpy as jnp
from jax.experimental import pallas as pl
from jax.experimental.pallas import tpu as pltpu


def _round_up(x, m):
    return ((x + m - 1) // m) * m


# ----------------------------------------------------------------------------
# Pallas kernel: both RITS directions, lane-concatenated, single invocation.
# ----------------------------------------------------------------------------
def _brits_kernel(H, C, T, Bp,
                  # time-series streams, time-major, batch padded to Bp (mult of 8),
                  # forward|backward concatenated along the feature axis (2F lanes)
                  vals_ref, masks_ref, deltas_ref, wloss_ref,      # (T*Bp, 2F)
                  # hoisted-matmul weights (block-diagonal across directions)
                  wg_ref, bg_ref,                                  # (2F, 2H+2F), (1, 2H+2F)
                  wm_ref, bm_ref,                                  # (2F, 8H+2F), (1, 8H+2F)
                  wcg_ref,                                         # (2F, 2F)
                  # per-step weights
                  whcat_ref, bhr_ref,                              # (2H, 8H+2F), (1, 2F)
                  wfr_ref, bfr_ref,                                # (2F, 2F), (1, 2F)
                  wihx_ref,                                        # (2F, 8H)
                  # classifier
                  wcls_ref, bcls_ref,                              # (2H, 2C), (1, 2C)
                  # outputs
                  imputed_ref, loss_ref, pred_ref,
                  # scratch
                  h_sc, c_sc, loss_sc, gammah_sc, alpha_sc, gpre_sc):
    f32 = jnp.float32
    H2, G = 2 * H, 8 * H

    # -------- hoisted, input-only matmuls (once over all T*Bp rows) ----------
    d = deltas_ref[...]                              # (T*Bp, 2F)
    m = masks_ref[...]

    dec = jnp.exp(-jnp.maximum(
        jnp.dot(d, wg_ref[...], preferred_element_type=f32) + bg_ref[...], 0.0))
    gammah_sc[...] = dec[:, :H2]                     # temporal decay of hidden state
    gamma_x = dec[:, H2:]                            # temporal decay of features

    mp = jnp.dot(m, wm_ref[...], preferred_element_type=f32) + bm_ref[...]
    gpre_sc[...] = mp[:, :G]                         # mask half of LSTM input proj (+ biases)
    alpha_sc[...] = jax.nn.sigmoid(                  # combining gate (input-only)
        jnp.dot(gamma_x, wcg_ref[...], preferred_element_type=f32) + mp[:, G:])

    h_sc[...] = jnp.zeros_like(h_sc)
    c_sc[...] = jnp.zeros_like(c_sc)
    loss_sc[...] = jnp.zeros_like(loss_sc)

    # -------- serial recurrence: both directions each step, 3 MXU issues -----
    def step(t, carry):
        r0 = pl.multiple_of(t * Bp, 8)               # Bp % 8 == 0 -> aligned sublane tile
        rows = pl.ds(r0, Bp)

        x = vals_ref[rows, :]                        # (Bp, 2F)
        mk = masks_ref[rows, :]
        h = h_sc[...] * gammah_sc[rows, :]           # decayed hidden state, (Bp, 2H)
        c = c_sc[...]

        # fused shared-LHS matmul: h @ [W_hh (gate-interleaved) | W_hist]
        hproj = jnp.dot(h, whcat_ref[...], preferred_element_type=f32)
        gates_h = hproj[:, :G]
        x_h = hproj[:, G:] + bhr_ref[...]            # history regression

        one_m = 1.0 - mk
        x_c = mk * x + one_m * x_h
        z_h = jnp.dot(x_c, wfr_ref[...], preferred_element_type=f32) + bfr_ref[...]

        alpha = alpha_sc[rows, :]
        c_h = alpha * z_h + (1.0 - alpha) * x_h
        c_c = mk * x + one_m * c_h

        # LSTMCell on concat([c_c, m]); only the c_c half is on the serial path
        gates = (jnp.dot(c_c, wihx_ref[...], preferred_element_type=f32)
                 + gpre_sc[rows, :] + gates_h)
        i_g = jax.nn.sigmoid(gates[:, 0:H2])
        f_g = jax.nn.sigmoid(gates[:, H2:2 * H2])
        g_g = jnp.tanh(gates[:, 2 * H2:3 * H2])
        o_g = jax.nn.sigmoid(gates[:, 3 * H2:4 * H2])
        c_new = f_g * c + i_g * g_g
        h_new = o_g * jnp.tanh(c_new)

        h_sc[...] = h_new
        c_sc[...] = c_new
        # masked-MAE terms accumulated elementwise; wloss = m / (sum_t(m) + 1e-9)
        loss_sc[...] = loss_sc[...] + (jnp.abs(x_h - x) + jnp.abs(z_h - x)
                                       + jnp.abs(c_h - x)) * wloss_ref[rows, :]
        imputed_ref[rows, :] = c_c
        return carry

    jax.lax.fori_loop(0, T, step, 0, unroll=(True if T <= 32 else 8))

    # -------- epilogue --------------------------------------------------------
    loss_ref[...] = loss_sc[...]

    h_fin = h_sc[...]
    logits = jnp.dot(h_fin, wcls_ref[...], preferred_element_type=f32) + bcls_ref[...]

    def _softmax(l):                                  # exact: feeds log() in NLL downstream
        mx = jnp.max(l, axis=1, keepdims=True)
        e = jnp.exp(l - mx)
        return e / jnp.sum(e, axis=1, keepdims=True)

    pred_ref[:, 0:C] = _softmax(logits[:, 0:C])           # forward direction
    pred_ref[:, C:2 * C] = _softmax(logits[:, C:2 * C])   # backward direction


# ----------------------------------------------------------------------------
# Weight / stream preparation (block-diagonal lane concatenation of directions)
# ----------------------------------------------------------------------------
def _blockdiag(a, b):
    ra, ca = a.shape
    rb, cb = b.shape
    top = jnp.concatenate([a, jnp.zeros((ra, cb), a.dtype)], axis=1)
    bot = jnp.concatenate([jnp.zeros((rb, ca), b.dtype), b], axis=1)
    return jnp.concatenate([top, bot], axis=0)


def _gate_blockdiag(wf_t, wb_t, H):
    """Per-gate block-diagonal concat of transposed LSTM weights.

    wf_t/wb_t: (rows, 4H), PyTorch gate column order [i, f, g, o].
    Output: (rows_f + rows_b, 8H) with columns [i_f,i_b,f_f,f_b,g_f,g_b,o_f,o_b]
    and forward-direction rows on top.
    """
    blocks = [_blockdiag(wf_t[:, k * H:(k + 1) * H], wb_t[:, k * H:(k + 1) * H])
              for k in range(4)]
    return jnp.concatenate(blocks, axis=1)


def _gate_bias(bf, bb, H):
    return jnp.concatenate(
        [jnp.concatenate([bf[k * H:(k + 1) * H], bb[k * H:(k + 1) * H]]) for k in range(4)])


def _prep_streams(X, M, D, B, Bp):
    """(B,T,F) -> time-major, batch padded to Bp; plus masked-MAE weights."""
    def tmpad(a):
        a = jnp.transpose(a.astype(jnp.float32), (1, 0, 2))          # (T, B, F)
        return jnp.pad(a, ((0, 0), (0, Bp - B), (0, 0)))
    Xt, Mt, Dt = tmpad(X), tmpad(M), tmpad(D)
    wl = Mt / (jnp.sum(Mt, axis=(1, 2), keepdims=True) + 1e-9)        # per-timestep m/(sum(m)+eps)
    return Xt, Mt, Dt, wl


def _prep_weights(pf, pb, F, H):
    eye = jnp.eye(F, dtype=jnp.float32)

    # temporal decays (gamma_x diagonal-masked), fused: d @ [W_gamma_h | W_gamma_x]
    wg = jnp.concatenate(
        [_blockdiag(pf['W_gamma_h'].T, pb['W_gamma_h'].T),
         _blockdiag((pf['W_gamma_x'] * eye).T, (pb['W_gamma_x'] * eye).T)], axis=1)
    bg = jnp.concatenate([pf['b_gamma_h'], pb['b_gamma_h'],
                          pf['b_gamma_x'], pb['b_gamma_x']])[None, :]

    # LSTM input weights, input order [c_c, m], gate order [i, f, g, o]
    wih_f, wih_b = pf['W_ih'].T, pb['W_ih'].T                          # (2F, 4H)
    wihx = _gate_blockdiag(wih_f[:F], wih_b[:F], H)                    # c_c half, (2F, 8H)
    wihm = _gate_blockdiag(wih_f[F:], wih_b[F:], H)                    # mask half
    bihh = _gate_bias(pf['b_ih'] + pf['b_hh'], pb['b_ih'] + pb['b_hh'], H)

    # combining weight, input order [gamma_x, m]
    wc_f, wc_b = pf['W_comb'].T, pb['W_comb'].T                        # (2F, F)
    wcg = _blockdiag(wc_f[:F], wc_b[:F])                               # gamma_x half
    wcm = _blockdiag(wc_f[F:], wc_b[F:])                               # mask half
    bcw = jnp.concatenate([pf['b_comb'], pb['b_comb']])

    # fused mask matmul: m @ [LSTM-mask-half | combining-mask-half]
    wm = jnp.concatenate([wihm, wcm], axis=1)                          # (2F, 8H+2F)
    bm = jnp.concatenate([bihh, bcw])[None, :]

    # per-step fused h @ [W_hh (gate-interleaved) | W_hist]
    whh = _gate_blockdiag(pf['W_hh'].T, pb['W_hh'].T, H)               # (2H, 8H)
    whist = _blockdiag(pf['W_hist'].T, pb['W_hist'].T)                 # (2H, 2F)
    whcat = jnp.concatenate([whh, whist], axis=1)
    bhr = jnp.concatenate([pf['b_hist'], pb['b_hist']])[None, :]

    # feature regression (zero diagonal)
    zd = 1.0 - eye
    wfr = _blockdiag((pf['W_feat'] * zd).T, (pb['W_feat'] * zd).T)
    bfr = jnp.concatenate([pf['b_feat'], pb['b_feat']])[None, :]

    # classifier
    wcls = _blockdiag(pf['W_cls'].T, pb['W_cls'].T)                    # (2H, 2C)
    bcls = jnp.concatenate([pf['b_cls'], pb['b_cls']])[None, :]

    return dict(wg=wg, bg=bg, wm=wm, bm=bm, wcg=wcg,
                whcat=whcat, bhr=bhr, wfr=wfr, bfr=bfr, wihx=wihx,
                wcls=wcls, bcls=bcls)


# ----------------------------------------------------------------------------
# Single pallas_call covering both directions
# ----------------------------------------------------------------------------
def brits_pallas_forward(vals, masks, deltas, wloss, w, T, Bp, F, H, C):
    TB = T * Bp
    F2, H2, C2, G = 2 * F, 2 * H, 2 * C, 8 * H

    args = (vals, masks, deltas, wloss,
            w['wg'], w['bg'], w['wm'], w['bm'], w['wcg'],
            w['whcat'], w['bhr'], w['wfr'], w['bfr'], w['wihx'],
            w['wcls'], w['bcls'])

    out_shape = (
        jax.ShapeDtypeStruct((TB, F2), jnp.float32),   # imputed data (time-major, dirs lane-concat)
        jax.ShapeDtypeStruct((Bp, F2), jnp.float32),   # elementwise reconstruction-loss accumulator
        jax.ShapeDtypeStruct((Bp, C2), jnp.float32),   # per-direction softmax predictions
    )
    scratch = [
        pltpu.VMEM((Bp, H2), jnp.float32),   # h
        pltpu.VMEM((Bp, H2), jnp.float32),   # c
        pltpu.VMEM((Bp, F2), jnp.float32),   # loss accumulator
        pltpu.VMEM((TB, H2), jnp.float32),   # hoisted gamma_h
        pltpu.VMEM((TB, F2), jnp.float32),   # hoisted combining gate alpha
        pltpu.VMEM((TB, G), jnp.float32),    # hoisted mask half of LSTM input projection
    ]

    # Explicit VMEM budget (everything is resident; single invocation).
    vmem_bytes = (sum(int(a.size) * a.dtype.itemsize for a in args)
                  + sum(math.prod(s.shape) * 4 for s in out_shape)
                  + (2 * Bp * H2 + Bp * F2 + TB * (H2 + F2 + G)) * 4)
    vmem_limit = int(min(max(2 * vmem_bytes + (2 << 20), 16 << 20), 64 << 20))

    flops = 2 * (TB * F2 * (H2 + F2) + TB * F2 * (G + F2) + TB * F2 * F2
                 + T * Bp * (H2 * (G + F2) + F2 * F2 + F2 * G)
                 + Bp * H2 * C2)
    transc = TB * (H2 + 3 * F2) + T * Bp * 5 * H2 + Bp * C2

    return pl.pallas_call(
        functools.partial(_brits_kernel, H, C, T, Bp),
        out_shape=out_shape,
        scratch_shapes=scratch,
        compiler_params=pltpu.CompilerParams(vmem_limit_bytes=vmem_limit),
        cost_estimate=pl.CostEstimate(flops=flops, transcendentals=transc,
                                      bytes_accessed=vmem_bytes),
    )(*args)


# ----------------------------------------------------------------------------
# _BRITS forward (plain-JAX glue around the single Pallas call)
# ----------------------------------------------------------------------------
def brits_forward(inputs, params_f, params_b,
                  classification_weight, reconstruction_weight):
    label = inputs['label']
    Xf, Mf, Df = (inputs['forward']['X'], inputs['forward']['missing_mask'],
                  inputs['forward']['deltas'])
    Xb, Mb, Db = (inputs['backward']['X'], inputs['backward']['missing_mask'],
                  inputs['backward']['deltas'])
    B, T, F = Xf.shape
    H = params_f['W_hh'].shape[1]
    C = params_f['W_cls'].shape[0]
    Bp = max(8, _round_up(B, 8))                 # pad batch to a full sublane tile

    Xf_t, Mf_t, Df_t, Wf_t = _prep_streams(Xf, Mf, Df, B, Bp)
    Xb_t, Mb_t, Db_t, Wb_t = _prep_streams(Xb, Mb, Db, B, Bp)

    def cat2(a, b):                               # lane-concat directions, flatten time-major
        return jnp.concatenate([a, b], axis=-1).reshape(T * Bp, 2 * F)

    vals = cat2(Xf_t, Xb_t)
    masks = cat2(Mf_t, Mb_t)
    deltas = cat2(Df_t, Db_t)
    wloss = cat2(Wf_t, Wb_t)

    w = _prep_weights(params_f, params_b, F, H)

    imputed, loss_acc, pred = brits_pallas_forward(
        vals, masks, deltas, wloss, w, T, Bp, F, H, C)

    # un-pad / un-concat
    imputed = imputed.reshape(T, Bp, 2 * F)[:, :B, :]
    imputed_f = jnp.transpose(imputed[..., :F], (1, 0, 2))   # (B, T, F)
    imputed_b = jnp.transpose(imputed[..., F:], (1, 0, 2))
    loss_sum = jnp.sum(loss_acc, axis=0)                     # (2F,)
    rec_f = jnp.sum(loss_sum[:F]) / T
    rec_b = jnp.sum(loss_sum[F:]) / T
    pred = pred[:B]
    pred_f, pred_b = pred[:, :C], pred[:, C:]

    # BRITS.reverse(): every tensor with dim > 1 in the backward result dict is
    # flipped along axis 1 — imputed_data (time) AND prediction (classes), a
    # quirk of the reference implementation reproduced here.  The flipped
    # final_hidden_state is unused downstream and therefore dropped.
    imputed_b = imputed_b[:, ::-1, :]
    pred_b = pred_b[:, ::-1]

    def nll(pred_p, lbl):
        logp = jnp.log(pred_p)
        picked = jnp.take_along_axis(logp, lbl[:, None], axis=1)[:, 0]
        return -jnp.mean(picked)

    cls_loss_f = nll(pred_f, label)
    cls_loss_b = nll(pred_b, label)
    consistency_loss = jnp.mean(jnp.abs(imputed_f - imputed_b)) * 1e-1
    classification_loss = (cls_loss_f + cls_loss_b) / 2.0

    return {
        'imputed_data': (imputed_f + imputed_b) / 2.0,
        'prediction': (pred_f + pred_b) / 2.0,
        'consistency_loss': consistency_loss,
        'classification_loss': classification_loss,
        'loss': (consistency_loss
                 + (rec_f + rec_b) * reconstruction_weight
                 + (cls_loss_f + cls_loss_b) * classification_weight),
    }


# ----------------------------------------------------------------------------
# Deterministic parameter init (shapes follow the PyTorch module __init__)
# ----------------------------------------------------------------------------
def init_rits_params(key, n_features, rnn_hidden_size, n_classes):
    F, H, C = n_features, rnn_hidden_size, n_classes
    ks = jax.random.split(key, 16)

    def u(k, shape, scale):
        return jax.random.uniform(k, shape, jnp.float32, -scale, scale)

    return {
        'W_gamma_h': u(ks[0], (H, F), 1.0 / math.sqrt(H)),
        'b_gamma_h': u(ks[1], (H,), 1.0 / math.sqrt(H)),
        'W_gamma_x': u(ks[2], (F, F), 1.0 / math.sqrt(F)),
        'b_gamma_x': u(ks[3], (F,), 1.0 / math.sqrt(F)),
        'W_hist':    u(ks[4], (F, H), 1.0 / math.sqrt(H)),
        'b_hist':    u(ks[5], (F,), 1.0 / math.sqrt(H)),
        'W_feat':    u(ks[6], (F, F), 1.0 / math.sqrt(F)),
        'b_feat':    u(ks[7], (F,), 1.0 / math.sqrt(F)),
        'W_comb':    u(ks[8], (F, 2 * F), 1.0 / math.sqrt(2 * F)),
        'b_comb':    u(ks[9], (F,), 1.0 / math.sqrt(2 * F)),
        'W_ih':      u(ks[10], (4 * H, 2 * F), 1.0 / math.sqrt(H)),
        'b_ih':      u(ks[11], (4 * H,), 1.0 / math.sqrt(H)),
        'W_hh':      u(ks[12], (4 * H, H), 1.0 / math.sqrt(H)),
        'b_hh':      u(ks[13], (4 * H,), 1.0 / math.sqrt(H)),
        'W_cls':     u(ks[14], (C, H), 1.0 / math.sqrt(H)),
        'b_cls':     u(ks[15], (C,), 1.0 / math.sqrt(H)),
    }


# ----------------------------------------------------------------------------
if __name__ == "__main__":
    B, T, F, H, C = 2, 8, 4, 32, 3

    key = jax.random.PRNGKey(0)
    k_x, k_m, k_lbl, k_pf, k_pb = jax.random.split(key, 5)

    X = jax.random.normal(k_x, (B, T, F), jnp.float32)
    M = (jax.random.uniform(k_m, (B, T, F)) > 0.2).astype(jnp.float32)

    def make_deltas(mask):
        ds = [jnp.zeros((B, F), jnp.float32)]
        prev = jnp.zeros((B, F), jnp.float32)
        for t in range(1, T):
            prev = 1.0 + (1.0 - mask[:, t - 1, :]) * prev
            ds.append(prev)
        return jnp.stack(ds, axis=1)

    D = make_deltas(M)
    Xb, Mb = X[:, ::-1, :], M[:, ::-1, :]
    Db = make_deltas(Mb)
    X = X * M          # missing entries zeroed, as in the dataset pipeline
    Xb = Xb * Mb
    label = jax.random.randint(k_lbl, (B,), 0, C)

    inputs = {
        'label': label,
        'forward': {'X': X, 'missing_mask': M, 'deltas': D},
        'backward': {'X': Xb, 'missing_mask': Mb, 'deltas': Db},
    }

    params_f = init_rits_params(k_pf, F, H, C)
    params_b = init_rits_params(k_pb, F, H, C)

    out = brits_forward(inputs, params_f, params_b,
                        classification_weight=1.0, reconstruction_weight=1.0)
    out = jax.tree_util.tree_map(jax.block_until_ready, out)
    print("KERNEL_OK")
</pallas_src>

<mosaic_0001>
module attributes {stable_mosaic.version = 11 : i64} {
  func.func @_brits_kernel(%arg0: memref<64x8xf32, #tpu.memory_space<vmem>>, %arg1: memref<64x8xf32, #tpu.memory_space<vmem>>, %arg2: memref<64x8xf32, #tpu.memory_space<vmem>>, %arg3: memref<64x8xf32, #tpu.memory_space<vmem>>, %arg4: memref<8x72xf32, #tpu.memory_space<vmem>>, %arg5: memref<1x72xf32, #tpu.memory_space<vmem>>, %arg6: memref<8x264xf32, #tpu.memory_space<vmem>>, %arg7: memref<1x264xf32, #tpu.memory_space<vmem>>, %arg8: memref<8x8xf32, #tpu.memory_space<vmem>>, %arg9: memref<64x264xf32, #tpu.memory_space<vmem>>, %arg10: memref<1x8xf32, #tpu.memory_space<vmem>>, %arg11: memref<8x8xf32, #tpu.memory_space<vmem>>, %arg12: memref<1x8xf32, #tpu.memory_space<vmem>>, %arg13: memref<8x256xf32, #tpu.memory_space<vmem>>, %arg14: memref<64x6xf32, #tpu.memory_space<vmem>>, %arg15: memref<1x6xf32, #tpu.memory_space<vmem>>, %arg16: memref<64x8xf32, #tpu.memory_space<vmem>>, %arg17: memref<8x8xf32, #tpu.memory_space<vmem>>, %arg18: memref<8x6xf32, #tpu.memory_space<vmem>>, %arg19: memref<8x64xf32, #tpu.memory_space<vmem>>, %arg20: memref<8x64xf32, #tpu.memory_space<vmem>>, %arg21: memref<8x8xf32, #tpu.memory_space<vmem>>, %arg22: memref<64x64xf32, #tpu.memory_space<vmem>>, %arg23: memref<64x8xf32, #tpu.memory_space<vmem>>, %arg24: memref<64x256xf32, #tpu.memory_space<vmem>>) attributes {dimension_semantics = [], scalar_prefetch = 0 : i64, scratch_operands = 6 : i64, tpu.core_type = #tpu.core_type<tc>} {
    %c0 = arith.constant 0 : index
    %c0_0 = arith.constant 0 : index
    %0 = vector.load %arg2[%c0, %c0_0] : memref<64x8xf32, #tpu.memory_space<vmem>>, vector<64x8xf32>
    %c0_1 = arith.constant 0 : index
    %c0_2 = arith.constant 0 : index
    %1 = vector.load %arg1[%c0_1, %c0_2] : memref<64x8xf32, #tpu.memory_space<vmem>>, vector<64x8xf32>
    %c0_3 = arith.constant 0 : index
    %c0_4 = arith.constant 0 : index
    %2 = vector.load %arg4[%c0_3, %c0_4] : memref<8x72xf32, #tpu.memory_space<vmem>>, vector<8x72xf32>
    %cst = arith.constant dense<0.000000e+00> : vector<64x72xf32>
    %3 = tpu.matmul %0, %2, %cst {dimension_numbers = #tpu.dot_dimension_numbers<[1], [0], [0], [1], [0, 0, 1, 1], [], []>} : vector<64x8xf32>, vector<8x72xf32>, vector<64x72xf32> -> vector<64x72xf32>
    %c0_5 = arith.constant 0 : index
    %c0_6 = arith.constant 0 : index
    %4 = vector.load %arg5[%c0_5, %c0_6] : memref<1x72xf32, #tpu.memory_space<vmem>>, vector<1x72xf32>
    %5 = vector.broadcast %4 : vector<1x72xf32> to vector<64x72xf32>
    %6 = arith.addf %3, %5 : vector<64x72xf32>
    %cst_7 = arith.constant 0.000000e+00 : f32
    %7 = vector.broadcast %cst_7 : f32 to vector<64x72xf32>
    %8 = arith.maximumf %6, %7 : vector<64x72xf32>
    %cst_8 = arith.constant 0.000000e+00 : f32
    %9 = vector.broadcast %cst_8 : f32 to vector<64x72xf32>
    %10 = arith.subf %9, %8 : vector<64x72xf32>
    %11 = math.exp %10 : vector<64x72xf32>
    %12 = vector.extract_strided_slice %11 {offsets = [0, 0], sizes = [64, 64], strides = [1, 1]} : vector<64x72xf32> to vector<64x64xf32>
    %c0_9 = arith.constant 0 : index
    %c0_10 = arith.constant 0 : index
    %13 = vector.load %arg22[%c0_9, %c0_10] : memref<64x64xf32, #tpu.memory_space<vmem>>, vector<64x64xf32>
    tpu.vector_store %arg22[%c0_9, %c0_10], %12 {strides = array<i32>} : memref<64x64xf32, #tpu.memory_space<vmem>>, vector<64x64xf32>,
    %14 = vector.extract_strided_slice %11 {offsets = [0, 64], sizes = [64, 8], strides = [1, 1]} : vector<64x72xf32> to vector<64x8xf32>
    %c0_11 = arith.constant 0 : index
    %c0_12 = arith.constant 0 : index
    %15 = vector.load %arg6[%c0_11, %c0_12] : memref<8x264xf32, #tpu.memory_space<vmem>>, vector<8x264xf32>
    %cst_13 = arith.constant dense<0.000000e+00> : vector<64x264xf32>
    %16 = tpu.matmul %1, %15, %cst_13 {dimension_numbers = #tpu.dot_dimension_numbers<[1], [0], [0], [1], [0, 0, 1, 1], [], []>} : vector<64x8xf32>, vector<8x264xf32>, vector<64x264xf32> -> vector<64x264xf32>
    %c0_14 = arith.constant 0 : index
    %c0_15 = arith.constant 0 : index
    %17 = vector.load %arg7[%c0_14, %c0_15] : memref<1x264xf32, #tpu.memory_space<vmem>>, vector<1x264xf32>
    %18 = vector.broadcast %17 : vector<1x264xf32> to vector<64x264xf32>
    %19 = arith.addf %16, %18 : vector<64x264xf32>
    %20 = vector.extract_strided_slice %19 {offsets = [0, 0], sizes = [64, 256], strides = [1, 1]} : vector<64x264xf32> to vector<64x256xf32>
    %c0_16 = arith.constant 0 : index
    %c0_17 = arith.constant 0 : index
    %21 = vector.load %arg24[%c0_16, %c0_17] : memref<64x256xf32, #tpu.memory_space<vmem>>, vector<64x256xf32>
    tpu.vector_store %arg24[%c0_16, %c0_17], %20 {strides = array<i32>} : memref<64x256xf32, #tpu.memory_space<vmem>>, vector<64x256xf32>,
    %c0_18 = arith.constant 0 : index
    %c0_19 = arith.constant 0 : index
    %22 = vector.load %arg8[%c0_18, %c0_19] : memref<8x8xf32, #tpu.memory_space<vmem>>, vector<8x8xf32>
    %cst_20 = arith.constant dense<0.000000e+00> : vector<64x8xf32>
    %23 = tpu.matmul %14, %22, %cst_20 {dimension_numbers = #tpu.dot_dimension_numbers<[1], [0], [0], [1], [0, 0, 1, 1], [], []>} : vector<64x8xf32>, vector<8x8xf32>, vector<64x8xf32> -> vector<64x8xf32>
    %24 = vector.extract_strided_slice %19 {offsets = [0, 256], sizes = [64, 8], strides = [1, 1]} : vector<64x264xf32> to vector<64x8xf32>
    %25 = arith.addf %23, %24 : vector<64x8xf32>
    %26 = arith.negf %25 : vector<64x8xf32>
    %27 = math.exp %26 : vector<64x8xf32>
    %cst_21 = arith.constant 1.000000e+00 : f32
    %28 = vector.broadcast %cst_21 : f32 to vector<64x8xf32>
    %29 = arith.addf %28, %27 : vector<64x8xf32>
    %30 = arith.divf %28, %29 : vector<64x8xf32>
    %c0_22 = arith.constant 0 : index
    %c0_23 = arith.constant 0 : index
    %31 = vector.load %arg23[%c0_22, %c0_23] : memref<64x8xf32, #tpu.memory_space<vmem>>, vector<64x8xf32>
    tpu.vector_store %arg23[%c0_22, %c0_23], %30 {strides = array<i32>} : memref<64x8xf32, #tpu.memory_space<vmem>>, vector<64x8xf32>,
    %cst_24 = arith.constant 0.000000e+00 : f32
    %32 = vector.broadcast %cst_24 : f32 to vector<8x64xf32>
    %c0_25 = arith.constant 0 : index
    %c0_26 = arith.constant 0 : index
    %33 = vector.load %arg19[%c0_25, %c0_26] : memref<8x64xf32, #tpu.memory_space<vmem>>, vector<8x64xf32>
    tpu.vector_store %arg19[%c0_25, %c0_26], %32 {strides = array<i32>} : memref<8x64xf32, #tpu.memory_space<vmem>>, vector<8x64xf32>,
    %cst_27 = arith.constant 0.000000e+00 : f32
    %34 = vector.broadcast %cst_27 : f32 to vector<8x64xf32>
    %c0_28 = arith.constant 0 : index
    %c0_29 = arith.constant 0 : index
    %35 = vector.load %arg20[%c0_28, %c0_29] : memref<8x64xf32, #tpu.memory_space<vmem>>, vector<8x64xf32>
    tpu.vector_store %arg20[%c0_28, %c0_29], %34 {strides = array<i32>} : memref<8x64xf32, #tpu.memory_space<vmem>>, vector<8x64xf32>,
    %cst_30 = arith.constant 0.000000e+00 : f32
    %36 = vector.broadcast %cst_30 : f32 to vector<8x8xf32>
    %c0_31 = arith.constant 0 : index
    %c0_32 = arith.constant 0 : index
    %37 = vector.load %arg21[%c0_31, %c0_32] : memref<8x8xf32, #tpu.memory_space<vmem>>, vector<8x8xf32>
    tpu.vector_store %arg21[%c0_31, %c0_32], %36 {strides = array<i32>} : memref<8x8xf32, #tpu.memory_space<vmem>>, vector<8x8xf32>,
    %c0_i32 = arith.constant 0 : i32
    %c8_i32 = arith.constant 8 : i32
    %38 = arith.muli %c0_i32, %c8_i32 : i32
    %39 = tpu.assume_multiple %38, 8 : i32
    %40 = arith.index_cast %39 : i32 to index
    %c0_33 = arith.constant 0 : index
    %41 = vector.load %arg0[%40, %c0_33] : memref<64x8xf32, #tpu.memory_space<vmem>>, vector<8x8xf32>
    %42 = arith.index_cast %39 : i32 to index
    %c0_34 = arith.constant 0 : index
    %43 = vector.load %arg1[%42, %c0_34] : memref<64x8xf32, #tpu.memory_space<vmem>>, vector<8x8xf32>
    %c0_35 = arith.constant 0 : index
    %c0_36 = arith.constant 0 : index
    %44 = vector.load %arg19[%c0_35, %c0_36] : memref<8x64xf32, #tpu.memory_space<vmem>>, vector<8x64xf32>
    %45 = arith.index_cast %39 : i32 to index
    %c0_37 = arith.constant 0 : index
    %46 = vector.load %arg22[%45, %c0_37] : memref<64x64xf32, #tpu.memory_space<vmem>>, vector<8x64xf32>
    %47 = arith.mulf %44, %46 : vector<8x64xf32>
    %c0_38 = arith.constant 0 : index
    %c0_39 = arith.constant 0 : index
    %48 = vector.load %arg20[%c0_38, %c0_39] : memref<8x64xf32, #tpu.memory_space<vmem>>, vector<8x64xf32>
    %c0_40 = arith.constant 0 : index
    %c0_41 = arith.constant 0 : index
    %49 = vector.load %arg9[%c0_40, %c0_41] : memref<64x264xf32, #tpu.memory_space<vmem>>, vector<64x264xf32>
    %cst_42 = arith.constant dense<0.000000e+00> : vector<8x264xf32>
    %50 = tpu.matmul %47, %49, %cst_42 {dimension_numbers = #tpu.dot_dimension_numbers<[1], [0], [0], [1], [0, 0, 1, 1], [], []>} : vector<8x64xf32>, vector<64x264xf32>, vector<8x264xf32> -> vector<8x264xf32>
    %51 = vector.extract_strided_slice %50 {offsets = [0, 0], sizes = [8, 256], strides = [1, 1]} : vector<8x264xf32> to vector<8x256xf32>
    %52 = vector.extract_strided_slice %50 {offsets = [0, 256], sizes = [8, 8], strides = [1, 1]} : vector<8x264xf32> to vector<8x8xf32>
    %c0_43 = arith.constant 0 : index
    %c0_44 = arith.constant 0 : index
    %53 = vector.load %arg10[%c0_43, %c0_44] : memref<1x8xf32, #tpu.memory_space<vmem>>, vector<1x8xf32>
    %54 = vector.broadcast %53 : vector<1x8xf32> to vector<8x8xf32>
    %55 = arith.addf %52, %54 : vector<8x8xf32>
    %cst_45 = arith.constant 1.000000e+00 : f32
    %56 = vector.broadcast %cst_45 : f32 to vector<8x8xf32>
    %57 = arith.subf %56, %43 : vector<8x8xf32>
    %58 = arith.mulf %43, %41 : vector<8x8xf32>
    %59 = arith.mulf %57, %55 : vector<8x8xf32>
    %60 = arith.addf %58, %59 : vector<8x8xf32>
    %c0_46 = arith.constant 0 : index
    %c0_47 = arith.constant 0 : index
    %61 = vector.load %arg11[%c0_46, %c0_47] : memref<8x8xf32, #tpu.memory_space<vmem>>, vector<8x8xf32>
    %cst_48 = arith.constant dense<0.000000e+00> : vector<8x8xf32>
    %62 = tpu.matmul %60, %61, %cst_48 {dimension_numbers = #tpu.dot_dimension_numbers<[1], [0], [0], [1], [0, 0, 1, 1], [], []>} : vector<8x8xf32>, vector<8x8xf32>, vector<8x8xf32> -> vector<8x8xf32>
    %c0_49 = arith.constant 0 : index
    %c0_50 = arith.constant 0 : index
    %63 = vector.load %arg12[%c0_49, %c0_50] : memref<1x8xf32, #tpu.memory_space<vmem>>, vector<1x8xf32>
    %64 = vector.broadcast %63 : vector<1x8xf32> to vector<8x8xf32>
    %65 = arith.addf %62, %64 : vector<8x8xf32>
    %66 = arith.index_cast %39 : i32 to index
    %c0_51 = arith.constant 0 : index
    %67 = vector.load %arg23[%66, %c0_51] : memref<64x8xf32, #tpu.memory_space<vmem>>, vector<8x8xf32>
    %68 = arith.mulf %67, %65 : vector<8x8xf32>
    %cst_52 = arith.constant 1.000000e+00 : f32
    %69 = vector.broadcast %cst_52 : f32 to vector<8x8xf32>
    %70 = arith.subf %69, %67 : vector<8x8xf32>
    %71 = arith.mulf %70, %55 : vector<8x8xf32>
    %72 = arith.addf %68, %71 : vector<8x8xf32>
    %73 = arith.mulf %43, %41 : vector<8x8xf32>
    %74 = arith.mulf %57, %72 : vector<8x8xf32>
    %75 = arith.addf %73, %74 : vector<8x8xf32>
    %c0_53 = arith.constant 0 : index
    %c0_54 = arith.constant 0 : index
    %76 = vector.load %arg13[%c0_53, %c0_54] : memref<8x256xf32, #tpu.memory_space<vmem>>, vector<8x256xf32>
    %cst_55 = arith.constant dense<0.000000e+00> : vector<8x256xf32>
    %77 = tpu.matmul %75, %76, %cst_55 {dimension_numbers = #tpu.dot_dimension_numbers<[1], [0], [0], [1], [0, 0, 1, 1], [], []>} : vector<8x8xf32>, vector<8x256xf32>, vector<8x256xf32> -> vector<8x256xf32>
    %78 = arith.index_cast %39 : i32 to index
    %c0_56 = arith.constant 0 : index
    %79 = vector.load %arg24[%78, %c0_56] : memref<64x256xf32, #tpu.memory_space<vmem>>, vector<8x256xf32>
    %80 = arith.addf %77, %79 : vector<8x256xf32>
    %81 = arith.addf %80, %51 : vector<8x256xf32>
    %82 = vector.extract_strided_slice %81 {offsets = [0, 0], sizes = [8, 64], strides = [1, 1]} : vector<8x256xf32> to vector<8x64xf32>
    %83 = arith.negf %82 : vector<8x64xf32>
    %84 = math.exp %83 : vector<8x64xf32>
    %cst_57 = arith.constant 1.000000e+00 : f32
    %85 = vector.broadcast %cst_57 : f32 to vector<8x64xf32>
    %86 = arith.addf %85, %84 : vector<8x64xf32>
    %87 = arith.divf %85, %86 : vector<8x64xf32>
    %88 = vector.extract_strided_slice %81 {offsets = [0, 64], sizes = [8, 64], strides = [1, 1]} : vector<8x256xf32> to vector<8x64xf32>
    %89 = arith.negf %88 : vector<8x64xf32>
    %90 = math.exp %89 : vector<8x64xf32>
    %cst_58 = arith.constant 1.000000e+00 : f32
    %91 = vector.broadcast %cst_58 : f32 to vector<8x64xf32>
    %92 = arith.addf %91, %90 : vector<8x64xf32>
    %93 = arith.divf %91, %92 : vector<8x64xf32>
    %94 = vector.extract_strided_slice %81 {offsets = [0, 128], sizes = [8, 64], strides = [1, 1]} : vector<8x256xf32> to vector<8x64xf32>
    %95 = math.tanh %94 : vector<8x64xf32>
    %96 = vector.extract_strided_slice %81 {offsets = [0, 192], sizes = [8, 64], strides = [1, 1]} : vector<8x256xf32> to vector<8x64xf32>
    %97 = arith.negf %96 : vector<8x64xf32>
    %98 = math.exp %97 : vector<8x64xf32>
    %cst_59 = arith.constant 1.000000e+00 : f32
    %99 = vector.broadcast %cst_59 : f32 to vector<8x64xf32>
    %100 = arith.addf %99, %98 : vector<8x64xf32>
    %101 = arith.divf %99, %100 : vector<8x64xf32>
    %102 = arith.mulf %93, %48 : vector<8x64xf32>
    %103 = arith.mulf %87, %95 : vector<8x64xf32>
    %104 = arith.addf %102, %103 : vector<8x64xf32>
    %105 = math.tanh %104 : vector<8x64xf32>
    %106 = arith.mulf %101, %105 : vector<8x64xf32>
    %c0_60 = arith.constant 0 : index
    %c0_61 = arith.constant 0 : index
    %107 = vector.load %arg19[%c0_60, %c0_61] : memref<8x64xf32, #tpu.memory_space<vmem>>, vector<8x64xf32>
    tpu.vector_store %arg19[%c0_60, %c0_61], %106 {strides = array<i32>} : memref<8x64xf32, #tpu.memory_space<vmem>>, vector<8x64xf32>,
    %c0_62 = arith.constant 0 : index
    %c0_63 = arith.constant 0 : index
    %108 = vector.load %arg20[%c0_62, %c0_63] : memref<8x64xf32, #tpu.memory_space<vmem>>, vector<8x64xf32>
    tpu.vector_store %arg20[%c0_62, %c0_63], %104 {strides = array<i32>} : memref<8x64xf32, #tpu.memory_space<vmem>>, vector<8x64xf32>,
    %c0_64 = arith.constant 0 : index
    %c0_65 = arith.constant 0 : index
    %109 = vector.load %arg21[%c0_64, %c0_65] : memref<8x8xf32, #tpu.memory_space<vmem>>, vector<8x8xf32>
    %110 = arith.subf %55, %41 : vector<8x8xf32>
    %111 = math.absf %110 : vector<8x8xf32>
    %112 = arith.subf %65, %41 : vector<8x8xf32>
    %113 = math.absf %112 : vector<8x8xf32>
    %114 = arith.addf %111, %113 : vector<8x8xf32>
    %115 = arith.subf %72, %41 : vector<8x8xf32>
    %116 = math.absf %115 : vector<8x8xf32>
    %117 = arith.addf %114, %116 : vector<8x8xf32>
    %118 = arith.index_cast %39 : i32 to index
    %c0_66 = arith.constant 0 : index
    %119 = vector.load %arg3[%118, %c0_66] : memref<64x8xf32, #tpu.memory_space<vmem>>, vector<8x8xf32>
    %120 = arith.mulf %117, %119 : vector<8x8xf32>
    %121 = arith.addf %109, %120 : vector<8x8xf32>
    %c0_67 = arith.constant 0 : index
    %c0_68 = arith.constant 0 : index
    %122 = vector.load %arg21[%c0_67, %c0_68] : memref<8x8xf32, #tpu.memory_space<vmem>>, vector<8x8xf32>
    tpu.vector_store %arg21[%c0_67, %c0_68], %121 {strides = array<i32>} : memref<8x8xf32, #tpu.memory_space<vmem>>, vector<8x8xf32>,
    %123 = arith.index_cast %39 : i32 to index
    %c0_69 = arith.constant 0 : index
    %124 = vector.load %arg16[%123, %c0_69] : memref<64x8xf32, #tpu.memory_space<vmem>>, vector<8x8xf32>
    tpu.vector_store %arg16[%123, %c0_69], %75 {strides = array<i32>} : memref<64x8xf32, #tpu.memory_space<vmem>>, vector<8x8xf32>,
    %c1_i32 = arith.constant 1 : i32
    %c8_i32_70 = arith.constant 8 : i32
    %125 = arith.muli %c1_i32, %c8_i32_70 : i32
    %126 = tpu.assume_multiple %125, 8 : i32
    %127 = arith.index_cast %126 : i32 to index
    %c0_71 = arith.constant 0 : index
    %128 = vector.load %arg0[%127, %c0_71] : memref<64x8xf32, #tpu.memory_space<vmem>>, vector<8x8xf32>
    %129 = arith.index_cast %126 : i32 to index
    %c0_72 = arith.constant 0 : index
    %130 = vector.load %arg1[%129, %c0_72] : memref<64x8xf32, #tpu.memory_space<vmem>>, vector<8x8xf32>
    %c0_73 = arith.constant 0 : index
    %c0_74 = arith.constant 0 : index
    %131 = vector.load %arg19[%c0_73, %c0_74] : memref<8x64xf32, #tpu.memory_space<vmem>>, vector<8x64xf32>
    %132 = arith.index_cast %126 : i32 to index
    %c0_75 = arith.constant 0 : index
    %133 = vector.load %arg22[%132, %c0_75] : memref<64x64xf32, #tpu.memory_space<vmem>>, vector<8x64xf32>
    %134 = arith.mulf %131, %133 : vector<8x64xf32>
    %c0_76 = arith.constant 0 : index
    %c0_77 = arith.constant 0 : index
    %135 = vector.load %arg20[%c0_76, %c0_77] : memref<8x64xf32, #tpu.memory_space<vmem>>, vector<8x64xf32>
    %c0_78 = arith.constant 0 : index
    %c0_79 = arith.constant 0 : index
    %136 = vector.load %arg9[%c0_78, %c0_79] : memref<64x264xf32, #tpu.memory_space<vmem>>, vector<64x264xf32>
    %cst_80 = arith.constant dense<0.000000e+00> : vector<8x264xf32>
    %137 = tpu.matmul %134, %136, %cst_80 {dimension_numbers = #tpu.dot_dimension_numbers<[1], [0], [0], [1], [0, 0, 1, 1], [], []>} : vector<8x64xf32>, vector<64x264xf32>, vector<8x264xf32> -> vector<8x264xf32>
    %138 = vector.extract_strided_slice %137 {offsets = [0, 0], sizes = [8, 256], strides = [1, 1]} : vector<8x264xf32> to vector<8x256xf32>
    %139 = vector.extract_strided_slice %137 {offsets = [0, 256], sizes = [8, 8], strides = [1, 1]} : vector<8x264xf32> to vector<8x8xf32>
    %c0_81 = arith.constant 0 : index
    %c0_82 = arith.constant 0 : index
    %140 = vector.load %arg10[%c0_81, %c0_82] : memref<1x8xf32, #tpu.memory_space<vmem>>, vector<1x8xf32>
    %141 = vector.broadcast %140 : vector<1x8xf32> to vector<8x8xf32>
    %142 = arith.addf %139, %141 : vector<8x8xf32>
    %cst_83 = arith.constant 1.000000e+00 : f32
    %143 = vector.broadcast %cst_83 : f32 to vector<8x8xf32>
    %144 = arith.subf %143, %130 : vector<8x8xf32>
    %145 = arith.mulf %130, %128 : vector<8x8xf32>
    %146 = arith.mulf %144, %142 : vector<8x8xf32>
    %147 = arith.addf %145, %146 : vector<8x8xf32>
    %c0_84 = arith.constant 0 : index
    %c0_85 = arith.constant 0 : index
    %148 = vector.load %arg11[%c0_84, %c0_85] : memref<8x8xf32, #tpu.memory_space<vmem>>, vector<8x8xf32>
    %cst_86 = arith.constant dense<0.000000e+00> : vector<8x8xf32>
    %149 = tpu.matmul %147, %148, %cst_86 {dimension_numbers = #tpu.dot_dimension_numbers<[1], [0], [0], [1], [0, 0, 1, 1], [], []>} : vector<8x8xf32>, vector<8x8xf32>, vector<8x8xf32> -> vector<8x8xf32>
    %c0_87 = arith.constant 0 : index
    %c0_88 = arith.constant 0 : index
    %150 = vector.load %arg12[%c0_87, %c0_88] : memref<1x8xf32, #tpu.memory_space<vmem>>, vector<1x8xf32>
    %151 = vector.broadcast %150 : vector<1x8xf32> to vector<8x8xf32>
    %152 = arith.addf %149, %151 : vector<8x8xf32>
    %153 = arith.index_cast %126 : i32 to index
    %c0_89 = arith.constant 0 : index
    %154 = vector.load %arg23[%153, %c0_89] : memref<64x8xf32, #tpu.memory_space<vmem>>, vector<8x8xf32>
    %155 = arith.mulf %154, %152 : vector<8x8xf32>
    %cst_90 = arith.constant 1.000000e+00 : f32
    %156 = vector.broadcast %cst_90 : f32 to vector<8x8xf32>
    %157 = arith.subf %156, %154 : vector<8x8xf32>
    %158 = arith.mulf %157, %142 : vector<8x8xf32>
    %159 = arith.addf %155, %158 : vector<8x8xf32>
    %160 = arith.mulf %130, %128 : vector<8x8xf32>
    %161 = arith.mulf %144, %159 : vector<8x8xf32>
    %162 = arith.addf %160, %161 : vector<8x8xf32>
    %c0_91 = arith.constant 0 : index
    %c0_92 = arith.constant 0 : index
    %163 = vector.load %arg13[%c0_91, %c0_92] : memref<8x256xf32, #tpu.memory_space<vmem>>, vector<8x256xf32>
    %cst_93 = arith.constant dense<0.000000e+00> : vector<8x256xf32>
    %164 = tpu.matmul %162, %163, %cst_93 {dimension_numbers = #tpu.dot_dimension_numbers<[1], [0], [0], [1], [0, 0, 1, 1], [], []>} : vector<8x8xf32>, vector<8x256xf32>, vector<8x256xf32> -> vector<8x256xf32>
    %165 = arith.index_cast %126 : i32 to index
    %c0_94 = arith.constant 0 : index
    %166 = vector.load %arg24[%165, %c0_94] : memref<64x256xf32, #tpu.memory_space<vmem>>, vector<8x256xf32>
    %167 = arith.addf %164, %166 : vector<8x256xf32>
    %168 = arith.addf %167, %138 : vector<8x256xf32>
    %169 = vector.extract_strided_slice %168 {offsets = [0, 0], sizes = [8, 64], strides = [1, 1]} : vector<8x256xf32> to vector<8x64xf32>
    %170 = arith.negf %169 : vector<8x64xf32>
    %171 = math.exp %170 : vector<8x64xf32>
    %cst_95 = arith.constant 1.000000e+00 : f32
    %172 = vector.broadcast %cst_95 : f32 to vector<8x64xf32>
    %173 = arith.addf %172, %171 : vector<8x64xf32>
    %174 = arith.divf %172, %173 : vector<8x64xf32>
    %175 = vector.extract_strided_slice %168 {offsets = [0, 64], sizes = [8, 64], strides = [1, 1]} : vector<8x256xf32> to vector<8x64xf32>
    %176 = arith.negf %175 : vector<8x64xf32>
    %177 = math.exp %176 : vector<8x64xf32>
    %cst_96 = arith.constant 1.000000e+00 : f32
    %178 = vector.broadcast %cst_96 : f32 to vector<8x64xf32>
    %179 = arith.addf %178, %177 : vector<8x64xf32>
    %180 = arith.divf %178, %179 : vector<8x64xf32>
    %181 = vector.extract_strided_slice %168 {offsets = [0, 128], sizes = [8, 64], strides = [1, 1]} : vector<8x256xf32> to vector<8x64xf32>
    %182 = math.tanh %181 : vector<8x64xf32>
    %183 = vector.extract_strided_slice %168 {offsets = [0, 192], sizes = [8, 64], strides = [1, 1]} : vector<8x256xf32> to vector<8x64xf32>
    %184 = arith.negf %183 : vector<8x64xf32>
    %185 = math.exp %184 : vector<8x64xf32>
    %cst_97 = arith.constant 1.000000e+00 : f32
    %186 = vector.broadcast %cst_97 : f32 to vector<8x64xf32>
    %187 = arith.addf %186, %185 : vector<8x64xf32>
    %188 = arith.divf %186, %187 : vector<8x64xf32>
    %189 = arith.mulf %180, %135 : vector<8x64xf32>
    %190 = arith.mulf %174, %182 : vector<8x64xf32>
    %191 = arith.addf %189, %190 : vector<8x64xf32>
    %192 = math.tanh %191 : vector<8x64xf32>
    %193 = arith.mulf %188, %192 : vector<8x64xf32>
    %c0_98 = arith.constant 0 : index
    %c0_99 = arith.constant 0 : index
    %194 = vector.load %arg19[%c0_98, %c0_99] : memref<8x64xf32, #tpu.memory_space<vmem>>, vector<8x64xf32>
    tpu.vector_store %arg19[%c0_98, %c0_99], %193 {strides = array<i32>} : memref<8x64xf32, #tpu.memory_space<vmem>>, vector<8x64xf32>,
    %c0_100 = arith.constant 0 : index
    %c0_101 = arith.constant 0 : index
    %195 = vector.load %arg20[%c0_100, %c0_101] : memref<8x64xf32, #tpu.memory_space<vmem>>, vector<8x64xf32>
    tpu.vector_store %arg20[%c0_100, %c0_101], %191 {strides = array<i32>} : memref<8x64xf32, #tpu.memory_space<vmem>>, vector<8x64xf32>,
    %c0_102 = arith.constant 0 : index
    %c0_103 = arith.constant 0 : index
    %196 = vector.load %arg21[%c0_102, %c0_103] : memref<8x8xf32, #tpu.memory_space<vmem>>, vector<8x8xf32>
    %197 = arith.subf %142, %128 : vector<8x8xf32>
    %198 = math.absf %197 : vector<8x8xf32>
    %199 = arith.subf %152, %128 : vector<8x8xf32>
    %200 = math.absf %199 : vector<8x8xf32>
    %201 = arith.addf %198, %200 : vector<8x8xf32>
    %202 = arith.subf %159, %128 : vector<8x8xf32>
    %203 = math.absf %202 : vector<8x8xf32>
    %204 = arith.addf %201, %203 : vector<8x8xf32>
    %205 = arith.index_cast %126 : i32 to index
    %c0_104 = arith.constant 0 : index
    %206 = vector.load %arg3[%205, %c0_104] : memref<64x8xf32, #tpu.memory_space<vmem>>, vector<8x8xf32>
    %207 = arith.mulf %204, %206 : vector<8x8xf32>
    %208 = arith.addf %196, %207 : vector<8x8xf32>
    %c0_105 = arith.constant 0 : index
    %c0_106 = arith.constant 0 : index
    %209 = vector.load %arg21[%c0_105, %c0_106] : memref<8x8xf32, #tpu.memory_space<vmem>>, vector<8x8xf32>
    tpu.vector_store %arg21[%c0_105, %c0_106], %208 {strides = array<i32>} : memref<8x8xf32, #tpu.memory_space<vmem>>, vector<8x8xf32>,
    %210 = arith.index_cast %126 : i32 to index
    %c0_107 = arith.constant 0 : index
    %211 = vector.load %arg16[%210, %c0_107] : memref<64x8xf32, #tpu.memory_space<vmem>>, vector<8x8xf32>
    tpu.vector_store %arg16[%210, %c0_107], %162 {strides = array<i32>} : memref<64x8xf32, #tpu.memory_space<vmem>>, vector<8x8xf32>,
    %c2_i32 = arith.constant 2 : i32
    %c8_i32_108 = arith.constant 8 : i32
    %212 = arith.muli %c2_i32, %c8_i32_108 : i32
    %213 = tpu.assume_multiple %212, 8 : i32
    %214 = arith.index_cast %213 : i32 to index
    %c0_109 = arith.constant 0 : index
    %215 = vector.load %arg0[%214, %c0_109] : memref<64x8xf32, #tpu.memory_space<vmem>>, vector<8x8xf32>
    %216 = arith.index_cast %213 : i32 to index
    %c0_110 = arith.constant 0 : index
    %217 = vector.load %arg1[%216, %c0_110] : memref<64x8xf32, #tpu.memory_space<vmem>>, vector<8x8xf32>
    %c0_111 = arith.constant 0 : index
    %c0_112 = arith.constant 0 : index
    %218 = vector.load %arg19[%c0_111, %c0_112] : memref<8x64xf32, #tpu.memory_space<vmem>>, vector<8x64xf32>
    %219 = arith.index_cast %213 : i32 to index
    %c0_113 = arith.constant 0 : index
    %220 = vector.load %arg22[%219, %c0_113] : memref<64x64xf32, #tpu.memory_space<vmem>>, vector<8x64xf32>
    %221 = arith.mulf %218, %220 : vector<8x64xf32>
    %c0_114 = arith.constant 0 : index
    %c0_115 = arith.constant 0 : index
    %222 = vector.load %arg20[%c0_114, %c0_115] : memref<8x64xf32, #tpu.memory_space<vmem>>, vector<8x64xf32>
    %c0_116 = arith.constant 0 : index
    %c0_117 = arith.constant 0 : index
    %223 = vector.load %arg9[%c0_116, %c0_117] : memref<64x264xf32, #tpu.memory_space<vmem>>, vector<64x264xf32>
    %cst_118 = arith.constant dense<0.000000e+00> : vector<8x264xf32>
    %224 = tpu.matmul %221, %223, %cst_118 {dimension_numbers = #tpu.dot_dimension_numbers<[1], [0], [0], [1], [0, 0, 1, 1], [], []>} : vector<8x64xf32>, vector<64x264xf32>, vector<8x264xf32> -> vector<8x264xf32>
    %225 = vector.extract_strided_slice %224 {offsets = [0, 0], sizes = [8, 256], strides = [1, 1]} : vector<8x264xf32> to vector<8x256xf32>
    %226 = vector.extract_strided_slice %224 {offsets = [0, 256], sizes = [8, 8], strides = [1, 1]} : vector<8x264xf32> to vector<8x8xf32>
    %c0_119 = arith.constant 0 : index
    %c0_120 = arith.constant 0 : index
    %227 = vector.load %arg10[%c0_119, %c0_120] : memref<1x8xf32, #tpu.memory_space<vmem>>, vector<1x8xf32>
    %228 = vector.broadcast %227 : vector<1x8xf32> to vector<8x8xf32>
    %229 = arith.addf %226, %228 : vector<8x8xf32>
    %cst_121 = arith.constant 1.000000e+00 : f32
    %230 = vector.broadcast %cst_121 : f32 to vector<8x8xf32>
    %231 = arith.subf %230, %217 : vector<8x8xf32>
    %232 = arith.mulf %217, %215 : vector<8x8xf32>
    %233 = arith.mulf %231, %229 : vector<8x8xf32>
    %234 = arith.addf %232, %233 : vector<8x8xf32>
    %c0_122 = arith.constant 0 : index
    %c0_123 = arith.constant 0 : index
    %235 = vector.load %arg11[%c0_122, %c0_123] : memref<8x8xf32, #tpu.memory_space<vmem>>, vector<8x8xf32>
    %cst_124 = arith.constant dense<0.000000e+00> : vector<8x8xf32>
    %236 = tpu.matmul %234, %235, %cst_124 {dimension_numbers = #tpu.dot_dimension_numbers<[1], [0], [0], [1], [0, 0, 1, 1], [], []>} : vector<8x8xf32>, vector<8x8xf32>, vector<8x8xf32> -> vector<8x8xf32>
    %c0_125 = arith.constant 0 : index
    %c0_126 = arith.constant 0 : index
    %237 = vector.load %arg12[%c0_125, %c0_126] : memref<1x8xf32, #tpu.memory_space<vmem>>, vector<1x8xf32>
    %238 = vector.broadcast %237 : vector<1x8xf32> to vector<8x8xf32>
    %239 = arith.addf %236, %238 : vector<8x8xf32>
    %240 = arith.index_cast %213 : i32 to index
    %c0_127 = arith.constant 0 : index
    %241 = vector.load %arg23[%240, %c0_127] : memref<64x8xf32, #tpu.memory_space<vmem>>, vector<8x8xf32>
    %242 = arith.mulf %241, %239 : vector<8x8xf32>
    %cst_128 = arith.constant 1.000000e+00 : f32
    %243 = vector.broadcast %cst_128 : f32 to vector<8x8xf32>
    %244 = arith.subf %243, %241 : vector<8x8xf32>
    %245 = arith.mulf %244, %229 : vector<8x8xf32>
    %246 = arith.addf %242, %245 : vector<8x8xf32>
    %247 = arith.mulf %217, %215 : vector<8x8xf32>
    %248 = arith.mulf %231, %246 : vector<8x8xf32>
    %249 = arith.addf %247, %248 : vector<8x8xf32>
    %c0_129 = arith.constant 0 : index
    %c0_130 = arith.constant 0 : index
    %250 = vector.load %arg13[%c0_129, %c0_130] : memref<8x256xf32, #tpu.memory_space<vmem>>, vector<8x256xf32>
    %cst_131 = arith.constant dense<0.000000e+00> : vector<8x256xf32>
    %251 = tpu.matmul %249, %250, %cst_131 {dimension_numbers = #tpu.dot_dimension_numbers<[1], [0], [0], [1], [0, 0, 1, 1], [], []>} : vector<8x8xf32>, vector<8x256xf32>, vector<8x256xf32> -> vector<8x256xf32>
    %252 = arith.index_cast %213 : i32 to index
    %c0_132 = arith.constant 0 : index
    %253 = vector.load %arg24[%252, %c0_132] : memref<64x256xf32, #tpu.memory_space<vmem>>, vector<8x256xf32>
    %254 = arith.addf %251, %253 : vector<8x256xf32>
    %255 = arith.addf %254, %225 : vector<8x256xf32>
    %256 = vector.extract_strided_slice %255 {offsets = [0, 0], sizes = [8, 64], strides = [1, 1]} : vector<8x256xf32> to vector<8x64xf32>
    %257 = arith.negf %256 : vector<8x64xf32>
    %258 = math.exp %257 : vector<8x64xf32>
    %cst_133 = arith.constant 1.000000e+00 : f32
    %259 = vector.broadcast %cst_133 : f32 to vector<8x64xf32>
    %260 = arith.addf %259, %258 : vector<8x64xf32>
    %261 = arith.divf %259, %260 : vector<8x64xf32>
    %262 = vector.extract_strided_slice %255 {offsets = [0, 64], sizes = [8, 64], strides = [1, 1]} : vector<8x256xf32> to vector<8x64xf32>
    %263 = arith.negf %262 : vector<8x64xf32>
    %264 = math.exp %263 : vector<8x64xf32>
    %cst_134 = arith.constant 1.000000e+00 : f32
    %265 = vector.broadcast %cst_134 : f32 to vector<8x64xf32>
    %266 = arith.addf %265, %264 : vector<8x64xf32>
    %267 = arith.divf %265, %266 : vector<8x64xf32>
    %268 = vector.extract_strided_slice %255 {offsets = [0, 128], sizes = [8, 64], strides = [1, 1]} : vector<8x256xf32> to vector<8x64xf32>
    %269 = math.tanh %268 : vector<8x64xf32>
    %270 = vector.extract_strided_slice %255 {offsets = [0, 192], sizes = [8, 64], strides = [1, 1]} : vector<8x256xf32> to vector<8x64xf32>
    %271 = arith.negf %270 : vector<8x64xf32>
    %272 = math.exp %271 : vector<8x64xf32>
    %cst_135 = arith.constant 1.000000e+00 : f32
    %273 = vector.broadcast %cst_135 : f32 to vector<8x64xf32>
    %274 = arith.addf %273, %272 : vector<8x64xf32>
    %275 = arith.divf %273, %274 : vector<8x64xf32>
    %276 = arith.mulf %267, %222 : vector<8x64xf32>
    %277 = arith.mulf %261, %269 : vector<8x64xf32>
    %278 = arith.addf %276, %277 : vector<8x64xf32>
    %279 = math.tanh %278 : vector<8x64xf32>
    %280 = arith.mulf %275, %279 : vector<8x64xf32>
    %c0_136 = arith.constant 0 : index
    %c0_137 = arith.constant 0 : index
    %281 = vector.load %arg19[%c0_136, %c0_137] : memref<8x64xf32, #tpu.memory_space<vmem>>, vector<8x64xf32>
    tpu.vector_store %arg19[%c0_136, %c0_137], %280 {strides = array<i32>} : memref<8x64xf32, #tpu.memory_space<vmem>>, vector<8x64xf32>,
    %c0_138 = arith.constant 0 : index
    %c0_139 = arith.constant 0 : index
    %282 = vector.load %arg20[%c0_138, %c0_139] : memref<8x64xf32, #tpu.memory_space<vmem>>, vector<8x64xf32>
    tpu.vector_store %arg20[%c0_138, %c0_139], %278 {strides = array<i32>} : memref<8x64xf32, #tpu.memory_space<vmem>>, vector<8x64xf32>,
    %c0_140 = arith.constant 0 : index
    %c0_141 = arith.constant 0 : index
    %283 = vector.load %arg21[%c0_140, %c0_141] : memref<8x8xf32, #tpu.memory_space<vmem>>, vector<8x8xf32>
    %284 = arith.subf %229, %215 : vector<8x8xf32>
    %285 = math.absf %284 : vector<8x8xf32>
    %286 = arith.subf %239, %215 : vector<8x8xf32>
    %287 = math.absf %286 : vector<8x8xf32>
    %288 = arith.addf %285, %287 : vector<8x8xf32>
    %289 = arith.subf %246, %215 : vector<8x8xf32>
    %290 = math.absf %289 : vector<8x8xf32>
    %291 = arith.addf %288, %290 : vector<8x8xf32>
    %292 = arith.index_cast %213 : i32 to index
    %c0_142 = arith.constant 0 : index
    %293 = vector.load %arg3[%292, %c0_142] : memref<64x8xf32, #tpu.memory_space<vmem>>, vector<8x8xf32>
    %294 = arith.mulf %291, %293 : vector<8x8xf32>
    %295 = arith.addf %283, %294 : vector<8x8xf32>
    %c0_143 = arith.constant 0 : index
    %c0_144 = arith.constant 0 : index
    %296 = vector.load %arg21[%c0_143, %c0_144] : memref<8x8xf32, #tpu.memory_space<vmem>>, vector<8x8xf32>
    tpu.vector_store %arg21[%c0_143, %c0_144], %295 {strides = array<i32>} : memref<8x8xf32, #tpu.memory_space<vmem>>, vector<8x8xf32>,
    %297 = arith.index_cast %213 : i32 to index
    %c0_145 = arith.constant 0 : index
    %298 = vector.load %arg16[%297, %c0_145] : memref<64x8xf32, #tpu.memory_space<vmem>>, vector<8x8xf32>
    tpu.vector_store %arg16[%297, %c0_145], %249 {strides = array<i32>} : memref<64x8xf32, #tpu.memory_space<vmem>>, vector<8x8xf32>,
    %c3_i32 = arith.constant 3 : i32
    %c8_i32_146 = arith.constant 8 : i32
    %299 = arith.muli %c3_i32, %c8_i32_146 : i32
    %300 = tpu.assume_multiple %299, 8 : i32
    %301 = arith.index_cast %300 : i32 to index
    %c0_147 = arith.constant 0 : index
    %302 = vector.load %arg0[%301, %c0_147] : memref<64x8xf32, #tpu.memory_space<vmem>>, vector<8x8xf32>
    %303 = arith.index_cast %300 : i32 to index
    %c0_148 = arith.constant 0 : index
    %304 = vector.load %arg1[%303, %c0_148] : memref<64x8xf32, #tpu.memory_space<vmem>>, vector<8x8xf32>
    %c0_149 = arith.constant 0 : index
    %c0_150 = arith.constant 0 : index
    %305 = vector.load %arg19[%c0_149, %c0_150] : memref<8x64xf32, #tpu.memory_space<vmem>>, vector<8x64xf32>
    %306 = arith.index_cast %300 : i32 to index
    %c0_151 = arith.constant 0 : index
    %307 = vector.load %arg22[%306, %c0_151] : memref<64x64xf32, #tpu.memory_space<vmem>>, vector<8x64xf32>
    %308 = arith.mulf %305, %307 : vector<8x64xf32>
    %c0_152 = arith.constant 0 : index
    %c0_153 = arith.constant 0 : index
    %309 = vector.load %arg20[%c0_152, %c0_153] : memref<8x64xf32, #tpu.memory_space<vmem>>, vector<8x64xf32>
    %c0_154 = arith.constant 0 : index
    %c0_155 = arith.constant 0 : index
    %310 = vector.load %arg9[%c0_154, %c0_155] : memref<64x264xf32, #tpu.memory_space<vmem>>, vector<64x264xf32>
    %cst_156 = arith.constant dense<0.000000e+00> : vector<8x264xf32>
    %311 = tpu.matmul %308, %310, %cst_156 {dimension_numbers = #tpu.dot_dimension_numbers<[1], [0], [0], [1], [0, 0, 1, 1], [], []>} : vector<8x64xf32>, vector<64x264xf32>, vector<8x264xf32> -> vector<8x264xf32>
    %312 = vector.extract_strided_slice %311 {offsets = [0, 0], sizes = [8, 256], strides = [1, 1]} : vector<8x264xf32> to vector<8x256xf32>
    %313 = vector.extract_strided_slice %311 {offsets = [0, 256], sizes = [8, 8], strides = [1, 1]} : vector<8x264xf32> to vector<8x8xf32>
    %c0_157 = arith.constant 0 : index
    %c0_158 = arith.constant 0 : index
    %314 = vector.load %arg10[%c0_157, %c0_158] : memref<1x8xf32, #tpu.memory_space<vmem>>, vector<1x8xf32>
    %315 = vector.broadcast %314 : vector<1x8xf32> to vector<8x8xf32>
    %316 = arith.addf %313, %315 : vector<8x8xf32>
    %cst_159 = arith.constant 1.000000e+00 : f32
    %317 = vector.broadcast %cst_159 : f32 to vector<8x8xf32>
    %318 = arith.subf %317, %304 : vector<8x8xf32>
    %319 = arith.mulf %304, %302 : vector<8x8xf32>
    %320 = arith.mulf %318, %316 : vector<8x8xf32>
    %321 = arith.addf %319, %320 : vector<8x8xf32>
    %c0_160 = arith.constant 0 : index
    %c0_161 = arith.constant 0 : index
    %322 = vector.load %arg11[%c0_160, %c0_161] : memref<8x8xf32, #tpu.memory_space<vmem>>, vector<8x8xf32>
    %cst_162 = arith.constant dense<0.000000e+00> : vector<8x8xf32>
    %323 = tpu.matmul %321, %322, %cst_162 {dimension_numbers = #tpu.dot_dimension_numbers<[1], [0], [0], [1], [0, 0, 1, 1], [], []>} : vector<8x8xf32>, vector<8x8xf32>, vector<8x8xf32> -> vector<8x8xf32>
    %c0_163 = arith.constant 0 : index
    %c0_164 = arith.constant 0 : index
    %324 = vector.load %arg12[%c0_163, %c0_164] : memref<1x8xf32, #tpu.memory_space<vmem>>, vector<1x8xf32>
    %325 = vector.broadcast %324 : vector<1x8xf32> to vector<8x8xf32>
    %326 = arith.addf %323, %325 : vector<8x8xf32>
    %327 = arith.index_cast %300 : i32 to index
    %c0_165 = arith.constant 0 : index
    %328 = vector.load %arg23[%327, %c0_165] : memref<64x8xf32, #tpu.memory_space<vmem>>, vector<8x8xf32>
    %329 = arith.mulf %328, %326 : vector<8x8xf32>
    %cst_166 = arith.constant 1.000000e+00 : f32
    %330 = vector.broadcast %cst_166 : f32 to vector<8x8xf32>
    %331 = arith.subf %330, %328 : vector<8x8xf32>
    %332 = arith.mulf %331, %316 : vector<8x8xf32>
    %333 = arith.addf %329, %332 : vector<8x8xf32>
    %334 = arith.mulf %304, %302 : vector<8x8xf32>
    %335 = arith.mulf %318, %333 : vector<8x8xf32>
    %336 = arith.addf %334, %335 : vector<8x8xf32>
    %c0_167 = arith.constant 0 : index
    %c0_168 = arith.constant 0 : index
    %337 = vector.load %arg13[%c0_167, %c0_168] : memref<8x256xf32, #tpu.memory_space<vmem>>, vector<8x256xf32>
    %cst_169 = arith.constant dense<0.000000e+00> : vector<8x256xf32>
    %338 = tpu.matmul %336, %337, %cst_169 {dimension_numbers = #tpu.dot_dimension_numbers<[1], [0], [0], [1], [0, 0, 1, 1], [], []>} : vector<8x8xf32>, vector<8x256xf32>, vector<8x256xf32> -> vector<8x256xf32>
    %339 = arith.index_cast %300 : i32 to index
    %c0_170 = arith.constant 0 : index
    %340 = vector.load %arg24[%339, %c0_170] : memref<64x256xf32, #tpu.memory_space<vmem>>, vector<8x256xf32>
    %341 = arith.addf %338, %340 : vector<8x256xf32>
    %342 = arith.addf %341, %312 : vector<8x256xf32>
    %343 = vector.extract_strided_slice %342 {offsets = [0, 0], sizes = [8, 64], strides = [1, 1]} : vector<8x256xf32> to vector<8x64xf32>
    %344 = arith.negf %343 : vector<8x64xf32>
    %345 = math.exp %344 : vector<8x64xf32>
    %cst_171 = arith.constant 1.000000e+00 : f32
    %346 = vector.broadcast %cst_171 : f32 to vector<8x64xf32>
    %347 = arith.addf %346, %345 : vector<8x64xf32>
    %348 = arith.divf %346, %347 : vector<8x64xf32>
    %349 = vector.extract_strided_slice %342 {offsets = [0, 64], sizes = [8, 64], strides = [1, 1]} : vector<8x256xf32> to vector<8x64xf32>
    %350 = arith.negf %349 : vector<8x64xf32>
    %351 = math.exp %350 : vector<8x64xf32>
    %cst_172 = arith.constant 1.000000e+00 : f32
    %352 = vector.broadcast %cst_172 : f32 to vector<8x64xf32>
    %353 = arith.addf %352, %351 : vector<8x64xf32>
    %354 = arith.divf %352, %353 : vector<8x64xf32>
    %355 = vector.extract_strided_slice %342 {offsets = [0, 128], sizes = [8, 64], strides = [1, 1]} : vector<8x256xf32> to vector<8x64xf32>
    %356 = math.tanh %355 : vector<8x64xf32>
    %357 = vector.extract_strided_slice %342 {offsets = [0, 192], sizes = [8, 64], strides = [1, 1]} : vector<8x256xf32> to vector<8x64xf32>
    %358 = arith.negf %357 : vector<8x64xf32>
    %359 = math.exp %358 : vector<8x64xf32>
    %cst_173 = arith.constant 1.000000e+00 : f32
    %360 = vector.broadcast %cst_173 : f32 to vector<8x64xf32>
    %361 = arith.addf %360, %359 : vector<8x64xf32>
    %362 = arith.divf %360, %361 : vector<8x64xf32>
    %363 = arith.mulf %354, %309 : vector<8x64xf32>
    %364 = arith.mulf %348, %356 : vector<8x64xf32>
    %365 = arith.addf %363, %364 : vector<8x64xf32>
    %366 = math.tanh %365 : vector<8x64xf32>
    %367 = arith.mulf %362, %366 : vector<8x64xf32>
    %c0_174 = arith.constant 0 : index
    %c0_175 = arith.constant 0 : index
    %368 = vector.load %arg19[%c0_174, %c0_175] : memref<8x64xf32, #tpu.memory_space<vmem>>, vector<8x64xf32>
    tpu.vector_store %arg19[%c0_174, %c0_175], %367 {strides = array<i32>} : memref<8x64xf32, #tpu.memory_space<vmem>>, vector<8x64xf32>,
    %c0_176 = arith.constant 0 : index
    %c0_177 = arith.constant 0 : index
    %369 = vector.load %arg20[%c0_176, %c0_177] : memref<8x64xf32, #tpu.memory_space<vmem>>, vector<8x64xf32>
    tpu.vector_store %arg20[%c0_176, %c0_177], %365 {strides = array<i32>} : memref<8x64xf32, #tpu.memory_space<vmem>>, vector<8x64xf32>,
    %c0_178 = arith.constant 0 : index
    %c0_179 = arith.constant 0 : index
    %370 = vector.load %arg21[%c0_178, %c0_179] : memref<8x8xf32, #tpu.memory_space<vmem>>, vector<8x8xf32>
    %371 = arith.subf %316, %302 : vector<8x8xf32>
    %372 = math.absf %371 : vector<8x8xf32>
    %373 = arith.subf %326, %302 : vector<8x8xf32>
    %374 = math.absf %373 : vector<8x8xf32>
    %375 = arith.addf %372, %374 : vector<8x8xf32>
    %376 = arith.subf %333, %302 : vector<8x8xf32>
    %377 = math.absf %376 : vector<8x8xf32>
    %378 = arith.addf %375, %377 : vector<8x8xf32>
    %379 = arith.index_cast %300 : i32 to index
    %c0_180 = arith.constant 0 : index
    %380 = vector.load %arg3[%379, %c0_180] : memref<64x8xf32, #tpu.memory_space<vmem>>, vector<8x8xf32>
    %381 = arith.mulf %378, %380 : vector<8x8xf32>
    %382 = arith.addf %370, %381 : vector<8x8xf32>
    %c0_181 = arith.constant 0 : index
    %c0_182 = arith.constant 0 : index
    %383 = vector.load %arg21[%c0_181, %c0_182] : memref<8x8xf32, #tpu.memory_space<vmem>>, vector<8x8xf32>
    tpu.vector_store %arg21[%c0_181, %c0_182], %382 {strides = array<i32>} : memref<8x8xf32, #tpu.memory_space<vmem>>, vector<8x8xf32>,
    %384 = arith.index_cast %300 : i32 to index
    %c0_183 = arith.constant 0 : index
    %385 = vector.load %arg16[%384, %c0_183] : memref<64x8xf32, #tpu.memory_space<vmem>>, vector<8x8xf32>
    tpu.vector_store %arg16[%384, %c0_183], %336 {strides = array<i32>} : memref<64x8xf32, #tpu.memory_space<vmem>>, vector<8x8xf32>,
    %c4_i32 = arith.constant 4 : i32
    %c8_i32_184 = arith.constant 8 : i32
    %386 = arith.muli %c4_i32, %c8_i32_184 : i32
    %387 = tpu.assume_multiple %386, 8 : i32
    %388 = arith.index_cast %387 : i32 to index
    %c0_185 = arith.constant 0 : index
    %389 = vector.load %arg0[%388, %c0_185] : memref<64x8xf32, #tpu.memory_space<vmem>>, vector<8x8xf32>
    %390 = arith.index_cast %387 : i32 to index
    %c0_186 = arith.constant 0 : index
    %391 = vector.load %arg1[%390, %c0_186] : memref<64x8xf32, #tpu.memory_space<vmem>>, vector<8x8xf32>
    %c0_187 = arith.constant 0 : index
    %c0_188 = arith.constant 0 : index
    %392 = vector.load %arg19[%c0_187, %c0_188] : memref<8x64xf32, #tpu.memory_space<vmem>>, vector<8x64xf32>
    %393 = arith.index_cast %387 : i32 to index
    %c0_189 = arith.constant 0 : index
    %394 = vector.load %arg22[%393, %c0_189] : memref<64x64xf32, #tpu.memory_space<vmem>>, vector<8x64xf32>
    %395 = arith.mulf %392, %394 : vector<8x64xf32>
    %c0_190 = arith.constant 0 : index
    %c0_191 = arith.constant 0 : index
    %396 = vector.load %arg20[%c0_190, %c0_191] : memref<8x64xf32, #tpu.memory_space<vmem>>, vector<8x64xf32>
    %c0_192 = arith.constant 0 : index
    %c0_193 = arith.constant 0 : index
    %397 = vector.load %arg9[%c0_192, %c0_193] : memref<64x264xf32, #tpu.memory_space<vmem>>, vector<64x264xf32>
    %cst_194 = arith.constant dense<0.000000e+00> : vector<8x264xf32>
    %398 = tpu.matmul %395, %397, %cst_194 {dimension_numbers = #tpu.dot_dimension_numbers<[1], [0], [0], [1], [0, 0, 1, 1], [], []>} : vector<8x64xf32>, vector<64x264xf32>, vector<8x264xf32> -> vector<8x264xf32>
    %399 = vector.extract_strided_slice %398 {offsets = [0, 0], sizes = [8, 256], strides = [1, 1]} : vector<8x264xf32> to vector<8x256xf32>
    %400 = vector.extract_strided_slice %398 {offsets = [0, 256], sizes = [8, 8], strides = [1, 1]} : vector<8x264xf32> to vector<8x8xf32>
    %c0_195 = arith.constant 0 : index
    %c0_196 = arith.constant 0 : index
    %401 = vector.load %arg10[%c0_195, %c0_196] : memref<1x8xf32, #tpu.memory_space<vmem>>, vector<1x8xf32>
    %402 = vector.broadcast %401 : vector<1x8xf32> to vector<8x8xf32>
    %403 = arith.addf %400, %402 : vector<8x8xf32>
    %cst_197 = arith.constant 1.000000e+00 : f32
    %404 = vector.broadcast %cst_197 : f32 to vector<8x8xf32>
    %405 = arith.subf %404, %391 : vector<8x8xf32>
    %406 = arith.mulf %391, %389 : vector<8x8xf32>
    %407 = arith.mulf %405, %403 : vector<8x8xf32>
    %408 = arith.addf %406, %407 : vector<8x8xf32>
    %c0_198 = arith.constant 0 : index
    %c0_199 = arith.constant 0 : index
    %409 = vector.load %arg11[%c0_198, %c0_199] : memref<8x8xf32, #tpu.memory_space<vmem>>, vector<8x8xf32>
    %cst_200 = arith.constant dense<0.000000e+00> : vector<8x8xf32>
    %410 = tpu.matmul %408, %409, %cst_200 {dimension_numbers = #tpu.dot_dimension_numbers<[1], [0], [0], [1], [0, 0, 1, 1], [], []>} : vector<8x8xf32>, vector<8x8xf32>, vector<8x8xf32> -> vector<8x8xf32>
    %c0_201 = arith.constant 0 : index
    %c0_202 = arith.constant 0 : index
    %411 = vector.load %arg12[%c0_201, %c0_202] : memref<1x8xf32, #tpu.memory_space<vmem>>, vector<1x8xf32>
    %412 = vector.broadcast %411 : vector<1x8xf32> to vector<8x8xf32>
    %413 = arith.addf %410, %412 : vector<8x8xf32>
    %414 = arith.index_cast %387 : i32 to index
    %c0_203 = arith.constant 0 : index
    %415 = vector.load %arg23[%414, %c0_203] : memref<64x8xf32, #tpu.memory_space<vmem>>, vector<8x8xf32>
    %416 = arith.mulf %415, %413 : vector<8x8xf32>
    %cst_204 = arith.constant 1.000000e+00 : f32
    %417 = vector.broadcast %cst_204 : f32 to vector<8x8xf32>
    %418 = arith.subf %417, %415 : vector<8x8xf32>
    %419 = arith.mulf %418, %403 : vector<8x8xf32>
    %420 = arith.addf %416, %419 : vector<8x8xf32>
    %421 = arith.mulf %391, %389 : vector<8x8xf32>
    %422 = arith.mulf %405, %420 : vector<8x8xf32>
    %423 = arith.addf %421, %422 : vector<8x8xf32>
    %c0_205 = arith.constant 0 : index
    %c0_206 = arith.constant 0 : index
    %424 = vector.load %arg13[%c0_205, %c0_206] : memref<8x256xf32, #tpu.memory_space<vmem>>, vector<8x256xf32>
    %cst_207 = arith.constant dense<0.000000e+00> : vector<8x256xf32>
    %425 = tpu.matmul %423, %424, %cst_207 {dimension_numbers = #tpu.dot_dimension_numbers<[1], [0], [0], [1], [0, 0, 1, 1], [], []>} : vector<8x8xf32>, vector<8x256xf32>, vector<8x256xf32> -> vector<8x256xf32>
    %426 = arith.index_cast %387 : i32 to index
    %c0_208 = arith.constant 0 : index
    %427 = vector.load %arg24[%426, %c0_208] : memref<64x256xf32, #tpu.memory_space<vmem>>, vector<8x256xf32>
    %428 = arith.addf %425, %427 : vector<8x256xf32>
    %429 = arith.addf %428, %399 : vector<8x256xf32>
    %430 = vector.extract_strided_slice %429 {offsets = [0, 0], sizes = [8, 64], strides = [1, 1]} : vector<8x256xf32> to vector<8x64xf32>
    %431 = arith.negf %430 : vector<8x64xf32>
    %432 = math.exp %431 : vector<8x64xf32>
    %cst_209 = arith.constant 1.000000e+00 : f32
    %433 = vector.broadcast %cst_209 : f32 to vector<8x64xf32>
    %434 = arith.addf %433, %432 : vector<8x64xf32>
    %435 = arith.divf %433, %434 : vector<8x64xf32>
    %436 = vector.extract_strided_slice %429 {offsets = [0, 64], sizes = [8, 64], strides = [1, 1]} : vector<8x256xf32> to vector<8x64xf32>
    %437 = arith.negf %436 : vector<8x64xf32>
    %438 = math.exp %437 : vector<8x64xf32>
    %cst_210 = arith.constant 1.000000e+00 : f32
    %439 = vector.broadcast %cst_210 : f32 to vector<8x64xf32>
    %440 = arith.addf %439, %438 : vector<8x64xf32>
    %441 = arith.divf %439, %440 : vector<8x64xf32>
    %442 = vector.extract_strided_slice %429 {offsets = [0, 128], sizes = [8, 64], strides = [1, 1]} : vector<8x256xf32> to vector<8x64xf32>
    %443 = math.tanh %442 : vector<8x64xf32>
    %444 = vector.extract_strided_slice %429 {offsets = [0, 192], sizes = [8, 64], strides = [1, 1]} : vector<8x256xf32> to vector<8x64xf32>
    %445 = arith.negf %444 : vector<8x64xf32>
    %446 = math.exp %445 : vector<8x64xf32>
    %cst_211 = arith.constant 1.000000e+00 : f32
    %447 = vector.broadcast %cst_211 : f32 to vector<8x64xf32>
    %448 = arith.addf %447, %446 : vector<8x64xf32>
    %449 = arith.divf %447, %448 : vector<8x64xf32>
    %450 = arith.mulf %441, %396 : vector<8x64xf32>
    %451 = arith.mulf %435, %443 : vector<8x64xf32>
    %452 = arith.addf %450, %451 : vector<8x64xf32>
    %453 = math.tanh %452 : vector<8x64xf32>
    %454 = arith.mulf %449, %453 : vector<8x64xf32>
    %c0_212 = arith.constant 0 : index
    %c0_213 = arith.constant 0 : index
    %455 = vector.load %arg19[%c0_212, %c0_213] : memref<8x64xf32, #tpu.memory_space<vmem>>, vector<8x64xf32>
    tpu.vector_store %arg19[%c0_212, %c0_213], %454 {strides = array<i32>} : memref<8x64xf32, #tpu.memory_space<vmem>>, vector<8x64xf32>,
    %c0_214 = arith.constant 0 : index
    %c0_215 = arith.constant 0 : index
    %456 = vector.load %arg20[%c0_214, %c0_215] : memref<8x64xf32, #tpu.memory_space<vmem>>, vector<8x64xf32>
    tpu.vector_store %arg20[%c0_214, %c0_215], %452 {strides = array<i32>} : memref<8x64xf32, #tpu.memory_space<vmem>>, vector<8x64xf32>,
    %c0_216 = arith.constant 0 : index
    %c0_217 = arith.constant 0 : index
    %457 = vector.load %arg21[%c0_216, %c0_217] : memref<8x8xf32, #tpu.memory_space<vmem>>, vector<8x8xf32>
    %458 = arith.subf %403, %389 : vector<8x8xf32>
    %459 = math.absf %458 : vector<8x8xf32>
    %460 = arith.subf %413, %389 : vector<8x8xf32>
    %461 = math.absf %460 : vector<8x8xf32>
    %462 = arith.addf %459, %461 : vector<8x8xf32>
    %463 = arith.subf %420, %389 : vector<8x8xf32>
    %464 = math.absf %463 : vector<8x8xf32>
    %465 = arith.addf %462, %464 : vector<8x8xf32>
    %466 = arith.index_cast %387 : i32 to index
    %c0_218 = arith.constant 0 : index
    %467 = vector.load %arg3[%466, %c0_218] : memref<64x8xf32, #tpu.memory_space<vmem>>, vector<8x8xf32>
    %468 = arith.mulf %465, %467 : vector<8x8xf32>
    %469 = arith.addf %457, %468 : vector<8x8xf32>
    %c0_219 = arith.constant 0 : index
    %c0_220 = arith.constant 0 : index
    %470 = vector.load %arg21[%c0_219, %c0_220] : memref<8x8xf32, #tpu.memory_space<vmem>>, vector<8x8xf32>
    tpu.vector_store %arg21[%c0_219, %c0_220], %469 {strides = array<i32>} : memref<8x8xf32, #tpu.memory_space<vmem>>, vector<8x8xf32>,
    %471 = arith.index_cast %387 : i32 to index
    %c0_221 = arith.constant 0 : index
    %472 = vector.load %arg16[%471, %c0_221] : memref<64x8xf32, #tpu.memory_space<vmem>>, vector<8x8xf32>
    tpu.vector_store %arg16[%471, %c0_221], %423 {strides = array<i32>} : memref<64x8xf32, #tpu.memory_space<vmem>>, vector<8x8xf32>,
    %c5_i32 = arith.constant 5 : i32
    %c8_i32_222 = arith.constant 8 : i32
    %473 = arith.muli %c5_i32, %c8_i32_222 : i32
    %474 = tpu.assume_multiple %473, 8 : i32
    %475 = arith.index_cast %474 : i32 to index
    %c0_223 = arith.constant 0 : index
    %476 = vector.load %arg0[%475, %c0_223] : memref<64x8xf32, #tpu.memory_space<vmem>>, vector<8x8xf32>
    %477 = arith.index_cast %474 : i32 to index
    %c0_224 = arith.constant 0 : index
    %478 = vector.load %arg1[%477, %c0_224] : memref<64x8xf32, #tpu.memory_space<vmem>>, vector<8x8xf32>
    %c0_225 = arith.constant 0 : index
    %c0_226 = arith.constant 0 : index
    %479 = vector.load %arg19[%c0_225, %c0_226] : memref<8x64xf32, #tpu.memory_space<vmem>>, vector<8x64xf32>
    %480 = arith.index_cast %474 : i32 to index
    %c0_227 = arith.constant 0 : index
    %481 = vector.load %arg22[%480, %c0_227] : memref<64x64xf32, #tpu.memory_space<vmem>>, vector<8x64xf32>
    %482 = arith.mulf %479, %481 : vector<8x64xf32>
    %c0_228 = arith.constant 0 : index
    %c0_229 = arith.constant 0 : index
    %483 = vector.load %arg20[%c0_228, %c0_229] : memref<8x64xf32, #tpu.memory_space<vmem>>, vector<8x64xf32>
    %c0_230 = arith.constant 0 : index
    %c0_231 = arith.constant 0 : index
    %484 = vector.load %arg9[%c0_230, %c0_231] : memref<64x264xf32, #tpu.memory_space<vmem>>, vector<64x264xf32>
    %cst_232 = arith.constant dense<0.000000e+00> : vector<8x264xf32>
    %485 = tpu.matmul %482, %484, %cst_232 {dimension_numbers = #tpu.dot_dimension_numbers<[1], [0], [0], [1], [0, 0, 1, 1], [], []>} : vector<8x64xf32>, vector<64x264xf32>, vector<8x264xf32> -> vector<8x264xf32>
    %486 = vector.extract_strided_slice %485 {offsets = [0, 0], sizes = [8, 256], strides = [1, 1]} : vector<8x264xf32> to vector<8x256xf32>
    %487 = vector.extract_strided_slice %485 {offsets = [0, 256], sizes = [8, 8], strides = [1, 1]} : vector<8x264xf32> to vector<8x8xf32>
    %c0_233 = arith.constant 0 : index
    %c0_234 = arith.constant 0 : index
    %488 = vector.load %arg10[%c0_233, %c0_234] : memref<1x8xf32, #tpu.memory_space<vmem>>, vector<1x8xf32>
    %489 = vector.broadcast %488 : vector<1x8xf32> to vector<8x8xf32>
    %490 = arith.addf %487, %489 : vector<8x8xf32>
    %cst_235 = arith.constant 1.000000e+00 : f32
    %491 = vector.broadcast %cst_235 : f32 to vector<8x8xf32>
    %492 = arith.subf %491, %478 : vector<8x8xf32>
    %493 = arith.mulf %478, %476 : vector<8x8xf32>
    %494 = arith.mulf %492, %490 : vector<8x8xf32>
    %495 = arith.addf %493, %494 : vector<8x8xf32>
    %c0_236 = arith.constant 0 : index
    %c0_237 = arith.constant 0 : index
    %496 = vector.load %arg11[%c0_236, %c0_237] : memref<8x8xf32, #tpu.memory_space<vmem>>, vector<8x8xf32>
    %cst_238 = arith.constant dense<0.000000e+00> : vector<8x8xf32>
    %497 = tpu.matmul %495, %496, %cst_238 {dimension_numbers = #tpu.dot_dimension_numbers<[1], [0], [0], [1], [0, 0, 1, 1], [], []>} : vector<8x8xf32>, vector<8x8xf32>, vector<8x8xf32> -> vector<8x8xf32>
    %c0_239 = arith.constant 0 : index
    %c0_240 = arith.constant 0 : index
    %498 = vector.load %arg12[%c0_239, %c0_240] : memref<1x8xf32, #tpu.memory_space<vmem>>, vector<1x8xf32>
    %499 = vector.broadcast %498 : vector<1x8xf32> to vector<8x8xf32>
    %500 = arith.addf %497, %499 : vector<8x8xf32>
    %501 = arith.index_cast %474 : i32 to index
    %c0_241 = arith.constant 0 : index
    %502 = vector.load %arg23[%501, %c0_241] : memref<64x8xf32, #tpu.memory_space<vmem>>, vector<8x8xf32>
    %503 = arith.mulf %502, %500 : vector<8x8xf32>
    %cst_242 = arith.constant 1.000000e+00 : f32
    %504 = vector.broadcast %cst_242 : f32 to vector<8x8xf32>
    %505 = arith.subf %504, %502 : vector<8x8xf32>
    %506 = arith.mulf %505, %490 : vector<8x8xf32>
    %507 = arith.addf %503, %506 : vector<8x8xf32>
    %508 = arith.mulf %478, %476 : vector<8x8xf32>
    %509 = arith.mulf %492, %507 : vector<8x8xf32>
    %510 = arith.addf %508, %509 : vector<8x8xf32>
    %c0_243 = arith.constant 0 : index
    %c0_244 = arith.constant 0 : index
    %511 = vector.load %arg13[%c0_243, %c0_244] : memref<8x256xf32, #tpu.memory_space<vmem>>, vector<8x256xf32>
    %cst_245 = arith.constant dense<0.000000e+00> : vector<8x256xf32>
    %512 = tpu.matmul %510, %511, %cst_245 {dimension_numbers = #tpu.dot_dimension_numbers<[1], [0], [0], [1], [0, 0, 1, 1], [], []>} : vector<8x8xf32>, vector<8x256xf32>, vector<8x256xf32> -> vector<8x256xf32>
    %513 = arith.index_cast %474 : i32 to index
    %c0_246 = arith.constant 0 : index
    %514 = vector.load %arg24[%513, %c0_246] : memref<64x256xf32, #tpu.memory_space<vmem>>, vector<8x256xf32>
    %515 = arith.addf %512, %514 : vector<8x256xf32>
    %516 = arith.addf %515, %486 : vector<8x256xf32>
    %517 = vector.extract_strided_slice %516 {offsets = [0, 0], sizes = [8, 64], strides = [1, 1]} : vector<8x256xf32> to vector<8x64xf32>
    %518 = arith.negf %517 : vector<8x64xf32>
    %519 = math.exp %518 : vector<8x64xf32>
    %cst_247 = arith.constant 1.000000e+00 : f32
    %520 = vector.broadcast %cst_247 : f32 to vector<8x64xf32>
    %521 = arith.addf %520, %519 : vector<8x64xf32>
    %522 = arith.divf %520, %521 : vector<8x64xf32>
    %523 = vector.extract_strided_slice %516 {offsets = [0, 64], sizes = [8, 64], strides = [1, 1]} : vector<8x256xf32> to vector<8x64xf32>
    %524 = arith.negf %523 : vector<8x64xf32>
    %525 = math.exp %524 : vector<8x64xf32>
    %cst_248 = arith.constant 1.000000e+00 : f32
    %526 = vector.broadcast %cst_248 : f32 to vector<8x64xf32>
    %527 = arith.addf %526, %525 : vector<8x64xf32>
    %528 = arith.divf %526, %527 : vector<8x64xf32>
    %529 = vector.extract_strided_slice %516 {offsets = [0, 128], sizes = [8, 64], strides = [1, 1]} : vector<8x256xf32> to vector<8x64xf32>
    %530 = math.tanh %529 : vector<8x64xf32>
    %531 = vector.extract_strided_slice %516 {offsets = [0, 192], sizes = [8, 64], strides = [1, 1]} : vector<8x256xf32> to vector<8x64xf32>
    %532 = arith.negf %531 : vector<8x64xf32>
    %533 = math.exp %532 : vector<8x64xf32>
    %cst_249 = arith.constant 1.000000e+00 : f32
    %534 = vector.broadcast %cst_249 : f32 to vector<8x64xf32>
    %535 = arith.addf %534, %533 : vector<8x64xf32>
    %536 = arith.divf %534, %535 : vector<8x64xf32>
    %537 = arith.mulf %528, %483 : vector<8x64xf32>
    %538 = arith.mulf %522, %530 : vector<8x64xf32>
    %539 = arith.addf %537, %538 : vector<8x64xf32>
    %540 = math.tanh %539 : vector<8x64xf32>
    %541 = arith.mulf %536, %540 : vector<8x64xf32>
    %c0_250 = arith.constant 0 : index
    %c0_251 = arith.constant 0 : index
    %542 = vector.load %arg19[%c0_250, %c0_251] : memref<8x64xf32, #tpu.memory_space<vmem>>, vector<8x64xf32>
    tpu.vector_store %arg19[%c0_250, %c0_251], %541 {strides = array<i32>} : memref<8x64xf32, #tpu.memory_space<vmem>>, vector<8x64xf32>,
    %c0_252 = arith.constant 0 : index
    %c0_253 = arith.constant 0 : index
    %543 = vector.load %arg20[%c0_252, %c0_253] : memref<8x64xf32, #tpu.memory_space<vmem>>, vector<8x64xf32>
    tpu.vector_store %arg20[%c0_252, %c0_253], %539 {strides = array<i32>} : memref<8x64xf32, #tpu.memory_space<vmem>>, vector<8x64xf32>,
    %c0_254 = arith.constant 0 : index
    %c0_255 = arith.constant 0 : index
    %544 = vector.load %arg21[%c0_254, %c0_255] : memref<8x8xf32, #tpu.memory_space<vmem>>, vector<8x8xf32>
    %545 = arith.subf %490, %476 : vector<8x8xf32>
    %546 = math.absf %545 : vector<8x8xf32>
    %547 = arith.subf %500, %476 : vector<8x8xf32>
    %548 = math.absf %547 : vector<8x8xf32>
    %549 = arith.addf %546, %548 : vector<8x8xf32>
    %550 = arith.subf %507, %476 : vector<8x8xf32>
    %551 = math.absf %550 : vector<8x8xf32>
    %552 = arith.addf %549, %551 : vector<8x8xf32>
    %553 = arith.index_cast %474 : i32 to index
    %c0_256 = arith.constant 0 : index
    %554 = vector.load %arg3[%553, %c0_256] : memref<64x8xf32, #tpu.memory_space<vmem>>, vector<8x8xf32>
    %555 = arith.mulf %552, %554 : vector<8x8xf32>
    %556 = arith.addf %544, %555 : vector<8x8xf32>
    %c0_257 = arith.constant 0 : index
    %c0_258 = arith.constant 0 : index
    %557 = vector.load %arg21[%c0_257, %c0_258] : memref<8x8xf32, #tpu.memory_space<vmem>>, vector<8x8xf32>
    tpu.vector_store %arg21[%c0_257, %c0_258], %556 {strides = array<i32>} : memref<8x8xf32, #tpu.memory_space<vmem>>, vector<8x8xf32>,
    %558 = arith.index_cast %474 : i32 to index
    %c0_259 = arith.constant 0 : index
    %559 = vector.load %arg16[%558, %c0_259] : memref<64x8xf32, #tpu.memory_space<vmem>>, vector<8x8xf32>
    tpu.vector_store %arg16[%558, %c0_259], %510 {strides = array<i32>} : memref<64x8xf32, #tpu.memory_space<vmem>>, vector<8x8xf32>,
    %c6_i32 = arith.constant 6 : i32
    %c8_i32_260 = arith.constant 8 : i32
    %560 = arith.muli %c6_i32, %c8_i32_260 : i32
    %561 = tpu.assume_multiple %560, 8 : i32
    %562 = arith.index_cast %561 : i32 to index
    %c0_261 = arith.constant 0 : index
    %563 = vector.load %arg0[%562, %c0_261] : memref<64x8xf32, #tpu.memory_space<vmem>>, vector<8x8xf32>
    %564 = arith.index_cast %561 : i32 to index
    %c0_262 = arith.constant 0 : index
    %565 = vector.load %arg1[%564, %c0_262] : memref<64x8xf32, #tpu.memory_space<vmem>>, vector<8x8xf32>
    %c0_263 = arith.constant 0 : index
    %c0_264 = arith.constant 0 : index
    %566 = vector.load %arg19[%c0_263, %c0_264] : memref<8x64xf32, #tpu.memory_space<vmem>>, vector<8x64xf32>
    %567 = arith.index_cast %561 : i32 to index
    %c0_265 = arith.constant 0 : index
    %568 = vector.load %arg22[%567, %c0_265] : memref<64x64xf32, #tpu.memory_space<vmem>>, vector<8x64xf32>
    %569 = arith.mulf %566, %568 : vector<8x64xf32>
    %c0_266 = arith.constant 0 : index
    %c0_267 = arith.constant 0 : index
    %570 = vector.load %arg20[%c0_266, %c0_267] : memref<8x64xf32, #tpu.memory_space<vmem>>, vector<8x64xf32>
    %c0_268 = arith.constant 0 : index
    %c0_269 = arith.constant 0 : index
    %571 = vector.load %arg9[%c0_268, %c0_269] : memref<64x264xf32, #tpu.memory_space<vmem>>, vector<64x264xf32>
    %cst_270 = arith.constant dense<0.000000e+00> : vector<8x264xf32>
    %572 = tpu.matmul %569, %571, %cst_270 {dimension_numbers = #tpu.dot_dimension_numbers<[1], [0], [0], [1], [0, 0, 1, 1], [], []>} : vector<8x64xf32>, vector<64x264xf32>, vector<8x264xf32> -> vector<8x264xf32>
    %573 = vector.extract_strided_slice %572 {offsets = [0, 0], sizes = [8, 256], strides = [1, 1]} : vector<8x264xf32> to vector<8x256xf32>
    %574 = vector.extract_strided_slice %572 {offsets = [0, 256], sizes = [8, 8], strides = [1, 1]} : vector<8x264xf32> to vector<8x8xf32>
    %c0_271 = arith.constant 0 : index
    %c0_272 = arith.constant 0 : index
    %575 = vector.load %arg10[%c0_271, %c0_272] : memref<1x8xf32, #tpu.memory_space<vmem>>, vector<1x8xf32>
    %576 = vector.broadcast %575 : vector<1x8xf32> to vector<8x8xf32>
    %577 = arith.addf %574, %576 : vector<8x8xf32>
    %cst_273 = arith.constant 1.000000e+00 : f32
    %578 = vector.broadcast %cst_273 : f32 to vector<8x8xf32>
    %579 = arith.subf %578, %565 : vector<8x8xf32>
    %580 = arith.mulf %565, %563 : vector<8x8xf32>
    %581 = arith.mulf %579, %577 : vector<8x8xf32>
    %582 = arith.addf %580, %581 : vector<8x8xf32>
    %c0_274 = arith.constant 0 : index
    %c0_275 = arith.constant 0 : index
    %583 = vector.load %arg11[%c0_274, %c0_275] : memref<8x8xf32, #tpu.memory_space<vmem>>, vector<8x8xf32>
    %cst_276 = arith.constant dense<0.000000e+00> : vector<8x8xf32>
    %584 = tpu.matmul %582, %583, %cst_276 {dimension_numbers = #tpu.dot_dimension_numbers<[1], [0], [0], [1], [0, 0, 1, 1], [], []>} : vector<8x8xf32>, vector<8x8xf32>, vector<8x8xf32> -> vector<8x8xf32>
    %c0_277 = arith.constant 0 : index
    %c0_278 = arith.constant 0 : index
    %585 = vector.load %arg12[%c0_277, %c0_278] : memref<1x8xf32, #tpu.memory_space<vmem>>, vector<1x8xf32>
    %586 = vector.broadcast %585 : vector<1x8xf32> to vector<8x8xf32>
    %587 = arith.addf %584, %586 : vector<8x8xf32>
    %588 = arith.index_cast %561 : i32 to index
    %c0_279 = arith.constant 0 : index
    %589 = vector.load %arg23[%588, %c0_279] : memref<64x8xf32, #tpu.memory_space<vmem>>, vector<8x8xf32>
    %590 = arith.mulf %589, %587 : vector<8x8xf32>
    %cst_280 = arith.constant 1.000000e+00 : f32
    %591 = vector.broadcast %cst_280 : f32 to vector<8x8xf32>
    %592 = arith.subf %591, %589 : vector<8x8xf32>
    %593 = arith.mulf %592, %577 : vector<8x8xf32>
    %594 = arith.addf %590, %593 : vector<8x8xf32>
    %595 = arith.mulf %565, %563 : vector<8x8xf32>
    %596 = arith.mulf %579, %594 : vector<8x8xf32>
    %597 = arith.addf %595, %596 : vector<8x8xf32>
    %c0_281 = arith.constant 0 : index
    %c0_282 = arith.constant 0 : index
    %598 = vector.load %arg13[%c0_281, %c0_282] : memref<8x256xf32, #tpu.memory_space<vmem>>, vector<8x256xf32>
    %cst_283 = arith.constant dense<0.000000e+00> : vector<8x256xf32>
    %599 = tpu.matmul %597, %598, %cst_283 {dimension_numbers = #tpu.dot_dimension_numbers<[1], [0], [0], [1], [0, 0, 1, 1], [], []>} : vector<8x8xf32>, vector<8x256xf32>, vector<8x256xf32> -> vector<8x256xf32>
    %600 = arith.index_cast %561 : i32 to index
    %c0_284 = arith.constant 0 : index
    %601 = vector.load %arg24[%600, %c0_284] : memref<64x256xf32, #tpu.memory_space<vmem>>, vector<8x256xf32>
    %602 = arith.addf %599, %601 : vector<8x256xf32>
    %603 = arith.addf %602, %573 : vector<8x256xf32>
    %604 = vector.extract_strided_slice %603 {offsets = [0, 0], sizes = [8, 64], strides = [1, 1]} : vector<8x256xf32> to vector<8x64xf32>
    %605 = arith.negf %604 : vector<8x64xf32>
    %606 = math.exp %605 : vector<8x64xf32>
    %cst_285 = arith.constant 1.000000e+00 : f32
    %607 = vector.broadcast %cst_285 : f32 to vector<8x64xf32>
    %608 = arith.addf %607, %606 : vector<8x64xf32>
    %609 = arith.divf %607, %608 : vector<8x64xf32>
    %610 = vector.extract_strided_slice %603 {offsets = [0, 64], sizes = [8, 64], strides = [1, 1]} : vector<8x256xf32> to vector<8x64xf32>
    %611 = arith.negf %610 : vector<8x64xf32>
    %612 = math.exp %611 : vector<8x64xf32>
    %cst_286 = arith.constant 1.000000e+00 : f32
    %613 = vector.broadcast %cst_286 : f32 to vector<8x64xf32>
    %614 = arith.addf %613, %612 : vector<8x64xf32>
    %615 = arith.divf %613, %614 : vector<8x64xf32>
    %616 = vector.extract_strided_slice %603 {offsets = [0, 128], sizes = [8, 64], strides = [1, 1]} : vector<8x256xf32> to vector<8x64xf32>
    %617 = math.tanh %616 : vector<8x64xf32>
    %618 = vector.extract_strided_slice %603 {offsets = [0, 192], sizes = [8, 64], strides = [1, 1]} : vector<8x256xf32> to vector<8x64xf32>
    %619 = arith.negf %618 : vector<8x64xf32>
    %620 = math.exp %619 : vector<8x64xf32>
    %cst_287 = arith.constant 1.000000e+00 : f32
    %621 = vector.broadcast %cst_287 : f32 to vector<8x64xf32>
    %622 = arith.addf %621, %620 : vector<8x64xf32>
    %623 = arith.divf %621, %622 : vector<8x64xf32>
    %624 = arith.mulf %615, %570 : vector<8x64xf32>
    %625 = arith.mulf %609, %617 : vector<8x64xf32>
    %626 = arith.addf %624, %625 : vector<8x64xf32>
    %627 = math.tanh %626 : vector<8x64xf32>
    %628 = arith.mulf %623, %627 : vector<8x64xf32>
    %c0_288 = arith.constant 0 : index
    %c0_289 = arith.constant 0 : index
    %629 = vector.load %arg19[%c0_288, %c0_289] : memref<8x64xf32, #tpu.memory_space<vmem>>, vector<8x64xf32>
    tpu.vector_store %arg19[%c0_288, %c0_289], %628 {strides = array<i32>} : memref<8x64xf32, #tpu.memory_space<vmem>>, vector<8x64xf32>,
    %c0_290 = arith.constant 0 : index
    %c0_291 = arith.constant 0 : index
    %630 = vector.load %arg20[%c0_290, %c0_291] : memref<8x64xf32, #tpu.memory_space<vmem>>, vector<8x64xf32>
    tpu.vector_store %arg20[%c0_290, %c0_291], %626 {strides = array<i32>} : memref<8x64xf32, #tpu.memory_space<vmem>>, vector<8x64xf32>,
    %c0_292 = arith.constant 0 : index
    %c0_293 = arith.constant 0 : index
    %631 = vector.load %arg21[%c0_292, %c0_293] : memref<8x8xf32, #tpu.memory_space<vmem>>, vector<8x8xf32>
    %632 = arith.subf %577, %563 : vector<8x8xf32>
    %633 = math.absf %632 : vector<8x8xf32>
    %634 = arith.subf %587, %563 : vector<8x8xf32>
    %635 = math.absf %634 : vector<8x8xf32>
    %636 = arith.addf %633, %635 : vector<8x8xf32>
    %637 = arith.subf %594, %563 : vector<8x8xf32>
    %638 = math.absf %637 : vector<8x8xf32>
    %639 = arith.addf %636, %638 : vector<8x8xf32>
    %640 = arith.index_cast %561 : i32 to index
    %c0_294 = arith.constant 0 : index
    %641 = vector.load %arg3[%640, %c0_294] : memref<64x8xf32, #tpu.memory_space<vmem>>, vector<8x8xf32>
    %642 = arith.mulf %639, %641 : vector<8x8xf32>
    %643 = arith.addf %631, %642 : vector<8x8xf32>
    %c0_295 = arith.constant 0 : index
    %c0_296 = arith.constant 0 : index
    %644 = vector.load %arg21[%c0_295, %c0_296] : memref<8x8xf32, #tpu.memory_space<vmem>>, vector<8x8xf32>
    tpu.vector_store %arg21[%c0_295, %c0_296], %643 {strides = array<i32>} : memref<8x8xf32, #tpu.memory_space<vmem>>, vector<8x8xf32>,
    %645 = arith.index_cast %561 : i32 to index
    %c0_297 = arith.constant 0 : index
    %646 = vector.load %arg16[%645, %c0_297] : memref<64x8xf32, #tpu.memory_space<vmem>>, vector<8x8xf32>
    tpu.vector_store %arg16[%645, %c0_297], %597 {strides = array<i32>} : memref<64x8xf32, #tpu.memory_space<vmem>>, vector<8x8xf32>,
    %c7_i32 = arith.constant 7 : i32
    %c8_i32_298 = arith.constant 8 : i32
    %647 = arith.muli %c7_i32, %c8_i32_298 : i32
    %648 = tpu.assume_multiple %647, 8 : i32
    %649 = arith.index_cast %648 : i32 to index
    %c0_299 = arith.constant 0 : index
    %650 = vector.load %arg0[%649, %c0_299] : memref<64x8xf32, #tpu.memory_space<vmem>>, vector<8x8xf32>
    %651 = arith.index_cast %648 : i32 to index
    %c0_300 = arith.constant 0 : index
    %652 = vector.load %arg1[%651, %c0_300] : memref<64x8xf32, #tpu.memory_space<vmem>>, vector<8x8xf32>
    %c0_301 = arith.constant 0 : index
    %c0_302 = arith.constant 0 : index
    %653 = vector.load %arg19[%c0_301, %c0_302] : memref<8x64xf32, #tpu.memory_space<vmem>>, vector<8x64xf32>
    %654 = arith.index_cast %648 : i32 to index
    %c0_303 = arith.constant 0 : index
    %655 = vector.load %arg22[%654, %c0_303] : memref<64x64xf32, #tpu.memory_space<vmem>>, vector<8x64xf32>
    %656 = arith.mulf %653, %655 : vector<8x64xf32>
    %c0_304 = arith.constant 0 : index
    %c0_305 = arith.constant 0 : index
    %657 = vector.load %arg20[%c0_304, %c0_305] : memref<8x64xf32, #tpu.memory_space<vmem>>, vector<8x64xf32>
    %c0_306 = arith.constant 0 : index
    %c0_307 = arith.constant 0 : index
    %658 = vector.load %arg9[%c0_306, %c0_307] : memref<64x264xf32, #tpu.memory_space<vmem>>, vector<64x264xf32>
    %cst_308 = arith.constant dense<0.000000e+00> : vector<8x264xf32>
    %659 = tpu.matmul %656, %658, %cst_308 {dimension_numbers = #tpu.dot_dimension_numbers<[1], [0], [0], [1], [0, 0, 1, 1], [], []>} : vector<8x64xf32>, vector<64x264xf32>, vector<8x264xf32> -> vector<8x264xf32>
    %660 = vector.extract_strided_slice %659 {offsets = [0, 0], sizes = [8, 256], strides = [1, 1]} : vector<8x264xf32> to vector<8x256xf32>
    %661 = vector.extract_strided_slice %659 {offsets = [0, 256], sizes = [8, 8], strides = [1, 1]} : vector<8x264xf32> to vector<8x8xf32>
    %c0_309 = arith.constant 0 : index
    %c0_310 = arith.constant 0 : index
    %662 = vector.load %arg10[%c0_309, %c0_310] : memref<1x8xf32, #tpu.memory_space<vmem>>, vector<1x8xf32>
    %663 = vector.broadcast %662 : vector<1x8xf32> to vector<8x8xf32>
    %664 = arith.addf %661, %663 : vector<8x8xf32>
    %cst_311 = arith.constant 1.000000e+00 : f32
    %665 = vector.broadcast %cst_311 : f32 to vector<8x8xf32>
    %666 = arith.subf %665, %652 : vector<8x8xf32>
    %667 = arith.mulf %652, %650 : vector<8x8xf32>
    %668 = arith.mulf %666, %664 : vector<8x8xf32>
    %669 = arith.addf %667, %668 : vector<8x8xf32>
    %c0_312 = arith.constant 0 : index
    %c0_313 = arith.constant 0 : index
    %670 = vector.load %arg11[%c0_312, %c0_313] : memref<8x8xf32, #tpu.memory_space<vmem>>, vector<8x8xf32>
    %cst_314 = arith.constant dense<0.000000e+00> : vector<8x8xf32>
    %671 = tpu.matmul %669, %670, %cst_314 {dimension_numbers = #tpu.dot_dimension_numbers<[1], [0], [0], [1], [0, 0, 1, 1], [], []>} : vector<8x8xf32>, vector<8x8xf32>, vector<8x8xf32> -> vector<8x8xf32>
    %c0_315 = arith.constant 0 : index
    %c0_316 = arith.constant 0 : index
    %672 = vector.load %arg12[%c0_315, %c0_316] : memref<1x8xf32, #tpu.memory_space<vmem>>, vector<1x8xf32>
    %673 = vector.broadcast %672 : vector<1x8xf32> to vector<8x8xf32>
    %674 = arith.addf %671, %673 : vector<8x8xf32>
    %675 = arith.index_cast %648 : i32 to index
    %c0_317 = arith.constant 0 : index
    %676 = vector.load %arg23[%675, %c0_317] : memref<64x8xf32, #tpu.memory_space<vmem>>, vector<8x8xf32>
    %677 = arith.mulf %676, %674 : vector<8x8xf32>
    %cst_318 = arith.constant 1.000000e+00 : f32
    %678 = vector.broadcast %cst_318 : f32 to vector<8x8xf32>
    %679 = arith.subf %678, %676 : vector<8x8xf32>
    %680 = arith.mulf %679, %664 : vector<8x8xf32>
    %681 = arith.addf %677, %680 : vector<8x8xf32>
    %682 = arith.mulf %652, %650 : vector<8x8xf32>
    %683 = arith.mulf %666, %681 : vector<8x8xf32>
    %684 = arith.addf %682, %683 : vector<8x8xf32>
    %c0_319 = arith.constant 0 : index
    %c0_320 = arith.constant 0 : index
    %685 = vector.load %arg13[%c0_319, %c0_320] : memref<8x256xf32, #tpu.memory_space<vmem>>, vector<8x256xf32>
    %cst_321 = arith.constant dense<0.000000e+00> : vector<8x256xf32>
    %686 = tpu.matmul %684, %685, %cst_321 {dimension_numbers = #tpu.dot_dimension_numbers<[1], [0], [0], [1], [0, 0, 1, 1], [], []>} : vector<8x8xf32>, vector<8x256xf32>, vector<8x256xf32> -> vector<8x256xf32>
    %687 = arith.index_cast %648 : i32 to index
    %c0_322 = arith.constant 0 : index
    %688 = vector.load %arg24[%687, %c0_322] : memref<64x256xf32, #tpu.memory_space<vmem>>, vector<8x256xf32>
    %689 = arith.addf %686, %688 : vector<8x256xf32>
    %690 = arith.addf %689, %660 : vector<8x256xf32>
    %691 = vector.extract_strided_slice %690 {offsets = [0, 0], sizes = [8, 64], strides = [1, 1]} : vector<8x256xf32> to vector<8x64xf32>
    %692 = arith.negf %691 : vector<8x64xf32>
    %693 = math.exp %692 : vector<8x64xf32>
    %cst_323 = arith.constant 1.000000e+00 : f32
    %694 = vector.broadcast %cst_323 : f32 to vector<8x64xf32>
    %695 = arith.addf %694, %693 : vector<8x64xf32>
    %696 = arith.divf %694, %695 : vector<8x64xf32>
    %697 = vector.extract_strided_slice %690 {offsets = [0, 64], sizes = [8, 64], strides = [1, 1]} : vector<8x256xf32> to vector<8x64xf32>
    %698 = arith.negf %697 : vector<8x64xf32>
    %699 = math.exp %698 : vector<8x64xf32>
    %cst_324 = arith.constant 1.000000e+00 : f32
    %700 = vector.broadcast %cst_324 : f32 to vector<8x64xf32>
    %701 = arith.addf %700, %699 : vector<8x64xf32>
    %702 = arith.divf %700, %701 : vector<8x64xf32>
    %703 = vector.extract_strided_slice %690 {offsets = [0, 128], sizes = [8, 64], strides = [1, 1]} : vector<8x256xf32> to vector<8x64xf32>
    %704 = math.tanh %703 : vector<8x64xf32>
    %705 = vector.extract_strided_slice %690 {offsets = [0, 192], sizes = [8, 64], strides = [1, 1]} : vector<8x256xf32> to vector<8x64xf32>
    %706 = arith.negf %705 : vector<8x64xf32>
    %707 = math.exp %706 : vector<8x64xf32>
    %cst_325 = arith.constant 1.000000e+00 : f32
    %708 = vector.broadcast %cst_325 : f32 to vector<8x64xf32>
    %709 = arith.addf %708, %707 : vector<8x64xf32>
    %710 = arith.divf %708, %709 : vector<8x64xf32>
    %711 = arith.mulf %702, %657 : vector<8x64xf32>
    %712 = arith.mulf %696, %704 : vector<8x64xf32>
    %713 = arith.addf %711, %712 : vector<8x64xf32>
    %714 = math.tanh %713 : vector<8x64xf32>
    %715 = arith.mulf %710, %714 : vector<8x64xf32>
    %c0_326 = arith.constant 0 : index
    %c0_327 = arith.constant 0 : index
    %716 = vector.load %arg19[%c0_326, %c0_327] : memref<8x64xf32, #tpu.memory_space<vmem>>, vector<8x64xf32>
    tpu.vector_store %arg19[%c0_326, %c0_327], %715 {strides = array<i32>} : memref<8x64xf32, #tpu.memory_space<vmem>>, vector<8x64xf32>,
    %c0_328 = arith.constant 0 : index
    %c0_329 = arith.constant 0 : index
    %717 = vector.load %arg20[%c0_328, %c0_329] : memref<8x64xf32, #tpu.memory_space<vmem>>, vector<8x64xf32>
    tpu.vector_store %arg20[%c0_328, %c0_329], %713 {strides = array<i32>} : memref<8x64xf32, #tpu.memory_space<vmem>>, vector<8x64xf32>,
    %c0_330 = arith.constant 0 : index
    %c0_331 = arith.constant 0 : index
    %718 = vector.load %arg21[%c0_330, %c0_331] : memref<8x8xf32, #tpu.memory_space<vmem>>, vector<8x8xf32>
    %719 = arith.subf %664, %650 : vector<8x8xf32>
    %720 = math.absf %719 : vector<8x8xf32>
    %721 = arith.subf %674, %650 : vector<8x8xf32>
    %722 = math.absf %721 : vector<8x8xf32>
    %723 = arith.addf %720, %722 : vector<8x8xf32>
    %724 = arith.subf %681, %650 : vector<8x8xf32>
    %725 = math.absf %724 : vector<8x8xf32>
    %726 = arith.addf %723, %725 : vector<8x8xf32>
    %727 = arith.index_cast %648 : i32 to index
    %c0_332 = arith.constant 0 : index
    %728 = vector.load %arg3[%727, %c0_332] : memref<64x8xf32, #tpu.memory_space<vmem>>, vector<8x8xf32>
    %729 = arith.mulf %726, %728 : vector<8x8xf32>
    %730 = arith.addf %718, %729 : vector<8x8xf32>
    %c0_333 = arith.constant 0 : index
    %c0_334 = arith.constant 0 : index
    %731 = vector.load %arg21[%c0_333, %c0_334] : memref<8x8xf32, #tpu.memory_space<vmem>>, vector<8x8xf32>
    tpu.vector_store %arg21[%c0_333, %c0_334], %730 {strides = array<i32>} : memref<8x8xf32, #tpu.memory_space<vmem>>, vector<8x8xf32>,
    %732 = arith.index_cast %648 : i32 to index
    %c0_335 = arith.constant 0 : index
    %733 = vector.load %arg16[%732, %c0_335] : memref<64x8xf32, #tpu.memory_space<vmem>>, vector<8x8xf32>
    tpu.vector_store %arg16[%732, %c0_335], %684 {strides = array<i32>} : memref<64x8xf32, #tpu.memory_space<vmem>>, vector<8x8xf32>,
    %c8_i32_336 = arith.constant 8 : i32
    %c0_337 = arith.constant 0 : index
    %c0_338 = arith.constant 0 : index
    %734 = vector.load %arg21[%c0_337, %c0_338] : memref<8x8xf32, #tpu.memory_space<vmem>>, vector<8x8xf32>
    %c0_339 = arith.constant 0 : index
    %c0_340 = arith.constant 0 : index
    %735 = vector.load %arg17[%c0_339, %c0_340] : memref<8x8xf32, #tpu.memory_space<vmem>>, vector<8x8xf32>
    tpu.vector_store %arg17[%c0_339, %c0_340], %734 {strides = array<i32>} : memref<8x8xf32, #tpu.memory_space<vmem>>, vector<8x8xf32>,
    %c0_341 = arith.constant 0 : index
    %c0_342 = arith.constant 0 : index
    %736 = vector.load %arg19[%c0_341, %c0_342] : memref<8x64xf32, #tpu.memory_space<vmem>>, vector<8x64xf32>
    %c0_343 = arith.constant 0 : index
    %c0_344 = arith.constant 0 : index
    %737 = vector.load %arg14[%c0_343, %c0_344] : memref<64x6xf32, #tpu.memory_space<vmem>>, vector<64x6xf32>
    %cst_345 = arith.constant dense<0.000000e+00> : vector<8x6xf32>
    %738 = tpu.matmul %736, %737, %cst_345 {dimension_numbers = #tpu.dot_dimension_numbers<[1], [0], [0], [1], [0, 0, 1, 1], [], []>} : vector<8x64xf32>, vector<64x6xf32>, vector<8x6xf32> -> vector<8x6xf32>
    %c0_346 = arith.constant 0 : index
    %c0_347 = arith.constant 0 : index
    %739 = vector.load %arg15[%c0_346, %c0_347] : memref<1x6xf32, #tpu.memory_space<vmem>>, vector<1x6xf32>
    %740 = vector.broadcast %739 : vector<1x6xf32> to vector<8x6xf32>
    %741 = arith.addf %738, %740 : vector<8x6xf32>
    %742 = vector.extract_strided_slice %741 {offsets = [0, 0], sizes = [8, 3], strides = [1, 1]} : vector<8x6xf32> to vector<8x3xf32>
    %cst_348 = arith.constant dense<0xFF800000> : vector<8xf32>
    %743 = vector.multi_reduction <maximumf>, %742, %cst_348 [1] : vector<8x3xf32> to vector<8xf32>
    %744 = vector.shape_cast %743 : vector<8xf32> to vector<8x1xf32>
    %745 = vector.broadcast %744 : vector<8x1xf32> to vector<8x3xf32>
    %746 = arith.subf %742, %745 : vector<8x3xf32>
    %747 = math.exp %746 : vector<8x3xf32>
    %cst_349 = arith.constant dense<0.000000e+00> : vector<8xf32>
    %748 = vector.multi_reduction <add>, %747, %cst_349 [1] : vector<8x3xf32> to vector<8xf32>
    %749 = vector.shape_cast %748 : vector<8xf32> to vector<8x1xf32>
    %750 = vector.broadcast %749 : vector<8x1xf32> to vector<8x3xf32>
    %751 = arith.divf %747, %750 : vector<8x3xf32>
    %c0_350 = arith.constant 0 : index
    %c0_351 = arith.constant 0 : index
    %752 = vector.load %arg18[%c0_350, %c0_351] : memref<8x6xf32, #tpu.memory_space<vmem>>, vector<8x3xf32>
    tpu.vector_store %arg18[%c0_350, %c0_351], %751 {strides = array<i32>} : memref<8x6xf32, #tpu.memory_space<vmem>>, vector<8x3xf32>,
    %753 = vector.extract_strided_slice %741 {offsets = [0, 3], sizes = [8, 3], strides = [1, 1]} : vector<8x6xf32> to vector<8x3xf32>
    %cst_352 = arith.constant dense<0xFF800000> : vector<8xf32>
    %754 = vector.multi_reduction <maximumf>, %753, %cst_352 [1] : vector<8x3xf32> to vector<8xf32>
    %755 = vector.shape_cast %754 : vector<8xf32> to vector<8x1xf32>
    %756 = vector.broadcast %755 : vector<8x1xf32> to vector<8x3xf32>
    %757 = arith.subf %753, %756 : vector<8x3xf32>
    %758 = math.exp %757 : vector<8x3xf32>
    %cst_353 = arith.constant dense<0.000000e+00> : vector<8xf32>
    %759 = vector.multi_reduction <add>, %758, %cst_353 [1] : vector<8x3xf32> to vector<8xf32>
    %760 = vector.shape_cast %759 : vector<8xf32> to vector<8x1xf32>
    %761 = vector.broadcast %760 : vector<8x1xf32> to vector<8x3xf32>
    %762 = arith.divf %758, %761 : vector<8x3xf32>
    %c0_354 = arith.constant 0 : index
    %c3 = arith.constant 3 : index
    %763 = vector.load %arg18[%c0_354, %c3] : memref<8x6xf32, #tpu.memory_space<vmem>>, vector<8x3xf32>
    tpu.vector_store %arg18[%c0_354, %c3], %762 {strides = array<i32>} : memref<8x6xf32, #tpu.memory_space<vmem>>, vector<8x3xf32>,
    return
  }
}

</mosaic_0001>

<bundles_post_ra>
// kernel: tpu_custom_call.1
= control target key start
LH: loop header
LB: loop body
LE: loop exit
PB: predicated region body
PF: predicated region fallthrough
CT: control target
= control target key end

     0   :  { %s6272_s0 = inlined_call_operand.vmem [shape: f32[64,8], index: 0, kind: input, shape index: {}]   ;;  %s6273_s1 = inlined_call_operand.vmem [shape: f32[64,8], index: 1, kind: input, shape index: {}]   ;;  %s6274_s2 = inlined_call_operand.vmem [shape: f32[64,8], index: 2, kind: input, shape index: {}]   ;;  %s6275_s3 = inlined_call_operand.vmem [shape: f32[64,8], index: 3, kind: input, shape index: {}]   ;;  %s6276_s4 = inlined_call_operand.vmem [shape: f32[8,72], index: 4, kind: input, shape index: {}]   ;;  %s6277_s5 = inlined_call_operand.vmem [shape: f32[1,72], index: 5, kind: input, shape index: {}]   ;;  %s6278_s6 = inlined_call_operand.vmem [shape: f32[8,264], index: 6, kind: input, shape index: {}]   ;;  %s6279_s7 = inlined_call_operand.vmem [shape: f32[1,264], index: 7, kind: input, shape index: {}]   ;;  %s6280_s8 = inlined_call_operand.vmem [shape: f32[8,8], index: 8, kind: input, shape index: {}]   ;;  %s6281_s9 = inlined_call_operand.vmem [shape: f32[64,264], index: 9, kind: input, shape index: {}]   ;;  %s6282_s10 = inlined_call_operand.vmem [shape: f32[1,8], index: 10, kind: input, shape index: {}]   ;;  %s6283_s11 = inlined_call_operand.vmem [shape: f32[8,8], index: 11, kind: input, shape index: {}]   ;;  %s6284_s12 = inlined_call_operand.vmem [shape: f32[1,8], index: 12, kind: input, shape index: {}]   ;;  %s6285_s13 = inlined_call_operand.vmem [shape: f32[8,256], index: 13, kind: input, shape index: {}]   ;;  %s6286_s14 = inlined_call_operand.vmem [shape: f32[64,6], index: 14, kind: input, shape index: {}]   ;;  %s6287_s15 = inlined_call_operand.vmem [shape: f32[1,6], index: 15, kind: input, shape index: {}]   ;;  %s6288_s16 = inlined_call_operand.vmem [shape: f32[64,8], index: 16, kind: output, shape index: {0}]   ;;  %s6289_s17 = inlined_call_operand.hbm [shape: f32[8,8], index: 17, kind: output, shape index: {1}]   ;;  %s6290_s18 = inlined_call_operand.hbm [shape: f32[8,6], index: 18, kind: output, shape index: {2}]  }
   0x1   :  { %6294 = sst [smem:[#allocation14_spill]] %s6272_s0 }
   0x2   :  { %6295 = sst [smem:[#allocation15_spill]] %s6273_s1 }
   0x3   :  { %6296 = sst [smem:[#allocation16_spill]] %s6274_s2 }
   0x4   :  { %24 = vsyncpa [#allocation9], 0  ;;  %v74_v0 = vld [vmem:[%s6276_s4] sm:$0xff]  ;;  %s6297_s0 = sld [smem:[#allocation16_spill]]  ;;  %vm82_vm0 = vcmask 64512   ;;  %v5215_v5 = vmov 0.0  }
   0x5   :  { %4453 = vmatprep.subr.mxu0 %v74_v0  ;;  %735 = vst.msk [vmem:[#allocation4] sm:$0xff] %vm82_vm0, %v5215_v5  ;;  %4942 = vmatprep.subr.mxu1 %v74_v0  ;;  %v254_v8 = vld [vmem:[%s6278_s6 + $0x8] sm:$0xff]  ;;  %v253_v9 = vld [vmem:[%s6278_s6] sm:$0xff] }
   0x6   :  { %4454 = vmatpush3.msra.mxu0 %v74_v0  ;;  %4943 = vmatpush3.msra.mxu1 %v74_v0 }
   0xa   :  { %v58_v1 = vld [vmem:[%s6297_s0] sm:$0xff]  ;;  %v59_v2 = vld [vmem:[%s6297_s0 + $0x8] sm:$0xff]  ;;  %v60_v3 = vld [vmem:[%s6297_s0 + $0x10] sm:$0xff] }
   0xb   :  { %4455 = vmatprep.mubr.msk.f32.mxu0 %vm82_vm0, %v58_v1  ;;  %v62_v4 = vld [vmem:[%s6297_s0 + $0x20] sm:$0xff]  ;;  %v63_v6 = vld [vmem:[%s6297_s0 + $0x28] sm:$0xff]  ;;  %v64_v7 = vld [vmem:[%s6297_s0 + $0x30] sm:$0xff] }
   0xc   :  { %4456 = vmatmul.mubr.msk.f32.vlgmr.msra.gmra.mrb[0].mxu0 %vm82_vm0, %v59_v2  ;;  %v61_v10 = vld [vmem:[%s6297_s0 + $0x18] sm:$0xff]  ;;  %4461 = vmatprep.mubr.msk.f32.mxu1 %vm82_vm0, %v62_v4 }
   0xd   :  { %4458 = vmatprep.mubr.msk.f32.mxu0 %vm82_vm0, %v60_v3 }
   0xe   :  { %25 = vsyncpa [#allocation11], 0  ;;  %4462 = vmatmul.mubr.msk.f32.vlgmr.msra.gmra.mrb[0].mxu1 %vm82_vm0, %v63_v6  ;;  %297 = vmatprep.subr.mxu1 %v254_v8  ;;  %v65_v11 = vld [vmem:[%s6297_s0 + $0x38] sm:$0xff]  ;;  %s6298_s2 = sld [smem:[#allocation15_spill]]  ;;  %vm244_vm1 = vcmask 523264   ;;  %v743_v16 = vld [vmem:[%s6281_s9 + $0x8] sm:$0xff] }
   0xf   :  { %4464 = vmatprep.mubr.msk.f32.mxu1 %vm82_vm0, %v64_v7  ;;  %298 = vmatpush1.msra.mxu1 %v253_v9  ;;  %733 = vst.msk [vmem:[#allocation2] sm:$0xff] %vm244_vm1, %v5215_v5  ;;  %734 = vst.msk [vmem:[#allocation3] sm:$0xff] %vm244_vm1, %v5215_v5  ;;  %v746_v17 = vld [vmem:[%s6281_s9 + $0x20] sm:$0xff]  ;;  %v745_v20 = vld [vmem:[%s6281_s9 + $0x18] sm:$0xff]  ;;  %vm5218_vm2 = vmmov 0   ;;  %s6299_s30 = sld [smem:[#allocation14_spill]] }
  0x10   :  { %4459 = vmatmul.mubr.msk.f32.gmra.mrb[2].mxu0 %vm82_vm0, %v61_v10  ;;  %v5402_v18 = vpack.c.bf16 %v746_v17, %v743_v16  ;;  %v742_v19 = vld [vmem:[%s6281_s9] sm:$0xff]  ;;  %v749_v23 = vld [vmem:[%s6281_s9 + $0x38] sm:$0xff]  ;;  %v752_v24 = vld [vmem:[%s6281_s9 + $0x50] sm:$0xff]  ;;  %vm4138_vm3 = vcmask 48152   ;;  %vm4125_vm4 = vcmask 23552  }
  0x11   :  { %v5413_v22 = vpack.c.bf16 %v745_v20, %v742_v19  ;;  %v5425_v25 = vpack.c.bf16 %v752_v24, %v749_v23  ;;  %v748_v26 = vld [vmem:[%s6281_s9 + $0x30] sm:$0xff]  ;;  %v751_v27 = vld [vmem:[%s6281_s9 + $0x48] sm:$0xff]  ;;  %v758_v31 = vld [vmem:[%s6281_s9 + $0x80] sm:$0xff] }
  0x12   :  { %4465 = vmatmul.mubr.msk.f32.gmra.mrb[2].mxu1 %vm82_vm0, %v65_v11  ;;  %4707 = vmatprep.subr.bf16.mxu1 %v5402_v18  ;;  %v5436_v29 = vpack.c.bf16 %v751_v27, %v748_v26  ;;  %v755_v30 = vld [vmem:[%s6281_s9 + $0x68] sm:$0xff]  ;;  %v754_v33 = vld [vmem:[%s6281_s9 + $0x60] sm:$0xff]  ;;  %v757_v34 = vld [vmem:[%s6281_s9 + $0x78] sm:$0xff] }
  0x13   :  { %361 = vmatprep.mubr.f32.mxu1 %v5215_v5  ;;  %v5448_v32 = vpack.c.bf16 %v758_v31, %v755_v30  ;;  %v5459_v36 = vpack.c.bf16 %v757_v34, %v754_v33  ;;  %v761_v37 = vld [vmem:[%s6281_s9 + $0x98] sm:$0xff]  ;;  %v764_v38 = vld [vmem:[%s6281_s9 + $0xb0] sm:$0xff]  ;;  %v763_v41 = vld [vmem:[%s6281_s9 + $0xa8] sm:$0xff] }
  0x14   :  { %v5362_v12 = vld [vmem:[%s6298_s2] sm:$0xff]  ;;  %v5374_v13 = vld [vmem:[%s6298_s2 + $0x8] sm:$0xff]  ;;  %v5382_v14 = vld [vmem:[%s6298_s2 + $0x10] sm:$0xff]  ;;  %v5471_v39 = vpack.c.bf16 %v764_v38, %v761_v37 }
  0x15   :  { %4469 = vmatprep.mubr.msk.f32.mxu0 %vm82_vm0, %v5362_v12  ;;  %v69_v15 = vld [vmem:[%s6298_s2 + $0x18] sm:$0xff]  ;;  %v70_v21 = vld [vmem:[%s6298_s2 + $0x20] sm:$0xff]  ;;  %v71_v28 = vld [vmem:[%s6298_s2 + $0x28] sm:$0xff] }
  0x16   :  { %4203 = vmatmul.mubr.msk.f32.vlgmr.msra.gmra.mrb[4].mxu1 %vm82_vm0, %v5362_v12  ;;  %v72_v35 = vld [vmem:[%s6298_s2 + $0x30] sm:$0xff]  ;;  %v73_v42 = vld [vmem:[%s6298_s2 + $0x38] sm:$0xff]  ;;  %v531_v45 = vld [vmem:[%s6280_s8] sm:$0xff] }
  0x17   :  { %367 = vmatprep.mubr.f32.mxu1 %v5215_v5  ;;  %4709 = vmatpush1.bf16.msra.mxu1 %v5413_v22  ;;  %v760_v40 = vld [vmem:[%s6281_s9 + $0x90] sm:$0xff]  ;;  %v4194_v46 = vld [vmem:[%s6277_s5] ss:$0 sm:$0xff]  ;;  %s5217_s5 = smov 64  }
  0x18   :  { %4711 = vmatprep.subr.bf16.mxu1 %v5425_v25  ;;  %v5482_v43 = vpack.c.bf16 %v763_v41, %v760_v40  ;;  %v255_v44 = vld [vmem:[%s6278_s6 + $0x10] sm:$0xff] }
  0x19   :  { %4467 = vmatprep.subr.mxu0 %v255_v44 }
  0x1a   :  { %4204 = vmatmul.mubr.msk.f32.gmra.mrb[6].mxu1 %vm82_vm0, %v5374_v13  ;;  %4468 = vmatpush3.msra.mxu0 %v255_v44  ;;  %v738_v44 = vld [vmem:[#allocation2] sm:$0xff] }
  0x1b   :  { %373 = vmatprep.mubr.f32.mxu1 %v5215_v5  ;;  %4713 = vmatpush1.bf16.msra.mxu1 %v5436_v29 }
  0x1c   :  { %4715 = vmatprep.subr.bf16.mxu1 %v5448_v32  ;;  %4470 = vmatmul.mubr.msk.f32.vlgmr.msra.gmra.mrb[4].mxu0 %vm82_vm0, %v5374_v13 }
  0x1d   :  { %4481 = vmatprep.subr.mxu0 %v531_v45  ;;  %4472 = vmatprep.mubr.msk.f32.mxu0 %vm82_vm0, %v5382_v14 }
  0x1e   :  { %4205 = vmatmul.mubr.msk.f32.gmra.mrb[8].mxu1 %vm82_vm0, %v5382_v14  ;;  %4482 = vmatpush3.msra.mxu0 %v531_v45 }
  0x1f   :  { %379 = vmatprep.mubr.f32.mxu1 %v5215_v5  ;;  %4717 = vmatpush1.bf16.msra.mxu1 %v5459_v36 }
  0x20   :  { %4719 = vmatprep.subr.bf16.mxu1 %v5471_v39  ;;  %4473 = vmatmul.mubr.msk.f32.gmra.mrb[6].mxu0 %vm82_vm0, %v69_v15 }
  0x21   :  { %4475 = vmatprep.mubr.msk.f32.mxu0 %vm82_vm0, %v70_v21 }
  0x22   :  { %4206 = vmatmul.mubr.msk.f32.gmra.mrb[10].mxu1 %vm82_vm0, %v69_v15 }
  0x23   :  { %385 = vmatprep.mubr.f32.mxu1 %v5215_v5  ;;  %4721 = vmatpush1.bf16.msra.mxu1 %v5482_v43 }
  0x24   :  { %4514 = vmatprep.subr.mxu1 %v5215_v5  ;;  %4476 = vmatmul.mubr.msk.f32.gmra.mrb[8].mxu0 %vm82_vm0, %v71_v28 }
  0x25   :  { %4478 = vmatprep.mubr.msk.f32.mxu0 %vm82_vm0, %v72_v35 }
  0x26   :  { %4207 = vmatmul.mubr.msk.f32.gmra.mrb[12].mxu1 %vm82_vm0, %v70_v21 }
  0x27   :  { %391 = vmatprep.mubr.f32.mxu1 %v5215_v5 }
  0x28   :  { %4479 = vmatmul.mubr.msk.f32.gmra.mrb[10].mxu0 %vm82_vm0, %v73_v42 }
  0x2a   :  { %4208 = vmatmul.mubr.msk.f32.gmra.mrb[14].mxu1 %vm82_vm0, %v71_v28  ;;  %v5216_v28 = vmov 0.0|0.0  }
  0x2b   :  { %397 = vmatprep.mubr.f32.mxu1 %v5215_v5  ;;  %4722 = vmatprep.subr.bf16.mxu0 %v5216_v28 }
  0x2e   :  { %4209 = vmatmul.mubr.msk.f32.gmra.mrb[16].mxu1 %vm82_vm0, %v72_v35 }
  0x2f   :  { %403 = vmatprep.mubr.f32.mxu1 %v5215_v5 }
  0x32   :  { %4210 = vmatmul.mubr.msk.f32.gmra.mrb[18].mxu1 %vm82_vm0, %v73_v42 }
  0x33   :  { %833 = vmatprep.mubr.f32.mxu1 %v5215_v5 }
  0xdf   :  { %v4457_v47 = vpop.f32.mrb[0].mxu0 }
  0xe0   :  { %v179_v48 = vadd.f32 %v4457_v47, %v4194_v46  ;;  %v173_v49 = vpop.f32.mrb[1].mxu0  ;;  %v744_v47 = vld [vmem:[%s6281_s9 + $0x10] sm:$0xff] }
  0xe1   :  { %v174_v50 = vadd.f32 %v4194_v46, %v173_v49  ;;  %v4463_v51 = vpop.f32.mrb[0].mxu1 }
  0xe2   :  { %v213_v52 = vmax.f32 %v179_v48, 0.0  ;;  %v199_v53 = vadd.f32 %v4463_v51, %v4194_v46  ;;  %v193_v54 = vpop.f32.mrb[1].mxu1  ;;  %v747_v48 = vld [vmem:[%s6281_s9 + $0x28] sm:$0xff]  ;;  %v750_v51 = vld [vmem:[%s6281_s9 + $0x40] sm:$0xff] }
  0xe3   :  { %v212_v55 = vmax.f32 %v174_v50, 0.0  ;;  %v4460_v56 = vpop.f32.mrb[2].mxu0  ;;  %v194_v57 = vadd.f32 %v4194_v46, %v193_v54  ;;  %v5534_v50 = vpack.c.bf16 %v747_v48, %v744_v47  ;;  %v918_v48 = vsub.f32 1.0, %v5362_v12 }
  0xe4   :  { %v221_v58 = vsub.f32 0.0, %v213_v52  ;;  %v189_v59 = vadd.f32 %v4460_v56, %v4194_v46  ;;  %v183_v60 = vpop.f32.mrb[3].mxu0  ;;  %v217_v61 = vmax.f32 %v199_v53, 0.0  ;;  %v753_v52 = vld [vmem:[%s6281_s9 + $0x58] sm:$0xff]  ;;  %v756_v56 = vld [vmem:[%s6281_s9 + $0x70] sm:$0xff] }
  0xe5   :  { %v220_v62 = vsub.f32 0.0, %v212_v55  ;;  %v184_v63 = vadd.f32 %v4194_v46, %v183_v60  ;;  %v216_v0 = vmax.f32 %v194_v57, 0.0  ;;  %v4466_v1 = vpop.f32.mrb[2].mxu1  ;;  %v5545_v55 = vpack.c.bf16 %v753_v52, %v750_v51  ;;  %v759_v57 = vld [vmem:[%s6281_s9 + $0x88] sm:$0xff] }
  0xe6   :  { %v230_v2 = vmul.f32 1.442695, %v221_v58  ;;  %v215_v3 = vmax.f32 %v189_v59, 0.0  ;;  %v225_v4 = vsub.f32 0.0, %v217_v61  ;;  %v209_v6 = vadd.f32 %v4466_v1, %v4194_v46  ;;  %v203_v7 = vpop.f32.mrb[3].mxu1  ;;  %v762_v61 = vld [vmem:[%s6281_s9 + $0xa0] sm:$0xff] }
  0xe7   :  { %v228_v8 = vmul.f32 1.442695, %v220_v62  ;;  %v214_v9 = vmax.f32 %v184_v63, 0.0  ;;  %v224_v10 = vsub.f32 0.0, %v216_v0  ;;  %v204_v11 = vadd.f32 %v4194_v46, %v203_v7  ;;  %v765_v62 = vld [vmem:[%s6281_s9 + $0xb8] sm:$0xff] }
  0xe8   :  { %5015 = vpow2.f32 %v230_v2  ;;  %v223_v15 = vsub.f32 0.0, %v215_v3  ;;  %v238_v16 = vmul.f32 1.442695, %v225_v4  ;;  %v219_v17 = vmax.f32 %v209_v6, 0.0  ;;  %v5591_v3 = vld [vmem:[%s6283_s11] sm:$0xff] }
  0xe9   :  { %5017 = vpow2.f32 %v228_v8  ;;  %v222_v19 = vsub.f32 0.0, %v214_v9  ;;  %v236_v20 = vmul.f32 1.442695, %v224_v10  ;;  %v218_v21 = vmax.f32 %v204_v11, 0.0  ;;  %v5600_v8 = vld [vmem:[%s6279_s7] sm:$0x7] }
  0xea   :  { %v234_v23 = vmul.f32 1.442695, %v223_v15  ;;  %5019 = vpow2.f32 %v238_v16  ;;  %v227_v24 = vsub.f32 0.0, %v219_v17  ;;  %v5557_v60 = vpack.c.bf16 %v759_v57, %v756_v56 }
  0xeb   :  { %v232_v26 = vmul.f32 1.442695, %v222_v19  ;;  %5021 = vpow2.f32 %v236_v20  ;;  %v226_v27 = vsub.f32 0.0, %v218_v21  ;;  %v5569_v1 = vpack.c.bf16 %v765_v62, %v762_v61 }
  0xec   :  { %5023 = vpow2.f32 %v234_v23  ;;  %v242_v30 = vmul.f32 1.442695, %v227_v24  ;;  %v258_v4 = vlaneseq }
  0xed   :  { %5025 = vpow2.f32 %v232_v26  ;;  %v240_v31 = vmul.f32 1.442695, %v226_v27 }
  0xee   :  { %5027 = vpow2.f32 %v242_v30  ;;  %v5594_v6 = vshrl.u32 %v258_v4, 7 }
  0xef   :  { %5029 = vpow2.f32 %v240_v31 }
  0xf0   :  { %v268_v7 = vsub.s32 2, %v5594_v6 }
  0xf2   :  { %v5016_v33 = vpop.eup %5015  ;;  %v269_v9 = vrot.slane %v5600_v8, %v268_v7 }
  0xf3   :  { %v5018_v34 = vpop.eup %5017  ;;  %246 = vst.msk [vmem:[#allocation5 + $0x8] sm:$0xff] %vm244_vm1, %v5016_v33 }
  0xf4   :  { %v5020_v35 = vpop.eup %5019  ;;  %245 = vst.msk [vmem:[#allocation5] sm:$0xff] %vm244_vm1, %v5018_v34  ;;  %540 = vrot.lane.b32.xlu0 %v5018_v34, %s5217_s5 }
  0xf5   :  { %v5022_v37 = vpop.eup %5021  ;;  %250 = vst.msk [vmem:[#allocation5 + $0x28] sm:$0xff] %vm244_vm1, %v5020_v35 }
  0xf6   :  { %v5024_v38 = vpop.eup %5023  ;;  %249 = vst.msk [vmem:[#allocation5 + $0x20] sm:$0xff] %vm244_vm1, %v5022_v37 }
  0xf7   :  { %v5026_v40 = vpop.eup %5025  ;;  %248 = vst.msk [vmem:[#allocation5 + $0x18] sm:$0xff] %vm244_vm1, %v5024_v38 }
  0xf8   :  { %v5028_v41 = vpop.eup %5027  ;;  %247 = vst.msk [vmem:[#allocation5 + $0x10] sm:$0xff] %vm244_vm1, %v5026_v40  ;;  %544 = vrot.lane.b32.xlu1 %v5026_v40, %s5217_s5  ;;  %542 = vrot.lane.b32.xlu0 %v5016_v33, %s5217_s5 }
  0xf9   :  { %v5030_v42 = vpop.eup %5029  ;;  %252 = vst.msk [vmem:[#allocation5 + $0x38] sm:$0xff] %vm244_vm1, %v5028_v41 }
  0xfa   :  { %251 = vst.msk [vmem:[#allocation5 + $0x30] sm:$0xff] %vm244_vm1, %v5030_v42 }
  0xfb   :  { %v739_v45 = vld [vmem:[#allocation5] sm:$0xff] }
  0xfc   :  { %546 = vrot.lane.b32.xlu1 %v5024_v38, %s5217_s5  ;;  %548 = vrot.lane.b32.xlu0 %v5022_v37, %s5217_s5  ;;  %v740_v46 = vmul.f32 %v739_v45, %v738_v44  ;;  %v5606_v44 = vld [vmem:[%s6299_s30] sm:$0xff] }
  0xfd   :  { %v5611_v45 = vld [vmem:[%s6282_s10] ss:$0 sm:$0xff]  ;;  %v5617_v57 = vmul.f32 %v5606_v44, %v5362_v12  ;;  %v1129_v12 = vld [vmem:[#allocation4] sm:$0xff] }
  0xfe   :  { %4235 = vmatmul.mubr.msk.f32.vlgmr.msra.gmra.mrb[4].mxu1 %vm244_vm1, %v740_v46 }
  0xff   :  { %4516 = vmatprep.mubr.msk.f32.mxu1 %vm5218_vm2, %v5215_v5  ;;  %4515 = vmatpush3.msra.mxu1 %v5591_v3 }
 0x100   :  { %550 = vrot.lane.b32.xlu1 %v5020_v35, %s5217_s5  ;;  %552 = vrot.lane.b32.xlu0 %v5030_v42, %s5217_s5 }
 0x104   :  { %554 = vrot.lane.b32.xlu1 %v5028_v41, %s5217_s5 }
 0x166   :  { %v541_v49 = vpop.permute.xlu0 %540 }
 0x167   :  { %4483 = vmatprep.mubr.msk.f32.mxu0 %vm82_vm0, %v541_v49 }
 0x16a   :  { %v545_v53 = vpop.permute.xlu1 %544  ;;  %v543_v54 = vpop.permute.xlu0 %542 }
 0x16b   :  { %4484 = vmatmul.mubr.msk.f32.vlgmr.msra.gmra.mrb[4].mxu0 %vm82_vm0, %v543_v54 }
 0x16c   :  { %4724 = vmatpush3.bf16.msra.mxu0 %v5534_v50  ;;  %4486 = vmatprep.mubr.msk.f32.mxu0 %vm82_vm0, %v545_v53 }
 0x16d   :  { %4725 = vmatprep.subr.bf16.mxu0 %v5216_v28 }
 0x16e   :  { %v547_v58 = vpop.permute.xlu1 %546  ;;  %v549_v59 = vpop.permute.xlu0 %548 }
 0x16f   :  { %4487 = vmatmul.mubr.msk.f32.gmra.mrb[6].mxu0 %vm82_vm0, %v547_v58 }
 0x170   :  { %4727 = vmatpush3.bf16.msra.mxu0 %v5545_v55  ;;  %4489 = vmatprep.mubr.msk.f32.mxu0 %vm82_vm0, %v549_v59 }
 0x171   :  { %4728 = vmatprep.subr.bf16.mxu0 %v5216_v28 }
 0x172   :  { %v551_v63 = vpop.permute.xlu1 %550  ;;  %v553_v0 = vpop.permute.xlu0 %552 }
 0x173   :  { %4490 = vmatmul.mubr.msk.f32.gmra.mrb[8].mxu0 %vm82_vm0, %v551_v63 }
 0x174   :  { %4730 = vmatpush3.bf16.msra.mxu0 %v5557_v60  ;;  %4492 = vmatprep.mubr.msk.f32.mxu0 %vm82_vm0, %v553_v0 }
 0x175   :  { %4731 = vmatprep.subr.bf16.mxu0 %v5216_v28 }
 0x176   :  { %v555_v2 = vpop.permute.xlu1 %554 }
 0x177   :  { %4493 = vmatmul.mubr.msk.f32.gmra.mrb[10].mxu0 %vm82_vm0, %v555_v2 }
 0x178   :  { %4733 = vmatpush3.bf16.msra.mxu0 %v5569_v1  ;;  %4511 = vmatprep.mubr.msk.f32.mxu0 %vm5218_vm2, %v5215_v5 }
 0x179   :  { %4750 = vmatprep.subr.bf16.mxu0 %v5216_v28 }
 0x17b   :  { %4512 = vmatmul.mubr.msk.f32.vlgmr.msra.gmra.mrb[12].mxu0 %vm244_vm1, %v740_v46 }
 0x17c   :  { %4752 = vmatpush3.bf16.msra.mxu0 %v5534_v50  ;;  %4535 = vmatprep.mubr.msk.f32.mxu0 %vm5218_vm2, %v5215_v5 }
 0x17d   :  { %4753 = vmatprep.subr.bf16.mxu0 %v5216_v28 }
 0x180   :  { %4755 = vmatpush3.bf16.msra.mxu0 %v5545_v55 }
 0x181   :  { %4756 = vmatprep.subr.bf16.mxu0 %v5216_v28 }
 0x184   :  { %4758 = vmatpush3.bf16.msra.mxu0 %v5557_v60 }
 0x185   :  { %4759 = vmatprep.subr.bf16.mxu0 %v5216_v28 }
 0x188   :  { %4761 = vmatpush3.bf16.msra.mxu0 %v5569_v1 }
 0x189   :  { %4778 = vmatprep.subr.bf16.mxu0 %v5216_v28 }
 0x23e   :  { %v4485_v10 = vpop.f32.mrb[4].mxu0 }
 0x23f   :  { %v4960_v11 = vadd.f32 %v4485_v10, %v269_v9  ;;  %v638_v15 = vpop.f32.mrb[5].mxu0 }
 0x240   :  { %v4961_v16 = vadd.f32 %v638_v15, %v269_v9 }
 0x241   :  { %v4228_v17 = vmul.f32 -1.442695, %v4960_v11 }
 0x242   :  { %v4227_v19 = vmul.f32 -1.442695, %v4961_v16  ;;  %v4488_v20 = vpop.f32.mrb[6].mxu0 }
 0x243   :  { %5031 = vpow2.f32 %v4228_v17  ;;  %v4962_v21 = vadd.f32 %v4488_v20, %v269_v9  ;;  %v648_v23 = vpop.f32.mrb[7].mxu0 }
 0x244   :  { %5033 = vpow2.f32 %v4227_v19  ;;  %v4963_v24 = vadd.f32 %v648_v23, %v269_v9 }
 0x245   :  { %v4230_v26 = vmul.f32 -1.442695, %v4962_v21 }
 0x246   :  { %v4229_v27 = vmul.f32 -1.442695, %v4963_v24  ;;  %v4491_v30 = vpop.f32.mrb[8].mxu0 }
 0x247   :  { %5035 = vpow2.f32 %v4230_v26  ;;  %v4964_v31 = vadd.f32 %v4491_v30, %v269_v9  ;;  %v658_v33 = vpop.f32.mrb[9].mxu0 }
 0x248   :  { %5037 = vpow2.f32 %v4229_v27  ;;  %v4965_v34 = vadd.f32 %v658_v33, %v269_v9  ;;  %v5641_v33 = vld [vmem:[%s6285_s13] sm:$0xff] }
 0x249   :  { %v4232_v35 = vmul.f32 -1.442695, %v4964_v31  ;;  %v5635_v31 = vld [vmem:[%s6285_s13 + $0x8] sm:$0xff] }
 0x24a   :  { %v4231_v37 = vmul.f32 -1.442695, %v4965_v34  ;;  %v4494_v38 = vpop.f32.mrb[10].mxu0  ;;  %1020 = vmatprep.subr.mxu1 %v5635_v31  ;;  %v741_v34 = vld [vmem:[#allocation3] sm:$0xff] }
 0x24b   :  { %5039 = vpow2.f32 %v4232_v35  ;;  %v4966_v40 = vadd.f32 %v4494_v38, %v269_v9  ;;  %v668_v41 = vpop.f32.mrb[11].mxu0  ;;  %1107 = vrot.lane.b32.xlu0 %v741_v34, %s5217_s5 }
 0x24c   :  { %5041 = vpow2.f32 %v4231_v37  ;;  %v4967_v42 = vadd.f32 %v668_v41, %v269_v9  ;;  %v5649_v37 = vld [vmem:[%s6284_s12] ss:$0 sm:$0xff] }
 0x24d   :  { %v5032_v46 = vpop.eup %5031  ;;  %v4234_v47 = vmul.f32 -1.442695, %v4966_v40 }
 0x24e   :  { %v5034_v49 = vpop.eup %5033  ;;  %v702_v51 = vadd.f32 1.0, %v5032_v46  ;;  %v4233_v52 = vmul.f32 -1.442695, %v4967_v42  ;;  %v906_v53 = vpop.f32.mrb[12].mxu0 }
 0x24f   :  { %v701_v54 = vadd.f32 1.0, %v5034_v49  ;;  %5043 = vpow2.f32 %v4234_v47  ;;  %v917_v56 = vadd.f32 %v5611_v45, %v906_v53  ;;  %v4513_v58 = vpop.f32.mrb[13].mxu0 }
 0x250   :  { %5045 = vrcp.f32 %v702_v51 }
 0x251   :  { %v5036_v59 = vpop.eup %5035  ;;  %5047 = vrcp.f32 %v701_v54  ;;  %v920_v61 = vmul.f32 %v918_v48, %v917_v56  ;;  %v1130_v41 = vsub.f32 %v917_v56, %v5606_v44 }
 0x252   :  { %v5038_v62 = vpop.eup %5037  ;;  %v704_v63 = vadd.f32 1.0, %v5036_v59  ;;  %5049 = vpow2.f32 %v4233_v52 }
 0x253   :  { %v703_v0 = vadd.f32 1.0, %v5038_v62  ;;  %v921_v2 = vadd.f32 %v920_v61, %v5617_v57  ;;  %v1131_v52 = vand.u32 2147483647, %v1130_v41 }
 0x254   :  { %5051 = vrcp.f32 %v704_v63 }
 0x255   :  { %v5040_v4 = vpop.eup %5039  ;;  %5053 = vrcp.f32 %v703_v0  ;;  %4517 = vmatmul.mubr.msk.f32.vlgmr.msra.gmra.mrb[20].mxu1 %vm82_vm0, %v921_v2  ;;  %v1138_v0 = vld [vmem:[%s6275_s3] sm:$0xff] }
 0x256   :  { %v5042_v7 = vpop.eup %5041  ;;  %v706_v9 = vadd.f32 1.0, %v5040_v4  ;;  %1084 = vmatprep.mubr.f32.mxu1 %v5215_v5  ;;  %1021 = vmatpush1.msra.mxu1 %v5641_v33 }
 0x257   :  { %v705_v10 = vadd.f32 1.0, %v5042_v7  ;;  %4735 = vmatprep.subr.bf16.mxu1 %v5402_v18 }
 0x258   :  { %5055 = vrcp.f32 %v706_v9 }
 0x259   :  { %v5044_v11 = vpop.eup %5043  ;;  %5057 = vrcp.f32 %v705_v10 }
 0x25a   :  { %v5046_v15 = vpop.eup %5045  ;;  %v708_v16 = vadd.f32 1.0, %v5044_v11  ;;  %v264_v11 = vsub.s32 1, %v5594_v6 }
 0x25b   :  { %v5048_v17 = vpop.eup %5047  ;;  %726 = vst.msk [vmem:[#allocation6 + $0x8] sm:$0xff] %vm82_vm0, %v5046_v15 }
 0x25c   :  { %v5050_v19 = vpop.eup %5049  ;;  %725 = vst.msk [vmem:[#allocation6] sm:$0xff] %vm82_vm0, %v5048_v17  ;;  %5059 = vrcp.f32 %v708_v16  ;;  %v5683_v15 = vrot.slane %v5600_v8, %v264_v11 }
 0x25d   :  { %v707_v20 = vadd.f32 1.0, %v5050_v19 }
 0x25e   :  { %v5052_v21 = vpop.eup %5051 }
 0x25f   :  { %v5054_v23 = vpop.eup %5053  ;;  %728 = vst.msk [vmem:[#allocation6 + $0x18] sm:$0xff] %vm82_vm0, %v5052_v21  ;;  %5061 = vrcp.f32 %v707_v20 }
 0x260   :  { %727 = vst.msk [vmem:[#allocation6 + $0x10] sm:$0xff] %vm82_vm0, %v5054_v23 }
 0x262   :  { %v5056_v24 = vpop.eup %5055 }
 0x263   :  { %v5058_v26 = vpop.eup %5057  ;;  %730 = vst.msk [vmem:[#allocation6 + $0x28] sm:$0xff] %vm82_vm0, %v5056_v24  ;;  %v1003_v35 = vld [vmem:[#allocation6] sm:$0xff] }
 0x264   :  { %729 = vst.msk [vmem:[#allocation6 + $0x20] sm:$0xff] %vm82_vm0, %v5058_v26  ;;  %v1005_v38 = vsub.f32 1.0, %v1003_v35 }
 0x266   :  { %v5060_v27 = vpop.eup %5059  ;;  %v1006_v49 = vmul.f32 %v1005_v38, %v917_v56  ;;  %v260_v56 = vsub.s32 0, %v5594_v6 }
 0x267   :  { %732 = vst.msk [vmem:[#allocation6 + $0x38] sm:$0xff] %vm82_vm0, %v5060_v27 }
 0x269   :  { %v5062_v30 = vpop.eup %5061 }
 0x26a   :  { %731 = vst.msk [vmem:[#allocation6 + $0x30] sm:$0xff] %vm82_vm0, %v5062_v30 }
 0x2bd   :  { %v1108_v27 = vpop.permute.xlu0 %1107 }
 0x328   :  { %v999_v40 = vpop.f32.mrb[20].mxu1 }
 0x329   :  { %v1000_v42 = vadd.f32 %v5649_v37, %v999_v40  ;;  %v4518_v46 = vpop.f32.mrb[21].mxu1 }
 0x32b   :  { %v1004_v47 = vmul.f32 %v1003_v35, %v1000_v42  ;;  %v1132_v51 = vsub.f32 %v1000_v42, %v5606_v44 }
 0x32d   :  { %v1007_v53 = vadd.f32 %v1006_v49, %v1004_v47  ;;  %v1133_v54 = vand.u32 2147483647, %v1132_v51  ;;  %v1149_v49 = vld [vmem:[#allocation5 + $0x8] sm:$0xff] }
 0x32f   :  { %v1008_v58 = vmul.f32 %v1007_v53, %v918_v48  ;;  %v1134_v59 = vadd.f32 %v1133_v54, %v1131_v52  ;;  %v1135_v61 = vsub.f32 %v1007_v53, %v5606_v44  ;;  %v4243_v52 = vld [vmem:[%s6299_s30 + $0x8] sm:$0xff]  ;;  %v1328_v53 = vsub.f32 1.0, %v5374_v13 }
 0x331   :  { %v1009_v62 = vadd.f32 %v1008_v58, %v5617_v57  ;;  %v1136_v63 = vand.u32 2147483647, %v1135_v61  ;;  %v5678_v57 = vrot.slane %v5600_v8, %v260_v56 }
 0x333   :  { %v1137_v2 = vadd.f32 %v1136_v63, %v1134_v59  ;;  %1142 = vst.msk [vmem:[%s6288_s16] sm:$0xff] %vm82_vm0, %v1009_v62  ;;  %4240 = vmatmul.mubr.msk.f32.vlgmr.msra.gmra.mrb[4].mxu1 %vm82_vm0, %v1009_v62  ;;  %v1329_v59 = vmul.f32 %v4243_v52, %v5374_v13 }
 0x334   :  { %4737 = vmatpush1.bf16.msra.mxu1 %v5413_v22  ;;  %1243 = vmatprep.mubr.f32.mxu1 %v5215_v5 }
 0x335   :  { %v1139_v44 = vmul.f32 %v1138_v0, %v1137_v2  ;;  %4739 = vmatprep.subr.bf16.mxu1 %v5425_v25  ;;  %v1414_v0 = vld [vmem:[#allocation6 + $0x8] sm:$0xff] }
 0x337   :  { %v1140_v48 = vadd.f32 %v1139_v44, %v1129_v12 }
 0x338   :  { %4741 = vmatpush1.bf16.msra.mxu1 %v5436_v29 }
 0x339   :  { %1141 = vst.msk [vmem:[#allocation4] sm:$0xff] %vm82_vm0, %v1140_v48  ;;  %4743 = vmatprep.subr.bf16.mxu1 %v5448_v32  ;;  %v1416_v48 = vsub.f32 1.0, %v1414_v0 }
 0x33c   :  { %4745 = vmatpush1.bf16.msra.mxu1 %v5459_v36 }
 0x33d   :  { %4747 = vmatprep.subr.bf16.mxu1 %v5471_v39 }
 0x340   :  { %4749 = vmatpush1.bf16.msra.mxu1 %v5482_v43 }
 0x341   :  { %4538 = vmatprep.subr.mxu1 %v5215_v5 }
 0x406   :  { %v1086_v4 = vpop.f32.mrb[4].mxu1 }
 0x407   :  { %v4944_v7 = vadd.f32 %v1086_v4, %v5678_v57  ;;  %v1088_v9 = vpop.f32.mrb[5].mxu1 }
 0x408   :  { %v4945_v16 = vadd.f32 %v1088_v9, %v5683_v15 }
 0x409   :  { %v4241_v10 = vmul.f32 -1.442695, %v4944_v7 }
 0x40a   :  { %v4242_v24 = vmul.f32 -1.442695, %v4945_v16 }
 0x40b   :  { %5063 = vpow2.f32 %v4241_v10 }
 0x40c   :  { %5065 = vtanh.f32 %v4945_v16 }
 0x415   :  { %v5064_v17 = vpop.eup %5063 }
 0x416   :  { %v1096_v19 = vadd.f32 1.0, %v5064_v17  ;;  %v5066_v20 = vpop.eup %5065 }
 0x418   :  { %5067 = vrcp.f32 %v1096_v19 }
 0x419   :  { %5069 = vpow2.f32 %v4242_v24 }
 0x422   :  { %v5068_v21 = vpop.eup %5067 }
 0x423   :  { %v1111_v23 = vmul.f32 %v5068_v21, %v5066_v20  ;;  %v5070_v26 = vpop.eup %5069  ;;  %v1110_v6 = vmul.f32 %v5068_v21, %v1108_v27 }
 0x424   :  { %v1103_v30 = vadd.f32 1.0, %v5070_v26  ;;  %v1540_v26 = vld [vmem:[#allocation4] sm:$0xff] }
 0x425   :  { %1113 = vrot.lane.b32.xlu1 %v1111_v23, %s5217_s5 }
 0x426   :  { %5071 = vrcp.f32 %v1103_v30 }
 0x430   :  { %v5072_v35 = vpop.eup %5071 }
 0x497   :  { %v1114_v34 = vpop.permute.xlu1 %1113 }
 0x498   :  { %v1116_v8 = vadd.f32 %v1114_v34, %v1110_v6 }
 0x49a   :  { %5073 = vtanh.f32 %v1116_v8  ;;  %1125 = vrot.lane.b32.xlu1 %v1116_v8, %s5217_s5 }
 0x4a4   :  { %v5074_v38 = vpop.eup %5073 }
 0x4a5   :  { %v1118_v40 = vmul.f32 %v5074_v38, %v5072_v35 }
 0x4a7   :  { %1120 = vrot.lane.b32.xlu0 %v1118_v40, %s5217_s5 }
 0x50c   :  { %v1126_v41 = vpop.permute.xlu1 %1125 }
 0x50d   :  { %1128 = vst.msk [vmem:[#allocation3] sm:$0xff] %vm244_vm1, %v1126_v41 }
 0x514   :  { %v1151_v42 = vld [vmem:[#allocation3] sm:$0xff] }
 0x515   :  { %1518 = vrot.lane.b32.xlu0 %v1151_v42, %s5217_s5 }
 0x519   :  { %v1121_v46 = vpop.permute.xlu0 %1120 }
 0x51a   :  { %1123 = vst.msk [vmem:[#allocation2] sm:$0xff] %vm244_vm1, %v1121_v46 }
 0x521   :  { %v1147_v47 = vld [vmem:[#allocation2] sm:$0xff] }
 0x522   :  { %v1150_v51 = vmul.f32 %v1149_v49, %v1147_v47 }
 0x524   :  { %4245 = vmatmul.mubr.msk.f32.vlgmr.msra.gmra.mrb[6].mxu1 %vm244_vm1, %v1150_v51  ;;  %4536 = vmatmul.mubr.msk.f32.vlgmr.msra.gmra.mrb[14].mxu0 %vm244_vm1, %v1150_v51 }
 0x525   :  { %4539 = vmatpush3.msra.mxu1 %v5591_v3  ;;  %4540 = vmatprep.mubr.msk.f32.mxu1 %vm5218_vm2, %v5215_v5 }
 0x526   :  { %1431 = vmatprep.subr.mxu1 %v5635_v31  ;;  %4780 = vmatpush3.bf16.msra.mxu0 %v5534_v50 }
 0x527   :  { %4781 = vmatprep.subr.bf16.mxu0 %v5216_v28  ;;  %4559 = vmatprep.mubr.msk.f32.mxu0 %vm5218_vm2, %v5215_v5 }
 0x52a   :  { %4783 = vmatpush3.bf16.msra.mxu0 %v5545_v55 }
 0x52b   :  { %4784 = vmatprep.subr.bf16.mxu0 %v5216_v28 }
 0x52e   :  { %4786 = vmatpush3.bf16.msra.mxu0 %v5557_v60 }
 0x52f   :  { %4787 = vmatprep.subr.bf16.mxu0 %v5216_v28 }
 0x532   :  { %4789 = vmatpush3.bf16.msra.mxu0 %v5569_v1 }
 0x533   :  { %4562 = vmatprep.subr.mxu0 %v5215_v5 }
 0x587   :  { %v1519_v38 = vpop.permute.xlu0 %1518 }
 0x5f7   :  { %v1316_v54 = vpop.f32.mrb[14].mxu0 }
 0x5f8   :  { %v1327_v58 = vadd.f32 %v5611_v45, %v1316_v54  ;;  %v4537_v61 = vpop.f32.mrb[15].mxu0 }
 0x5fa   :  { %v1330_v62 = vmul.f32 %v1328_v53, %v1327_v58  ;;  %v1541_v12 = vsub.f32 %v1327_v58, %v4243_v52  ;;  %v1417_v13 = vmul.f32 %v1416_v48, %v1327_v58 }
 0x5fc   :  { %v1331_v63 = vadd.f32 %v1330_v62, %v1329_v59  ;;  %v1542_v9 = vand.u32 2147483647, %v1541_v12  ;;  %v4255_v62 = vld [vmem:[%s6299_s30 + $0x10] sm:$0xff] }
 0x5fd   :  { %v1742_v12 = vmul.f32 %v4255_v62, %v5382_v14 }
 0x5fe   :  { %4541 = vmatmul.mubr.msk.f32.vlgmr.msra.gmra.mrb[22].mxu1 %vm82_vm0, %v1331_v63  ;;  %v1741_v63 = vsub.f32 1.0, %v5382_v14  ;;  %v1827_v14 = vld [vmem:[#allocation6 + $0x10] sm:$0xff] }
 0x5ff   :  { %1432 = vmatpush1.msra.mxu1 %v5641_v33  ;;  %1495 = vmatprep.mubr.f32.mxu1 %v5215_v5 }
 0x600   :  { %4763 = vmatprep.subr.bf16.mxu1 %v5402_v18  ;;  %v4253_v18 = vld [vmem:[%s6275_s3 + $0x8] sm:$0xff] }
 0x6d1   :  { %v1409_v2 = vpop.f32.mrb[22].mxu1 }
 0x6d2   :  { %v1410_v44 = vadd.f32 %v5649_v37, %v1409_v2  ;;  %v4542_v56 = vpop.f32.mrb[23].mxu1 }
 0x6d4   :  { %v1415_v4 = vmul.f32 %v1414_v0, %v1410_v44  ;;  %v1543_v7 = vsub.f32 %v1410_v44, %v4243_v52 }
 0x6d6   :  { %v1418_v10 = vadd.f32 %v1417_v13, %v1415_v4  ;;  %v1544_v11 = vand.u32 2147483647, %v1543_v7  ;;  %v1829_v7 = vsub.f32 1.0, %v1827_v14 }
 0x6d8   :  { %v1419_v16 = vmul.f32 %v1418_v10, %v1328_v53  ;;  %v1545_v17 = vadd.f32 %v1544_v11, %v1542_v9  ;;  %v1546_v19 = vsub.f32 %v1418_v10, %v4243_v52 }
 0x6da   :  { %v1420_v20 = vadd.f32 %v1419_v16, %v1329_v59  ;;  %v1547_v21 = vand.u32 2147483647, %v1546_v19  ;;  %v1562_v59 = vld [vmem:[#allocation5 + $0x10] sm:$0xff] }
 0x6dc   :  { %v1548_v23 = vadd.f32 %v1547_v21, %v1545_v17  ;;  %4254 = vst.msk [vmem:[%s6288_s16 + $0x8] sm:$0xff] %vm82_vm0, %v1420_v20  ;;  %4250 = vmatmul.mubr.msk.f32.vlgmr.msra.gmra.mrb[6].mxu1 %vm82_vm0, %v1420_v20 }
 0x6dd   :  { %4765 = vmatpush1.bf16.msra.mxu1 %v5413_v22  ;;  %1656 = vmatprep.mubr.f32.mxu1 %v5215_v5 }
 0x6de   :  { %v1551_v24 = vmul.f32 %v4253_v18, %v1548_v23  ;;  %4767 = vmatprep.subr.bf16.mxu1 %v5425_v25  ;;  %v4265_v23 = vld [vmem:[%s6275_s3 + $0x10] sm:$0xff] }
 0x6e0   :  { %v1552_v27 = vadd.f32 %v1551_v24, %v1540_v26 }
 0x6e1   :  { %4769 = vmatpush1.bf16.msra.mxu1 %v5436_v29 }
 0x6e2   :  { %1553 = vst.msk [vmem:[#allocation4] sm:$0xff] %vm82_vm0, %v1552_v27  ;;  %4771 = vmatprep.subr.bf16.mxu1 %v5448_v32 }
 0x6e5   :  { %4773 = vmatpush1.bf16.msra.mxu1 %v5459_v36 }
 0x6e6   :  { %4775 = vmatprep.subr.bf16.mxu1 %v5471_v39 }
 0x6e9   :  { %4777 = vmatpush1.bf16.msra.mxu1 %v5482_v43  ;;  %v1953_v27 = vld [vmem:[#allocation4] sm:$0xff] }
 0x6ea   :  { %1844 = vmatprep.subr.mxu1 %v5635_v31 }
 0x7af   :  { %v1497_v22 = vpop.f32.mrb[6].mxu1 }
 0x7b0   :  { %v4946_v30 = vadd.f32 %v1497_v22, %v5678_v57  ;;  %v1499_v25 = vpop.f32.mrb[7].mxu1 }
 0x7b1   :  { %v4947_v29 = vadd.f32 %v1499_v25, %v5683_v15 }
 0x7b2   :  { %v4251_v6 = vmul.f32 -1.442695, %v4946_v30 }
 0x7b3   :  { %v4252_v39 = vmul.f32 -1.442695, %v4947_v29 }
 0x7b4   :  { %5075 = vpow2.f32 %v4251_v6 }
 0x7b5   :  { %5077 = vtanh.f32 %v4947_v29 }
 0x7be   :  { %v5076_v34 = vpop.eup %5075 }
 0x7bf   :  { %v1507_v8 = vadd.f32 1.0, %v5076_v34  ;;  %v5078_v32 = vpop.eup %5077 }
 0x7c1   :  { %5079 = vrcp.f32 %v1507_v8 }
 0x7c2   :  { %5081 = vpow2.f32 %v4252_v39 }
 0x7cb   :  { %v5080_v36 = vpop.eup %5079 }
 0x7cc   :  { %v1522_v35 = vmul.f32 %v5080_v36, %v5078_v32  ;;  %v5082_v43 = vpop.eup %5081  ;;  %v1521_v41 = vmul.f32 %v5080_v36, %v1519_v38  ;;  %v1979_v38 = vld [vmem:[%s6281_s9 + $0x8] sm:$0xff] }
 0x7cd   :  { %v1514_v40 = vadd.f32 1.0, %v5082_v43 }
 0x7ce   :  { %1524 = vrot.lane.b32.xlu1 %v1522_v35, %s5217_s5 }
 0x7cf   :  { %5083 = vrcp.f32 %v1514_v40  ;;  %v1982_v40 = vld [vmem:[%s6281_s9 + $0x20] sm:$0xff] }
 0x7d9   :  { %v5084_v47 = vpop.eup %5083 }
 0x840   :  { %v1525_v42 = vpop.permute.xlu1 %1524 }
 0x841   :  { %v1527_v46 = vadd.f32 %v1525_v42, %v1521_v41  ;;  %v1978_v41 = vld [vmem:[%s6281_s9] sm:$0xff]  ;;  %v5793_v42 = vpack.c.bf16 %v1982_v40, %v1979_v38 }
 0x843   :  { %5085 = vtanh.f32 %v1527_v46  ;;  %1536 = vrot.lane.b32.xlu1 %v1527_v46, %s5217_s5  ;;  %v1981_v46 = vld [vmem:[%s6281_s9 + $0x18] sm:$0xff] }
 0x84d   :  { %v5086_v49 = vpop.eup %5085 }
 0x84e   :  { %v1529_v51 = vmul.f32 %v5086_v49, %v5084_v47  ;;  %v5798_v47 = vpack.c.bf16 %v1981_v46, %v1978_v41 }
 0x850   :  { %1531 = vrot.lane.b32.xlu0 %v1529_v51, %s5217_s5 }
 0x8b5   :  { %v1537_v52 = vpop.permute.xlu1 %1536 }
 0x8b6   :  { %1539 = vst.msk [vmem:[#allocation3] sm:$0xff] %vm244_vm1, %v1537_v52 }
 0x8bd   :  { %v1564_v53 = vld [vmem:[#allocation3] sm:$0xff] }
 0x8be   :  { %1931 = vrot.lane.b32.xlu0 %v1564_v53, %s5217_s5  ;;  %v1985_v53 = vld [vmem:[%s6281_s9 + $0x38] sm:$0xff] }
 0x8c2   :  { %v1532_v54 = vpop.permute.xlu0 %1531 }
 0x8c3   :  { %1534 = vst.msk [vmem:[#allocation2] sm:$0xff] %vm244_vm1, %v1532_v54  ;;  %v1988_v54 = vld [vmem:[%s6281_s9 + $0x50] sm:$0xff] }
 0x8ca   :  { %v1560_v58 = vld [vmem:[#allocation2] sm:$0xff] }
 0x8cb   :  { %v1563_v61 = vmul.f32 %v1562_v59, %v1560_v58  ;;  %v1984_v58 = vld [vmem:[%s6281_s9 + $0x30] sm:$0xff] }
 0x8cd   :  { %4257 = vmatmul.mubr.msk.f32.vlgmr.msra.gmra.mrb[8].mxu1 %vm244_vm1, %v1563_v61  ;;  %4560 = vmatmul.mubr.msk.f32.vlgmr.msra.gmra.mrb[16].mxu0 %vm244_vm1, %v1563_v61  ;;  %v5811_v61 = vpack.c.bf16 %v1988_v54, %v1985_v53 }
 0x8ce   :  { %4563 = vmatpush3.msra.mxu0 %v5591_v3  ;;  %4564 = vmatprep.mubr.msk.f32.mxu0 %vm5218_vm2, %v5215_v5 }
 0x8cf   :  { %1845 = vmatpush1.msra.mxu1 %v5641_v33  ;;  %1908 = vmatprep.mubr.f32.mxu1 %v5215_v5 }
 0x8d0   :  { %4806 = vmatprep.subr.bf16.mxu0 %v5216_v28  ;;  %4791 = vmatprep.subr.bf16.mxu1 %v5793_v42 }
 0x930   :  { %v1932_v51 = vpop.permute.xlu0 %1931 }
 0x9a0   :  { %v1729_v0 = vpop.f32.mrb[16].mxu0 }
 0x9a1   :  { %v1740_v2 = vadd.f32 %v5611_v45, %v1729_v0  ;;  %v4561_v44 = vpop.f32.mrb[17].mxu0 }
 0x9a2   :  { %v1994_v44 = vld [vmem:[%s6281_s9 + $0x80] sm:$0xff] }
 0x9a3   :  { %v1743_v48 = vmul.f32 %v1741_v63, %v1740_v2  ;;  %v1830_v11 = vmul.f32 %v1829_v7, %v1740_v2 }
 0x9a5   :  { %v1744_v56 = vadd.f32 %v1743_v48, %v1742_v12  ;;  %v1990_v48 = vld [vmem:[%s6281_s9 + $0x60] sm:$0xff] }
 0x9a7   :  { %4565 = vmatmul.mubr.msk.f32.vlgmr.msra.gmra.mrb[18].mxu0 %vm82_vm0, %v1744_v56 }
 0x9a8   :  { %4808 = vmatpush3.bf16.msra.mxu0 %v5534_v50  ;;  %4583 = vmatprep.mubr.msk.f32.mxu0 %vm5218_vm2, %v5215_v5  ;;  %v1954_v50 = vsub.f32 %v1740_v2, %v4255_v62 }
 0x9a9   :  { %4809 = vmatprep.subr.bf16.mxu0 %v5216_v28 }
 0x9aa   :  { %v1955_v16 = vand.u32 2147483647, %v1954_v50  ;;  %v2000_v50 = vld [vmem:[%s6281_s9 + $0xb0] sm:$0xff] }
 0x9ac   :  { %4811 = vmatpush3.bf16.msra.mxu0 %v5545_v55 }
 0x9ad   :  { %4812 = vmatprep.subr.bf16.mxu0 %v5216_v28 }
 0x9b0   :  { %4814 = vmatpush3.bf16.msra.mxu0 %v5557_v60 }
 0x9b1   :  { %4815 = vmatprep.subr.bf16.mxu0 %v5216_v28 }
 0x9b4   :  { %4817 = vmatpush3.bf16.msra.mxu0 %v5569_v1 }
 0x9b5   :  { %4586 = vmatprep.subr.mxu0 %v5215_v5 }
 0xa7a   :  { %v1822_v4 = vpop.f32.mrb[18].mxu0 }
 0xa7b   :  { %v1823_v13 = vadd.f32 %v5649_v37, %v1822_v4  ;;  %v4566_v9 = vpop.f32.mrb[19].mxu0  ;;  %v1997_v4 = vld [vmem:[%s6281_s9 + $0x98] sm:$0xff] }
 0xa7c   :  { %v5843_v7 = vpack.c.bf16 %v2000_v50, %v1997_v4  ;;  %v1996_v9 = vld [vmem:[%s6281_s9 + $0x90] sm:$0xff] }
 0xa7d   :  { %v1828_v10 = vmul.f32 %v1827_v14, %v1823_v13  ;;  %v1956_v55 = vsub.f32 %v1823_v13, %v4255_v62  ;;  %v1993_v14 = vld [vmem:[%s6281_s9 + $0x78] sm:$0xff] }
 0xa7e   :  { %v5841_v13 = vpack.c.bf16 %v1993_v14, %v1990_v48 }
 0xa7f   :  { %v1831_v17 = vadd.f32 %v1830_v11, %v1828_v10  ;;  %v1957_v19 = vand.u32 2147483647, %v1956_v55  ;;  %v1999_v10 = vld [vmem:[%s6281_s9 + $0xa8] sm:$0xff] }
 0xa80   :  { %v5853_v11 = vpack.c.bf16 %v1999_v10, %v1996_v9  ;;  %v2393_v10 = vld [vmem:[%s6281_s9 + $0x10] sm:$0xff] }
 0xa81   :  { %v1832_v60 = vmul.f32 %v1831_v17, %v1741_v63  ;;  %v1958_v20 = vadd.f32 %v1957_v19, %v1955_v16  ;;  %v1959_v21 = vsub.f32 %v1831_v17, %v4255_v62  ;;  %v1987_v62 = vld [vmem:[%s6281_s9 + $0x48] sm:$0xff] }
 0xa82   :  { %v5816_v0 = vpack.c.bf16 %v1987_v62, %v1984_v58 }
 0xa83   :  { %v1833_v18 = vadd.f32 %v1832_v60, %v1742_v12  ;;  %v1960_v1 = vand.u32 2147483647, %v1959_v21  ;;  %v1991_v12 = vld [vmem:[%s6281_s9 + $0x68] sm:$0xff] }
 0xa84   :  { %v5830_v56 = vpack.c.bf16 %v1994_v44, %v1991_v12 }
 0xa85   :  { %v1961_v24 = vadd.f32 %v1960_v1, %v1958_v20  ;;  %4266 = vst.msk [vmem:[%s6288_s16 + $0x10] sm:$0xff] %vm82_vm0, %v1833_v18  ;;  %4262 = vmatmul.mubr.msk.f32.vlgmr.msra.gmra.mrb[8].mxu1 %vm82_vm0, %v1833_v18  ;;  %v1975_v18 = vld [vmem:[#allocation5 + $0x18] sm:$0xff] }
 0xa86   :  { %2069 = vmatprep.mubr.f32.mxu1 %v5215_v5  ;;  %4793 = vmatpush1.bf16.msra.mxu1 %v5798_v47 }
 0xa87   :  { %v1964_v26 = vmul.f32 %v4265_v23, %v1961_v24  ;;  %4795 = vmatprep.subr.bf16.mxu1 %v5811_v61  ;;  %v4267_v23 = vld [vmem:[%s6299_s30 + $0x18] sm:$0xff] }
 0xa89   :  { %v1965_v22 = vadd.f32 %v1964_v26, %v1953_v27 }
 0xa8a   :  { %4797 = vmatpush1.bf16.msra.mxu1 %v5816_v0 }
 0xa8b   :  { %1966 = vst.msk [vmem:[#allocation4] sm:$0xff] %vm82_vm0, %v1965_v22  ;;  %4799 = vmatprep.subr.bf16.mxu1 %v5830_v56 }
 0xa8e   :  { %4801 = vmatpush1.bf16.msra.mxu1 %v5841_v13 }
 0xa8f   :  { %4803 = vmatprep.subr.bf16.mxu1 %v5843_v7 }
 0xa92   :  { %4805 = vmatpush1.bf16.msra.mxu1 %v5853_v11  ;;  %v2366_v54 = vld [vmem:[#allocation4] sm:$0xff] }
 0xa93   :  { %2257 = vmatprep.subr.mxu1 %v5635_v31  ;;  %v4268_v31 = vld [vmem:[%s6298_s2 + $0x18] sm:$0xff] }
 0xa94   :  { %v2155_v27 = vmul.f32 %v4268_v31, %v4267_v23 }
 0xb58   :  { %v1910_v30 = vpop.f32.mrb[8].mxu1 }
 0xb59   :  { %v4948_v25 = vadd.f32 %v1910_v30, %v5678_v57  ;;  %v1912_v6 = vpop.f32.mrb[9].mxu1 }
 0xb5a   :  { %v4949_v34 = vadd.f32 %v1912_v6, %v5683_v15 }
 0xb5b   :  { %v4263_v29 = vmul.f32 -1.442695, %v4948_v25  ;;  %v2240_v25 = vld [vmem:[#allocation6 + $0x18] sm:$0xff] }
 0xb5c   :  { %v4264_v43 = vmul.f32 -1.442695, %v4949_v34 }
 0xb5d   :  { %5087 = vpow2.f32 %v4263_v29 }
 0xb5e   :  { %5089 = vtanh.f32 %v4949_v34 }
 0xb67   :  { %v5088_v8 = vpop.eup %5087 }
 0xb68   :  { %v1920_v32 = vadd.f32 1.0, %v5088_v8  ;;  %v5090_v36 = vpop.eup %5089  ;;  %v2242_v8 = vsub.f32 1.0, %v2240_v25 }
 0xb6a   :  { %5091 = vrcp.f32 %v1920_v32 }
 0xb6b   :  { %5093 = vpow2.f32 %v4264_v43 }
 0xb74   :  { %v5092_v35 = vpop.eup %5091 }
 0xb75   :  { %v1935_v39 = vmul.f32 %v5092_v35, %v5090_v36  ;;  %v5094_v49 = vpop.eup %5093  ;;  %v1934_v59 = vmul.f32 %v5092_v35, %v1932_v51 }
 0xb76   :  { %v1927_v52 = vadd.f32 1.0, %v5094_v49 }
 0xb77   :  { %1937 = vrot.lane.b32.xlu1 %v1935_v39, %s5217_s5 }
 0xb78   :  { %5095 = vrcp.f32 %v1927_v52  ;;  %v4277_v52 = vld [vmem:[%s6275_s3 + $0x18] sm:$0xff] }
 0xb82   :  { %v5096_v55 = vpop.eup %5095 }
 0xbe9   :  { %v1938_v63 = vpop.permute.xlu1 %1937 }
 0xbea   :  { %v1940_v2 = vadd.f32 %v1938_v63, %v1934_v59 }
 0xbec   :  { %5097 = vtanh.f32 %v1940_v2  ;;  %1949 = vrot.lane.b32.xlu1 %v1940_v2, %s5217_s5 }
 0xbf6   :  { %v5098_v16 = vpop.eup %5097 }
 0xbf7   :  { %v1942_v17 = vmul.f32 %v5098_v16, %v5096_v55  ;;  %v2396_v55 = vld [vmem:[%s6281_s9 + $0x28] sm:$0xff] }
 0xbf8   :  { %v5908_v16 = vpack.c.bf16 %v2396_v55, %v2393_v10 }
 0xbf9   :  { %1944 = vrot.lane.b32.xlu0 %v1942_v17, %s5217_s5 }
 0xc5e   :  { %v1950_v19 = vpop.permute.xlu1 %1949 }
 0xc5f   :  { %1952 = vst.msk [vmem:[#allocation3] sm:$0xff] %vm244_vm1, %v1950_v19 }
 0xc66   :  { %v1977_v60 = vld [vmem:[#allocation3] sm:$0xff] }
 0xc67   :  { %2344 = vrot.lane.b32.xlu0 %v1977_v60, %s5217_s5 }
 0xc6b   :  { %v1945_v20 = vpop.permute.xlu0 %1944 }
 0xc6c   :  { %1947 = vst.msk [vmem:[#allocation2] sm:$0xff] %vm244_vm1, %v1945_v20  ;;  %v2399_v20 = vld [vmem:[%s6281_s9 + $0x40] sm:$0xff] }
 0xc73   :  { %v1973_v21 = vld [vmem:[#allocation2] sm:$0xff] }
 0xc74   :  { %v1976_v1 = vmul.f32 %v1975_v18, %v1973_v21  ;;  %v2402_v21 = vld [vmem:[%s6281_s9 + $0x58] sm:$0xff] }
 0xc76   :  { %4269 = vmatmul.mubr.msk.f32.vlgmr.msra.gmra.mrb[10].mxu1 %vm244_vm1, %v1976_v1  ;;  %4584 = vmatmul.mubr.msk.f32.vlgmr.msra.gmra.mrb[20].mxu0 %vm244_vm1, %v1976_v1  ;;  %v5918_v1 = vpack.c.bf16 %v2402_v21, %v2399_v20  ;;  %v4289_v21 = vld [vmem:[%s6275_s3 + $0x20] sm:$0xff] }
 0xc77   :  { %4587 = vmatpush3.msra.mxu0 %v5591_v3  ;;  %4588 = vmatprep.mubr.msk.f32.mxu0 %vm5218_vm2, %v5215_v5  ;;  %v2154_v3 = vsub.f32 1.0, %v4268_v31 }
 0xc78   :  { %2258 = vmatpush1.msra.mxu1 %v5641_v33  ;;  %2321 = vmatprep.mubr.f32.mxu1 %v5215_v5 }
 0xc79   :  { %4819 = vmatprep.subr.bf16.mxu1 %v5793_v42  ;;  %4834 = vmatprep.subr.bf16.mxu0 %v5216_v28 }
 0xcd9   :  { %v2345_v19 = vpop.permute.xlu0 %2344 }
 0xd49   :  { %v2142_v24 = vpop.f32.mrb[20].mxu0 }
 0xd4a   :  { %v2153_v26 = vadd.f32 %v5611_v45, %v2142_v24  ;;  %v4585_v33 = vpop.f32.mrb[21].mxu0  ;;  %v2408_v24 = vld [vmem:[%s6281_s9 + $0x88] sm:$0xff] }
 0xd4b   :  { %v2414_v33 = vld [vmem:[%s6281_s9 + $0xb8] sm:$0xff] }
 0xd4c   :  { %v2156_v22 = vmul.f32 %v2154_v3, %v2153_v26  ;;  %v2367_v29 = vsub.f32 %v2153_v26, %v4267_v23  ;;  %v2243_v35 = vmul.f32 %v2242_v8, %v2153_v26  ;;  %v2411_v26 = vld [vmem:[%s6281_s9 + $0xa0] sm:$0xff] }
 0xd4e   :  { %v2157_v30 = vadd.f32 %v2156_v22, %v2155_v27  ;;  %v2368_v45 = vand.u32 2147483647, %v2367_v29  ;;  %v5938_v22 = vpack.c.bf16 %v2414_v33, %v2411_v26 }
 0xd50   :  { %4589 = vmatmul.mubr.msk.f32.vlgmr.msra.gmra.mrb[22].mxu0 %vm82_vm0, %v2157_v30 }
 0xd51   :  { %4607 = vmatprep.mubr.msk.f32.mxu0 %vm5218_vm2, %v5215_v5  ;;  %4836 = vmatpush3.bf16.msra.mxu0 %v5908_v16 }
 0xd52   :  { %4837 = vmatprep.subr.bf16.mxu0 %v5216_v28 }
 0xd55   :  { %4839 = vmatpush3.bf16.msra.mxu0 %v5918_v1 }
 0xd56   :  { %4840 = vmatprep.subr.bf16.mxu0 %v5216_v28 }
 0xe23   :  { %v2235_v6 = vpop.f32.mrb[22].mxu0 }
 0xe24   :  { %v2236_v34 = vadd.f32 %v5649_v37, %v2235_v6  ;;  %v4590_v32 = vpop.f32.mrb[23].mxu0 }
 0xe26   :  { %v2241_v36 = vmul.f32 %v2240_v25, %v2236_v34  ;;  %v2369_v39 = vsub.f32 %v2236_v34, %v4267_v23 }
 0xe28   :  { %v2244_v43 = vadd.f32 %v2243_v35, %v2241_v36  ;;  %v2370_v38 = vand.u32 2147483647, %v2369_v39  ;;  %v2388_v36 = vld [vmem:[#allocation5 + $0x20] sm:$0xff]  ;;  %v5955_v39 = vld [vmem:[%s6283_s11] sm:$0xff] }
 0xe2a   :  { %v2245_v40 = vmul.f32 %v2244_v43, %v2154_v3  ;;  %v2371_v41 = vadd.f32 %v2370_v38, %v2368_v45  ;;  %v2372_v46 = vsub.f32 %v2244_v43, %v4267_v23  ;;  %v2405_v3 = vld [vmem:[%s6281_s9 + $0x70] sm:$0xff]  ;;  %v4280_v45 = vld [vmem:[%s6298_s2 + $0x20] sm:$0xff] }
 0xe2b   :  { %v4279_v43 = vld [vmem:[%s6299_s30 + $0x20] sm:$0xff] }
 0xe2c   :  { %v2246_v49 = vadd.f32 %v2245_v40, %v2155_v27  ;;  %v2373_v51 = vand.u32 2147483647, %v2372_v46  ;;  %v5932_v27 = vpack.c.bf16 %v2408_v24, %v2405_v3  ;;  %v5968_v38 = vld [vmem:[%s6282_s10] ss:$0 sm:$0xff]  ;;  %v2567_v40 = vsub.f32 1.0, %v4280_v45 }
 0xe2e   :  { %v2374_v53 = vadd.f32 %v2373_v51, %v2371_v41  ;;  %4278 = vst.msk [vmem:[%s6288_s16 + $0x18] sm:$0xff] %vm82_vm0, %v2246_v49  ;;  %4274 = vmatmul.mubr.msk.f32.vlgmr.msra.gmra.mrb[10].mxu1 %vm82_vm0, %v2246_v49  ;;  %4842 = vmatpush3.bf16.msra.mxu0 %v5932_v27  ;;  %v2568_v49 = vmul.f32 %v4280_v45, %v4279_v43 }
 0xe2f   :  { %4821 = vmatpush1.bf16.msra.mxu1 %v5798_v47  ;;  %2482 = vmatprep.mubr.f32.mxu1 %v5215_v5 }
 0xe30   :  { %v2377_v37 = vmul.f32 %v4277_v52, %v2374_v53  ;;  %4823 = vmatprep.subr.bf16.mxu1 %v5811_v61  ;;  %4843 = vmatprep.subr.bf16.mxu0 %v5216_v28 }
 0xe32   :  { %v2378_v58 = vadd.f32 %v2377_v37, %v2366_v54  ;;  %4845 = vmatpush3.bf16.msra.mxu0 %v5938_v22  ;;  %v5985_v37 = vld [vmem:[%s6285_s13 + $0x8] sm:$0xff]  ;;  %v5991_v54 = vld [vmem:[%s6285_s13] sm:$0xff] }
 0xe33   :  { %4825 = vmatpush1.bf16.msra.mxu1 %v5816_v0  ;;  %4610 = vmatprep.subr.mxu0 %v5215_v5 }
 0xe34   :  { %2379 = vst.msk [vmem:[#allocation4] sm:$0xff] %vm82_vm0, %v2378_v58  ;;  %4827 = vmatprep.subr.bf16.mxu1 %v5830_v56  ;;  %v5998_v58 = vld [vmem:[%s6284_s12] ss:$0 sm:$0xff] }
 0xe37   :  { %4829 = vmatpush1.bf16.msra.mxu1 %v5841_v13 }
 0xe38   :  { %4831 = vmatprep.subr.bf16.mxu1 %v5843_v7 }
 0xe3b   :  { %4833 = vmatpush1.bf16.msra.mxu1 %v5853_v11 }
 0xe3c   :  { %2670 = vmatprep.subr.mxu1 %v5985_v37 }
 0xf01   :  { %v2323_v59 = vpop.f32.mrb[10].mxu1 }
 0xf02   :  { %v4950_v62 = vadd.f32 %v2323_v59, %v5678_v57  ;;  %v2325_v63 = vpop.f32.mrb[11].mxu1  ;;  %v2653_v59 = vld [vmem:[#allocation6 + $0x20] sm:$0xff] }
 0xf03   :  { %v4951_v12 = vadd.f32 %v2325_v63, %v5683_v15 }
 0xf04   :  { %v4275_v2 = vmul.f32 -1.442695, %v4950_v62 }
 0xf05   :  { %v4276_v9 = vmul.f32 -1.442695, %v4951_v12 }
 0xf06   :  { %5099 = vpow2.f32 %v4275_v2 }
 0xf07   :  { %5101 = vtanh.f32 %v4951_v12  ;;  %v2655_v12 = vsub.f32 1.0, %v2653_v59 }
 0xf10   :  { %v5100_v44 = vpop.eup %5099 }
 0xf11   :  { %v2333_v48 = vadd.f32 1.0, %v5100_v44  ;;  %v5102_v14 = vpop.eup %5101 }
 0xf13   :  { %5103 = vrcp.f32 %v2333_v48 }
 0xf14   :  { %5105 = vpow2.f32 %v4276_v9 }
 0xf1d   :  { %v5104_v4 = vpop.eup %5103 }
 0xf1e   :  { %v2348_v50 = vmul.f32 %v5104_v4, %v5102_v14  ;;  %v5106_v17 = vpop.eup %5105  ;;  %v2347_v18 = vmul.f32 %v5104_v4, %v2345_v19 }
 0xf1f   :  { %v2340_v60 = vadd.f32 1.0, %v5106_v17 }
 0xf20   :  { %2350 = vrot.lane.b32.xlu1 %v2348_v50, %s5217_s5 }
 0xf21   :  { %5107 = vrcp.f32 %v2340_v60 }
 0xf2b   :  { %v5108_v30 = vpop.eup %5107 }
 0xf92   :  { %v2351_v31 = vpop.permute.xlu1 %2350 }
 0xf93   :  { %v2353_v23 = vadd.f32 %v2351_v31, %v2347_v18 }
 0xf95   :  { %5109 = vtanh.f32 %v2353_v23  ;;  %2362 = vrot.lane.b32.xlu1 %v2353_v23, %s5217_s5  ;;  %v2779_v23 = vld [vmem:[#allocation4] sm:$0xff] }
 0xf9f   :  { %v5110_v25 = vpop.eup %5109 }
 0xfa0   :  { %v2355_v6 = vmul.f32 %v5110_v25, %v5108_v30 }
 0xfa2   :  { %2357 = vrot.lane.b32.xlu0 %v2355_v6, %s5217_s5 }
0x1007   :  { %v2363_v29 = vpop.permute.xlu1 %2362 }
0x1008   :  { %2365 = vst.msk [vmem:[#allocation3] sm:$0xff] %vm244_vm1, %v2363_v29 }
0x100f   :  { %v2390_v34 = vld [vmem:[#allocation3] sm:$0xff] }
0x1010   :  { %2757 = vrot.lane.b32.xlu0 %v2390_v34, %s5217_s5 }
0x1014   :  { %v2358_v8 = vpop.permute.xlu0 %2357 }
0x1015   :  { %2360 = vst.msk [vmem:[#allocation2] sm:$0xff] %vm244_vm1, %v2358_v8 }
0x101c   :  { %v2386_v32 = vld [vmem:[#allocation2] sm:$0xff] }
0x101d   :  { %v2389_v35 = vmul.f32 %v2388_v36, %v2386_v32 }
0x101f   :  { %4281 = vmatmul.mubr.msk.f32.vlgmr.msra.gmra.mrb[12].mxu1 %vm244_vm1, %v2389_v35  ;;  %4608 = vmatmul.mubr.msk.f32.vlgmr.msra.gmra.mrb[24].mxu0 %vm244_vm1, %v2389_v35 }
0x1020   :  { %4612 = vmatprep.mubr.msk.f32.mxu0 %vm5218_vm2, %v5215_v5  ;;  %2734 = vmatprep.mubr.f32.mxu1 %v5215_v5 }
0x1021   :  { %4611 = vmatpush3.msra.mxu0 %v5955_v39  ;;  %2671 = vmatpush1.msra.mxu1 %v5991_v54 }
0x1022   :  { %4862 = vmatprep.subr.bf16.mxu0 %v5216_v28  ;;  %4847 = vmatprep.subr.bf16.mxu1 %v5793_v42 }
0x1082   :  { %v2758_v45 = vpop.permute.xlu0 %2757 }
0x10f2   :  { %v2555_v41 = vpop.f32.mrb[24].mxu0 }
0x10f3   :  { %v2566_v46 = vadd.f32 %v5968_v38, %v2555_v41  ;;  %v4609_v51 = vpop.f32.mrb[25].mxu0 }
0x10f5   :  { %v2569_v52 = vmul.f32 %v2567_v40, %v2566_v46  ;;  %v2780_v63 = vsub.f32 %v2566_v46, %v4279_v43  ;;  %v2656_v14 = vmul.f32 %v2655_v12, %v2566_v46 }
0x10f7   :  { %v2570_v53 = vadd.f32 %v2569_v52, %v2568_v49  ;;  %v2781_v50 = vand.u32 2147483647, %v2780_v63 }
0x10f9   :  { %4613 = vmatmul.mubr.msk.f32.vlgmr.msra.gmra.mrb[26].mxu0 %vm82_vm0, %v2570_v53 }
0x10fa   :  { %4864 = vmatpush3.bf16.msra.mxu0 %v5908_v16  ;;  %4631 = vmatprep.mubr.msk.f32.mxu0 %vm5218_vm2, %v5215_v5 }
0x10fb   :  { %4865 = vmatprep.subr.bf16.mxu0 %v5216_v28 }
0x10fe   :  { %4867 = vmatpush3.bf16.msra.mxu0 %v5918_v1 }
0x10ff   :  { %4868 = vmatprep.subr.bf16.mxu0 %v5216_v28 }
0x1102   :  { %4870 = vmatpush3.bf16.msra.mxu0 %v5932_v27 }
0x1103   :  { %4871 = vmatprep.subr.bf16.mxu0 %v5216_v28 }
0x1106   :  { %4873 = vmatpush3.bf16.msra.mxu0 %v5938_v22 }
0x1107   :  { %4634 = vmatprep.subr.mxu0 %v5215_v5 }
0x11cc   :  { %v2648_v62 = vpop.f32.mrb[26].mxu0 }
0x11cd   :  { %v2649_v2 = vadd.f32 %v5998_v58, %v2648_v62  ;;  %v4614_v44 = vpop.f32.mrb[27].mxu0 }
0x11ce   :  { %v4292_v44 = vld [vmem:[%s6298_s2 + $0x28] sm:$0xff] }
0x11cf   :  { %v2654_v48 = vmul.f32 %v2653_v59, %v2649_v2  ;;  %v2782_v4 = vsub.f32 %v2649_v2, %v4279_v43  ;;  %v2801_v2 = vld [vmem:[#allocation5 + $0x28] sm:$0xff] }
0x11d1   :  { %v2657_v9 = vadd.f32 %v2656_v14, %v2654_v48  ;;  %v2783_v10 = vand.u32 2147483647, %v2782_v4  ;;  %v4291_v48 = vld [vmem:[%s6299_s30 + $0x28] sm:$0xff]  ;;  %v2980_v14 = vsub.f32 1.0, %v4292_v44 }
0x11d3   :  { %v2658_v55 = vmul.f32 %v2657_v9, %v2567_v40  ;;  %v2784_v17 = vadd.f32 %v2783_v10, %v2781_v50  ;;  %v2785_v19 = vsub.f32 %v2657_v9, %v4279_v43  ;;  %v2981_v9 = vmul.f32 %v4292_v44, %v4291_v48 }
0x11d5   :  { %v2659_v60 = vadd.f32 %v2658_v55, %v2568_v49  ;;  %v2786_v20 = vand.u32 2147483647, %v2785_v19 }
0x11d7   :  { %v2787_v18 = vadd.f32 %v2786_v20, %v2784_v17  ;;  %4290 = vst.msk [vmem:[%s6288_s16 + $0x20] sm:$0xff] %vm82_vm0, %v2659_v60  ;;  %4286 = vmatmul.mubr.msk.f32.vlgmr.msra.gmra.mrb[12].mxu1 %vm82_vm0, %v2659_v60 }
0x11d8   :  { %4849 = vmatpush1.bf16.msra.mxu1 %v5798_v47  ;;  %2895 = vmatprep.mubr.f32.mxu1 %v5215_v5 }
0x11d9   :  { %v2790_v31 = vmul.f32 %v4289_v21, %v2787_v18  ;;  %4851 = vmatprep.subr.bf16.mxu1 %v5811_v61 }
0x11db   :  { %v2791_v3 = vadd.f32 %v2790_v31, %v2779_v23 }
0x11dc   :  { %4853 = vmatpush1.bf16.msra.mxu1 %v5816_v0 }
0x11dd   :  { %2792 = vst.msk [vmem:[#allocation4] sm:$0xff] %vm82_vm0, %v2791_v3  ;;  %4855 = vmatprep.subr.bf16.mxu1 %v5830_v56 }
0x11e0   :  { %4857 = vmatpush1.bf16.msra.mxu1 %v5841_v13 }
0x11e1   :  { %4859 = vmatprep.subr.bf16.mxu1 %v5843_v7 }
0x11e4   :  { %4861 = vmatpush1.bf16.msra.mxu1 %v5853_v11 }
0x11e5   :  { %3083 = vmatprep.subr.mxu1 %v5985_v37 }
0x12aa   :  { %v2736_v24 = vpop.f32.mrb[12].mxu1 }
0x12ab   :  { %v4952_v26 = vadd.f32 %v2736_v24, %v5678_v57  ;;  %v2738_v33 = vpop.f32.mrb[13].mxu1 }
0x12ac   :  { %v4953_v25 = vadd.f32 %v2738_v33, %v5683_v15 }
0x12ad   :  { %v4287_v30 = vmul.f32 -1.442695, %v4952_v26 }
0x12ae   :  { %v4288_v36 = vmul.f32 -1.442695, %v4953_v25 }
0x12af   :  { %5111 = vpow2.f32 %v4287_v30 }
0x12b0   :  { %5113 = vtanh.f32 %v4953_v25 }
0x12b9   :  { %v5112_v6 = vpop.eup %5111 }
0x12ba   :  { %v2746_v29 = vadd.f32 1.0, %v5112_v6  ;;  %v5114_v34 = vpop.eup %5113 }
0x12bc   :  { %5115 = vrcp.f32 %v2746_v29 }
0x12bd   :  { %5117 = vpow2.f32 %v4288_v36 }
0x12c6   :  { %v5116_v8 = vpop.eup %5115 }
0x12c7   :  { %v2761_v32 = vmul.f32 %v5116_v8, %v5114_v34  ;;  %v5118_v35 = vpop.eup %5117  ;;  %v2760_v40 = vmul.f32 %v5116_v8, %v2758_v45  ;;  %v4301_v8 = vld [vmem:[%s6275_s3 + $0x28] sm:$0xff] }
0x12c8   :  { %v2753_v43 = vadd.f32 1.0, %v5118_v35  ;;  %v3192_v35 = vld [vmem:[#allocation4] sm:$0xff] }
0x12c9   :  { %2763 = vrot.lane.b32.xlu1 %v2761_v32, %s5217_s5 }
0x12ca   :  { %5119 = vrcp.f32 %v2753_v43 }
0x12d4   :  { %v5120_v49 = vpop.eup %5119 }
0x133b   :  { %v2764_v41 = vpop.permute.xlu1 %2763 }
0x133c   :  { %v2766_v46 = vadd.f32 %v2764_v41, %v2760_v40 }
0x133e   :  { %5121 = vtanh.f32 %v2766_v46  ;;  %2775 = vrot.lane.b32.xlu1 %v2766_v46, %s5217_s5 }
0x1348   :  { %v5122_v51 = vpop.eup %5121 }
0x1349   :  { %v2768_v52 = vmul.f32 %v5122_v51, %v5120_v49 }
0x134b   :  { %2770 = vrot.lane.b32.xlu0 %v2768_v52, %s5217_s5 }
0x13b0   :  { %v2776_v53 = vpop.permute.xlu1 %2775 }
0x13b1   :  { %2778 = vst.msk [vmem:[#allocation3] sm:$0xff] %vm244_vm1, %v2776_v53 }
0x13b8   :  { %v2803_v59 = vld [vmem:[#allocation3] sm:$0xff] }
0x13b9   :  { %3170 = vrot.lane.b32.xlu0 %v2803_v59, %s5217_s5 }
0x13bd   :  { %v2771_v62 = vpop.permute.xlu0 %2770 }
0x13be   :  { %2773 = vst.msk [vmem:[#allocation2] sm:$0xff] %vm244_vm1, %v2771_v62 }
0x13c5   :  { %v2799_v63 = vld [vmem:[#allocation2] sm:$0xff] }
0x13c6   :  { %v2802_v12 = vmul.f32 %v2801_v2, %v2799_v63 }
0x13c8   :  { %4293 = vmatmul.mubr.msk.f32.vlgmr.msra.gmra.mrb[14].mxu1 %vm244_vm1, %v2802_v12  ;;  %4632 = vmatmul.mubr.msk.f32.vlgmr.msra.gmra.mrb[28].mxu0 %vm244_vm1, %v2802_v12 }
0x13c9   :  { %4635 = vmatpush3.msra.mxu0 %v5955_v39  ;;  %4636 = vmatprep.mubr.msk.f32.mxu0 %vm5218_vm2, %v5215_v5 }
0x13ca   :  { %3084 = vmatpush1.msra.mxu1 %v5991_v54  ;;  %3147 = vmatprep.mubr.f32.mxu1 %v5215_v5 }
0x13cb   :  { %4875 = vmatprep.subr.bf16.mxu1 %v5793_v42  ;;  %4890 = vmatprep.subr.bf16.mxu0 %v5216_v28  ;;  %v3066_v42 = vld [vmem:[#allocation6 + $0x28] sm:$0xff] }
0x13cc   :  { %v3068_v21 = vsub.f32 1.0, %v3066_v42 }
0x142b   :  { %v3171_v51 = vpop.permute.xlu0 %3170 }
0x149b   :  { %v2968_v4 = vpop.f32.mrb[28].mxu0 }
0x149c   :  { %v2979_v50 = vadd.f32 %v5968_v38, %v2968_v4  ;;  %v4633_v10 = vpop.f32.mrb[29].mxu0 }
0x149d   :  { %v4304_v10 = vld [vmem:[%s6298_s2 + $0x30] sm:$0xff] }
0x149e   :  { %v2982_v55 = vmul.f32 %v2980_v14, %v2979_v50  ;;  %v3193_v60 = vsub.f32 %v2979_v50, %v4291_v48  ;;  %v3069_v23 = vmul.f32 %v3068_v21, %v2979_v50  ;;  %v3214_v50 = vld [vmem:[#allocation5 + $0x30] sm:$0xff] }
0x14a0   :  { %v2983_v17 = vadd.f32 %v2982_v55, %v2981_v9  ;;  %v3194_v24 = vand.u32 2147483647, %v3193_v60  ;;  %v4303_v55 = vld [vmem:[%s6299_s30 + $0x30] sm:$0xff] }
0x14a1   :  { %v3394_v60 = vmul.f32 %v4304_v10, %v4303_v55 }
0x14a2   :  { %4637 = vmatmul.mubr.msk.f32.vlgmr.msra.gmra.mrb[30].mxu0 %vm82_vm0, %v2983_v17  ;;  %v3393_v17 = vsub.f32 1.0, %v4304_v10 }
0x14a3   :  { %4892 = vmatpush3.bf16.msra.mxu0 %v5908_v16  ;;  %4655 = vmatprep.mubr.msk.f32.mxu0 %vm5218_vm2, %v5215_v5 }
0x14a4   :  { %4893 = vmatprep.subr.bf16.mxu0 %v5216_v28 }
0x14a7   :  { %4895 = vmatpush3.bf16.msra.mxu0 %v5918_v1 }
0x14a8   :  { %4896 = vmatprep.subr.bf16.mxu0 %v5216_v28 }
0x14ab   :  { %4898 = vmatpush3.bf16.msra.mxu0 %v5932_v27 }
0x14ac   :  { %4899 = vmatprep.subr.bf16.mxu0 %v5216_v28 }
0x14af   :  { %4901 = vmatpush3.bf16.msra.mxu0 %v5938_v22 }
0x14b0   :  { %4658 = vmatprep.subr.mxu0 %v5215_v5 }
0x1575   :  { %v3061_v19 = vpop.f32.mrb[30].mxu0 }
0x1576   :  { %v3062_v20 = vadd.f32 %v5998_v58, %v3061_v19  ;;  %v4638_v18 = vpop.f32.mrb[31].mxu0 }
0x1578   :  { %v3067_v31 = vmul.f32 %v3066_v42, %v3062_v20  ;;  %v3195_v3 = vsub.f32 %v3062_v20, %v4291_v48 }
0x157a   :  { %v3070_v26 = vadd.f32 %v3069_v23, %v3067_v31  ;;  %v3196_v33 = vand.u32 2147483647, %v3195_v3  ;;  %v3479_v31 = vld [vmem:[#allocation6 + $0x30] sm:$0xff] }
0x157c   :  { %v3071_v30 = vmul.f32 %v3070_v26, %v2980_v14  ;;  %v3197_v25 = vadd.f32 %v3196_v33, %v3194_v24  ;;  %v3198_v6 = vsub.f32 %v3070_v26, %v4291_v48  ;;  %v3481_v24 = vsub.f32 1.0, %v3479_v31 }
0x157e   :  { %v3072_v29 = vadd.f32 %v3071_v30, %v2981_v9  ;;  %v3199_v34 = vand.u32 2147483647, %v3198_v6 }
0x1580   :  { %v3200_v32 = vadd.f32 %v3199_v34, %v3197_v25  ;;  %4302 = vst.msk [vmem:[%s6288_s16 + $0x28] sm:$0xff] %vm82_vm0, %v3072_v29  ;;  %4298 = vmatmul.mubr.msk.f32.vlgmr.msra.gmra.mrb[14].mxu1 %vm82_vm0, %v3072_v29 }
0x1581   :  { %4877 = vmatpush1.bf16.msra.mxu1 %v5798_v47  ;;  %3308 = vmatprep.mubr.f32.mxu1 %v5215_v5 }
0x1582   :  { %v3203_v36 = vmul.f32 %v4301_v8, %v3200_v32  ;;  %4879 = vmatprep.subr.bf16.mxu1 %v5811_v61 }
0x1584   :  { %v3204_v45 = vadd.f32 %v3203_v36, %v3192_v35  ;;  %v4313_v36 = vld [vmem:[%s6275_s3 + $0x30] sm:$0xff] }
0x1585   :  { %4881 = vmatpush1.bf16.msra.mxu1 %v5816_v0 }
0x1586   :  { %3205 = vst.msk [vmem:[#allocation4] sm:$0xff] %vm82_vm0, %v3204_v45  ;;  %4883 = vmatprep.subr.bf16.mxu1 %v5830_v56 }
0x1589   :  { %4885 = vmatpush1.bf16.msra.mxu1 %v5841_v13 }
0x158a   :  { %4887 = vmatprep.subr.bf16.mxu1 %v5843_v7 }
0x158d   :  { %4889 = vmatpush1.bf16.msra.mxu1 %v5853_v11 }
0x158e   :  { %3496 = vmatprep.subr.mxu1 %v5985_v37 }
0x1653   :  { %v3149_v47 = vpop.f32.mrb[14].mxu1 }
0x1654   :  { %v4954_v43 = vadd.f32 %v3149_v47, %v5678_v57  ;;  %v3151_v61 = vpop.f32.mrb[15].mxu1  ;;  %v3605_v47 = vld [vmem:[#allocation4] sm:$0xff] }
0x1655   :  { %v4955_v0 = vadd.f32 %v3151_v61, %v5683_v15 }
0x1656   :  { %v4299_v40 = vmul.f32 -1.442695, %v4954_v43 }
0x1657   :  { %v4300_v7 = vmul.f32 -1.442695, %v4955_v0 }
0x1658   :  { %5123 = vpow2.f32 %v4299_v40 }
0x1659   :  { %5125 = vtanh.f32 %v4955_v0 }
0x1662   :  { %v5124_v41 = vpop.eup %5123 }
0x1663   :  { %v3159_v46 = vadd.f32 1.0, %v5124_v41  ;;  %v5126_v56 = vpop.eup %5125 }
0x1665   :  { %5127 = vrcp.f32 %v3159_v46 }
0x1666   :  { %5129 = vpow2.f32 %v4300_v7 }
0x166f   :  { %v5128_v13 = vpop.eup %5127 }
0x1670   :  { %v3174_v49 = vmul.f32 %v5128_v13, %v5126_v56  ;;  %v5130_v11 = vpop.eup %5129  ;;  %v3173_v53 = vmul.f32 %v5128_v13, %v3171_v51 }
0x1671   :  { %v3166_v52 = vadd.f32 1.0, %v5130_v11 }
0x1672   :  { %3176 = vrot.lane.b32.xlu1 %v3174_v49, %s5217_s5 }
0x1673   :  { %5131 = vrcp.f32 %v3166_v52  ;;  %v3631_v52 = vld [vmem:[%s6281_s9 + $0x8] sm:$0xff] }
0x167d   :  { %v5132_v63 = vpop.eup %5131 }
0x16e4   :  { %v3177_v59 = vpop.permute.xlu1 %3176 }
0x16e5   :  { %v3179_v62 = vadd.f32 %v3177_v59, %v3173_v53  ;;  %v3634_v53 = vld [vmem:[%s6281_s9 + $0x20] sm:$0xff] }
0x16e6   :  { %v3630_v59 = vld [vmem:[%s6281_s9] sm:$0xff] }
0x16e7   :  { %5133 = vtanh.f32 %v3179_v62  ;;  %3188 = vrot.lane.b32.xlu1 %v3179_v62, %s5217_s5  ;;  %v4902_v62 = vpack.c.bf16 %v3634_v53, %v3631_v52 }
0x16f1   :  { %v5134_v2 = vpop.eup %5133 }
0x16f2   :  { %v3181_v12 = vmul.f32 %v5134_v2, %v5132_v63  ;;  %v3633_v63 = vld [vmem:[%s6281_s9 + $0x18] sm:$0xff] }
0x16f3   :  { %v4904_v2 = vpack.c.bf16 %v3633_v63, %v3630_v59 }
0x16f4   :  { %3183 = vrot.lane.b32.xlu0 %v3181_v12, %s5217_s5 }
0x1759   :  { %v3189_v44 = vpop.permute.xlu1 %3188 }
0x175a   :  { %3191 = vst.msk [vmem:[#allocation3] sm:$0xff] %vm244_vm1, %v3189_v44 }
0x1761   :  { %v3216_v48 = vld [vmem:[#allocation3] sm:$0xff] }
0x1762   :  { %3583 = vrot.lane.b32.xlu0 %v3216_v48, %s5217_s5 }
0x1766   :  { %v3184_v14 = vpop.permute.xlu0 %3183 }
0x1767   :  { %3186 = vst.msk [vmem:[#allocation2] sm:$0xff] %vm244_vm1, %v3184_v14  ;;  %v3637_v14 = vld [vmem:[%s6281_s9 + $0x38] sm:$0xff] }
0x176e   :  { %v3212_v4 = vld [vmem:[#allocation2] sm:$0xff] }
0x176f   :  { %v3215_v9 = vmul.f32 %v3214_v50, %v3212_v4  ;;  %v3640_v4 = vld [vmem:[%s6281_s9 + $0x50] sm:$0xff] }
0x1770   :  { %v3636_v50 = vld [vmem:[%s6281_s9 + $0x30] sm:$0xff]  ;;  %v4906_v10 = vpack.c.bf16 %v3640_v4, %v3637_v14 }
0x1771   :  { %4305 = vmatmul.mubr.msk.f32.vlgmr.msra.gmra.mrb[16].mxu1 %vm244_vm1, %v3215_v9  ;;  %4656 = vmatmul.mubr.msk.f32.vlgmr.msra.gmra.mrb[32].mxu0 %vm244_vm1, %v3215_v9 }
0x1772   :  { %4659 = vmatpush3.msra.mxu0 %v5955_v39  ;;  %4660 = vmatprep.mubr.msk.f32.mxu0 %vm5218_vm2, %v5215_v5 }
0x1773   :  { %3497 = vmatpush1.msra.mxu1 %v5991_v54  ;;  %3560 = vmatprep.mubr.f32.mxu1 %v5215_v5 }
0x1774   :  { %4918 = vmatprep.subr.bf16.mxu0 %v5216_v28  ;;  %4903 = vmatprep.subr.bf16.mxu1 %v4902_v62 }
0x17d4   :  { %v3584_v44 = vpop.permute.xlu0 %3583 }
0x1844   :  { %v3381_v42 = vpop.f32.mrb[32].mxu0 }
0x1845   :  { %v3392_v19 = vadd.f32 %v5968_v38, %v3381_v42  ;;  %v4657_v20 = vpop.f32.mrb[33].mxu0 }
0x1846   :  { %v3646_v20 = vld [vmem:[%s6281_s9 + $0x80] sm:$0xff] }
0x1847   :  { %v3395_v21 = vmul.f32 %v3393_v17, %v3392_v19  ;;  %v3482_v30 = vmul.f32 %v3481_v24, %v3392_v19 }
0x1849   :  { %v3396_v18 = vadd.f32 %v3395_v21, %v3394_v60  ;;  %v3642_v21 = vld [vmem:[%s6281_s9 + $0x60] sm:$0xff] }
0x184b   :  { %4661 = vmatmul.mubr.msk.f32.vlgmr.msra.gmra.mrb[34].mxu0 %vm82_vm0, %v3396_v18 }
0x184c   :  { %4920 = vmatpush3.bf16.msra.mxu0 %v5908_v16  ;;  %4679 = vmatprep.mubr.msk.f32.mxu0 %vm5218_vm2, %v5215_v5  ;;  %v3606_v16 = vsub.f32 %v3392_v19, %v4303_v55 }
0x184d   :  { %4921 = vmatprep.subr.bf16.mxu0 %v5216_v28 }
0x184e   :  { %v3607_v25 = vand.u32 2147483647, %v3606_v16  ;;  %v3652_v16 = vld [vmem:[%s6281_s9 + $0xb0] sm:$0xff] }
0x1850   :  { %4923 = vmatpush3.bf16.msra.mxu0 %v5918_v1 }
0x1851   :  { %4924 = vmatprep.subr.bf16.mxu0 %v5216_v28 }
0x1854   :  { %4926 = vmatpush3.bf16.msra.mxu0 %v5932_v27 }
0x1855   :  { %4927 = vmatprep.subr.bf16.mxu0 %v5216_v28 }
0x1858   :  { %4929 = vmatpush3.bf16.msra.mxu0 %v5938_v22 }
0x1859   :  { %4682 = vmatprep.subr.mxu0 %v5215_v5 }
0x191e   :  { %v3474_v23 = vpop.f32.mrb[34].mxu0 }
0x191f   :  { %v3475_v3 = vadd.f32 %v5998_v58, %v3474_v23  ;;  %v4662_v26 = vpop.f32.mrb[35].mxu0  ;;  %v3649_v23 = vld [vmem:[%s6281_s9 + $0x98] sm:$0xff] }
0x1920   :  { %v4914_v24 = vpack.c.bf16 %v3652_v16, %v3649_v23  ;;  %v3648_v26 = vld [vmem:[%s6281_s9 + $0x90] sm:$0xff] }
0x1921   :  { %v3480_v33 = vmul.f32 %v3479_v31, %v3475_v3  ;;  %v3608_v1 = vsub.f32 %v3475_v3, %v4303_v55  ;;  %v3645_v31 = vld [vmem:[%s6281_s9 + $0x78] sm:$0xff] }
0x1922   :  { %v4912_v3 = vpack.c.bf16 %v3645_v31, %v3642_v21  ;;  %v4037_v21 = vld [vmem:[%s6286_s14] sm:$0xff]  ;;  %v4040_v31 = vld [vmem:[%s6286_s14 + $0x18] sm:$0xff] }
0x1923   :  { %v3483_v6 = vadd.f32 %v3482_v30, %v3480_v33  ;;  %v3609_v29 = vand.u32 2147483647, %v3608_v1  ;;  %v3651_v33 = vld [vmem:[%s6281_s9 + $0xa8] sm:$0xff] }
0x1924   :  { %v4916_v30 = vpack.c.bf16 %v3651_v33, %v3648_v26 }
0x1925   :  { %v3484_v27 = vmul.f32 %v3483_v6, %v3393_v17  ;;  %v3610_v34 = vadd.f32 %v3609_v29, %v3607_v25  ;;  %v3611_v8 = vsub.f32 %v3483_v6, %v4303_v55  ;;  %v3639_v55 = vld [vmem:[%s6281_s9 + $0x48] sm:$0xff] }
0x1926   :  { %v4908_v42 = vpack.c.bf16 %v3639_v55, %v3636_v50 }
0x1927   :  { %v3485_v32 = vadd.f32 %v3484_v27, %v3394_v60  ;;  %v3612_v22 = vand.u32 2147483647, %v3611_v8  ;;  %v3643_v60 = vld [vmem:[%s6281_s9 + $0x68] sm:$0xff] }
0x1928   :  { %v4910_v18 = vpack.c.bf16 %v3646_v20, %v3643_v60 }
0x1929   :  { %v3613_v35 = vadd.f32 %v3612_v22, %v3610_v34  ;;  %4314 = vst.msk [vmem:[%s6288_s16 + $0x30] sm:$0xff] %vm82_vm0, %v3485_v32  ;;  %4310 = vmatmul.mubr.msk.f32.vlgmr.msra.gmra.mrb[16].mxu1 %vm82_vm0, %v3485_v32  ;;  %v3627_v32 = vld [vmem:[#allocation5 + $0x38] sm:$0xff] }
0x192a   :  { %3721 = vmatprep.mubr.f32.mxu1 %v5215_v5  ;;  %4905 = vmatpush1.bf16.msra.mxu1 %v4904_v2 }
0x192b   :  { %v3616_v45 = vmul.f32 %v4313_v36, %v3613_v35  ;;  %4907 = vmatprep.subr.bf16.mxu1 %v4906_v10  ;;  %v4315_v36 = vld [vmem:[%s6299_s30 + $0x38] sm:$0xff] }
0x192d   :  { %v3617_v43 = vadd.f32 %v3616_v45, %v3605_v47 }
0x192e   :  { %4909 = vmatpush1.bf16.msra.mxu1 %v4908_v42 }
0x192f   :  { %3618 = vst.msk [vmem:[#allocation4] sm:$0xff] %vm82_vm0, %v3617_v43  ;;  %4911 = vmatprep.subr.bf16.mxu1 %v4910_v18 }
0x1932   :  { %4913 = vmatpush1.bf16.msra.mxu1 %v4912_v3 }
0x1933   :  { %4915 = vmatprep.subr.bf16.mxu1 %v4914_v24 }
0x1936   :  { %4917 = vmatpush1.bf16.msra.mxu1 %v4916_v30 }
0x1937   :  { %3909 = vmatprep.subr.mxu1 %v5985_v37  ;;  %v4316_v37 = vld [vmem:[%s6298_s2 + $0x38] sm:$0xff] }
0x1938   :  { %v3806_v35 = vsub.f32 1.0, %v4316_v37  ;;  %v3807_v47 = vmul.f32 %v4316_v37, %v4315_v36 }
0x19fc   :  { %v3562_v61 = vpop.f32.mrb[16].mxu1 }
0x19fd   :  { %v4956_v40 = vadd.f32 %v3562_v61, %v5678_v57  ;;  %v3564_v0 = vpop.f32.mrb[17].mxu1 }
0x19fe   :  { %v4957_v46 = vadd.f32 %v3564_v0, %v5683_v15 }
0x19ff   :  { %v4311_v41 = vmul.f32 -1.442695, %v4956_v40  ;;  %v3892_v40 = vld [vmem:[#allocation6 + $0x38] sm:$0xff] }
0x1a00   :  { %v4312_v51 = vmul.f32 -1.442695, %v4957_v46 }
0x1a01   :  { %5135 = vpow2.f32 %v4311_v41 }
0x1a02   :  { %5137 = vtanh.f32 %v4957_v46 }
0x1a0b   :  { %v5136_v56 = vpop.eup %5135 }
0x1a0c   :  { %v3572_v13 = vadd.f32 1.0, %v5136_v56  ;;  %v5138_v49 = vpop.eup %5137  ;;  %v3894_v56 = vsub.f32 1.0, %v3892_v40 }
0x1a0e   :  { %5139 = vrcp.f32 %v3572_v13 }
0x1a0f   :  { %5141 = vpow2.f32 %v4312_v51 }
0x1a18   :  { %v5140_v7 = vpop.eup %5139 }
0x1a19   :  { %v3587_v11 = vmul.f32 %v5140_v7, %v5138_v49  ;;  %v5142_v12 = vpop.eup %5141  ;;  %v3586_v9 = vmul.f32 %v5140_v7, %v3584_v44  ;;  %v4018_v44 = vld [vmem:[#allocation4] sm:$0xff] }
0x1a1a   :  { %v3579_v48 = vadd.f32 1.0, %v5142_v12 }
0x1a1b   :  { %3589 = vrot.lane.b32.xlu1 %v3587_v11, %s5217_s5 }
0x1a1c   :  { %5143 = vrcp.f32 %v3579_v48 }
0x1a26   :  { %v5144_v1 = vpop.eup %5143 }
0x1a8d   :  { %v3590_v17 = vpop.permute.xlu1 %3589 }
0x1a8e   :  { %v3592_v19 = vadd.f32 %v3590_v17, %v3586_v9 }
0x1a90   :  { %5145 = vtanh.f32 %v3592_v19  ;;  %3601 = vrot.lane.b32.xlu1 %v3592_v19, %s5217_s5 }
0x1a9a   :  { %v5146_v25 = vpop.eup %5145 }
0x1a9b   :  { %v3594_v6 = vmul.f32 %v5146_v25, %v5144_v1  ;;  %v4041_v25 = vld [vmem:[%s6286_s14 + $0x20] sm:$0xff] }
0x1a9d   :  { %3596 = vrot.lane.b32.xlu0 %v3594_v6, %s5217_s5  ;;  %v4042_v6 = vld [vmem:[%s6286_s14 + $0x28] sm:$0xff] }
0x1b02   :  { %v3602_v29 = vpop.permute.xlu1 %3601 }
0x1b03   :  { %3604 = vst.msk [vmem:[#allocation3] sm:$0xff] %vm244_vm1, %v3602_v29  ;;  %v4043_v29 = vld [vmem:[%s6286_s14 + $0x30] sm:$0xff] }
0x1b0a   :  { %v3629_v27 = vld [vmem:[#allocation3] sm:$0xff] }
0x1b0b   :  { %3996 = vrot.lane.b32.xlu0 %v3629_v27, %s5217_s5  ;;  %v4937_v27 = vpack.c.bf16 %v4042_v6, %v4041_v25 }
0x1b0f   :  { %v3597_v34 = vpop.permute.xlu0 %3596 }
0x1b10   :  { %3599 = vst.msk [vmem:[#allocation2] sm:$0xff] %vm244_vm1, %v3597_v34  ;;  %v4044_v34 = vld [vmem:[%s6286_s14 + $0x38] sm:$0xff] }
0x1b17   :  { %v3625_v8 = vld [vmem:[#allocation2] sm:$0xff] }
0x1b18   :  { %v3628_v22 = vmul.f32 %v3627_v32, %v3625_v8  ;;  %v4940_v8 = vpack.c.bf16 %v4044_v34, %v4043_v29 }
0x1b1a   :  { %4317 = vmatmul.mubr.msk.f32.vlgmr.msra.gmra.mrb[18].mxu1 %vm244_vm1, %v3628_v22  ;;  %4680 = vmatmul.mubr.msk.f32.vlgmr.msra.gmra.mrb[36].mxu0 %vm244_vm1, %v3628_v22 }
0x1b1b   :  { %4683 = vmatpush3.msra.mxu0 %v5955_v39  ;;  %4684 = vmatprep.mubr.msk.f32.mxu0 %vm5218_vm2, %v5215_v5 }
0x1b1c   :  { %3910 = vmatpush1.msra.mxu1 %v5991_v54  ;;  %3973 = vmatprep.mubr.f32.mxu1 %v5215_v5 }
0x1b1d   :  { %4930 = vmatprep.subr.bf16.mxu0 %v5216_v28 }
0x1b7d   :  { %v3997_v24 = vpop.permute.xlu0 %3996 }
0x1bed   :  { %v3794_v45 = vpop.f32.mrb[36].mxu0 }
0x1bee   :  { %v3805_v39 = vadd.f32 %v5968_v38, %v3794_v45  ;;  %v4681_v43 = vpop.f32.mrb[37].mxu0  ;;  %v4327_v45 = vld [vmem:[%s6287_s15] ss:$0 sm:$0xff]  ;;  %s5220_s15 = smov [#allocation8]  }
0x1bef   :  { %s4163_s9 = sshll.u32 %s5220_s15, 4  ;;  %s4164_s9 = int_to_ptr.vmem [resolvable:$true] %s4163_s9 }
0x1bf0   :  { %v3808_v61 = vmul.f32 %v3806_v35, %v3805_v39  ;;  %v4019_v41 = vsub.f32 %v3805_v39, %v4315_v36  ;;  %v3895_v7 = vmul.f32 %v3894_v56, %v3805_v39  ;;  %s5167_s7 = scalar_lea.vmem %s4164_s9, 128  ;;  %p5172_p1 = scmp.lt.s32.totalorder %s4164_s9, %s4164_s9 }
0x1bf1   :  { %p5168_p0 = scmp.ne.s32.totalorder %s4164_s9, %s5167_s7  ;;  %p5173_p2 = scmp.lt.s32.totalorder %s5167_s7, %s5167_s7 }
0x1bf2   :  { %v3809_v54 = vadd.f32 %v3808_v61, %v3807_v47  ;;  %v4020_v38 = vand.u32 2147483647, %v4019_v41 }
0x1bf3   :  { %p5174_p3 = por %p5173_p2, %p5172_p1 }
0x1bf4   :  { %4685 = vmatmul.mubr.msk.f32.vlgmr.msra.gmra.mrb[38].mxu0 %vm82_vm0, %v3809_v54 }
0x1bf5   :  { %4703 = vmatprep.mubr.msk.f32.mxu0 %vm5218_vm2, %v5215_v5  ;;  %v4325_v5 = vld [vmem:[%s6275_s3 + $0x38] sm:$0xff]  ;;  %p5175_p4 = pnand %p5174_p3, %p5168_p0 }
0x1cc7   :  { %v3887_v0 = vpop.f32.mrb[38].mxu0 }
0x1cc8   :  { %v3888_v46 = vadd.f32 %v5998_v58, %v3887_v0  ;;  %v4686_v13 = vpop.f32.mrb[39].mxu0 }
0x1cca   :  { %v3893_v49 = vmul.f32 %v3892_v40, %v3888_v46  ;;  %v4021_v11 = vsub.f32 %v3888_v46, %v4315_v36 }
0x1ccc   :  { %v3896_v51 = vadd.f32 %v3895_v7, %v3893_v49  ;;  %v4022_v52 = vand.u32 2147483647, %v4021_v11 }
0x1cce   :  { %v3897_v53 = vmul.f32 %v3896_v51, %v3806_v35  ;;  %v4023_v59 = vadd.f32 %v4022_v52, %v4020_v38  ;;  %v4024_v62 = vsub.f32 %v3896_v51, %v4315_v36 }
0x1cd0   :  { %v3898_v63 = vadd.f32 %v3897_v53, %v3807_v47  ;;  %v4025_v2 = vand.u32 2147483647, %v4024_v62 }
0x1cd2   :  { %v4026_v12 = vadd.f32 %v4025_v2, %v4023_v59  ;;  %4326 = vst.msk [vmem:[%s6288_s16 + $0x38] sm:$0xff] %vm82_vm0, %v3898_v63  ;;  %4322 = vmatmul.mubr.msk.f32.vlgmr.msra.gmra.mrb[18].mxu1 %vm82_vm0, %v3898_v63 }
0x1cd4   :  { %v4029_v58 = vmul.f32 %v4325_v5, %v4026_v12 }
0x1cd6   :  { %v4030_v48 = vadd.f32 %v4029_v58, %v4018_v44 }
0x1cd8   :  { %4031 = vst.msk [vmem:[#allocation4] sm:$0xff] %vm82_vm0, %v4030_v48 }
0x1cdf   :  { %v4034_v14 = vld [vmem:[#allocation4] sm:$0xff] }
0x1ce0   :  { %4035 = vst.msk [vmem:[#allocation8] sm:$0xff] %vm82_vm0, %v4034_v14 }
0x1da5   :  { %v3975_v4 = vpop.f32.mrb[18].mxu1 }
0x1da6   :  { %v4958_v50 = vadd.f32 %v3975_v4, %v5678_v57  ;;  %v3977_v9 = vpop.f32.mrb[19].mxu1  ;;  %v4038_v57 = vld [vmem:[%s6286_s14 + $0x8] sm:$0xff] }
0x1da7   :  { %v4959_v55 = vadd.f32 %v3977_v9, %v5683_v15  ;;  %v4039_v15 = vld [vmem:[%s6286_s14 + $0x10] sm:$0xff]  ;;  %v4931_v18 = vpack.c.bf16 %v4038_v57, %v4037_v21  ;;  %s5219_s14 = smov 125  }
0x1da8   :  { %v4323_v10 = vmul.f32 -1.442695, %v4958_v50  ;;  %v4934_v23 = vpack.c.bf16 %v4040_v31, %v4039_v15 }
0x1da9   :  { %4932 = vmatpush3.bf16.msra.mxu0 %v4931_v18  ;;  %v4324_v16 = vmul.f32 -1.442695, %v4959_v55 }
0x1daa   :  { %5147 = vpow2.f32 %v4323_v10  ;;  %4933 = vmatprep.subr.bf16.mxu0 %v5216_v28 }
0x1dab   :  { %5149 = vtanh.f32 %v4959_v55 }
0x1dad   :  { %4935 = vmatpush3.bf16.msra.mxu0 %v4934_v23 }
0x1dae   :  { %4936 = vmatprep.subr.bf16.mxu0 %v5216_v28 }
0x1db1   :  { %4938 = vmatpush3.bf16.msra.mxu0 %v4937_v27 }
0x1db2   :  { %4939 = vmatprep.subr.bf16.mxu0 %v5216_v28 }
0x1db4   :  { %v5148_v17 = vpop.eup %5147 }
0x1db5   :  { %v3985_v42 = vadd.f32 1.0, %v5148_v17  ;;  %v5150_v19 = vpop.eup %5149  ;;  %4941 = vmatpush3.bf16.msra.mxu0 %v4940_v8 }
0x1db7   :  { %5151 = vrcp.f32 %v3985_v42 }
0x1db8   :  { %5153 = vpow2.f32 %v4324_v16 }
0x1dc1   :  { %v5152_v60 = vpop.eup %5151 }
0x1dc2   :  { %v4000_v20 = vmul.f32 %v5152_v60, %v5150_v19  ;;  %v5154_v3 = vpop.eup %5153  ;;  %v3999_v33 = vmul.f32 %v5152_v60, %v3997_v24 }
0x1dc3   :  { %v3992_v26 = vadd.f32 1.0, %v5154_v3 }
0x1dc4   :  { %4002 = vrot.lane.b32.xlu1 %v4000_v20, %s5217_s5 }
0x1dc5   :  { %5155 = vrcp.f32 %v3992_v26 }
0x1dcf   :  { %v5156_v32 = vpop.eup %5155 }
0x1e36   :  { %v4003_v30 = vpop.permute.xlu1 %4002 }
0x1e37   :  { %v4005_v1 = vadd.f32 %v4003_v30, %v3999_v33 }
0x1e39   :  { %5157 = vtanh.f32 %v4005_v1 }
0x1e43   :  { %v5158_v22 = vpop.eup %5157 }
0x1e44   :  { %v4007_v37 = vmul.f32 %v5158_v22, %v5156_v32 }
0x1e46   :  { %4009 = vrot.lane.b32.xlu0 %v4007_v37, %s5217_s5 }
0x1eb8   :  { %v4010_v36 = vpop.permute.xlu0 %4009 }
0x1eb9   :  { %4012 = vst.msk [vmem:[#allocation2] sm:$0xff] %vm244_vm1, %v4010_v36 }
0x1ec0   :  { %v4036_v35 = vld [vmem:[#allocation2] sm:$0xff] }
0x1ec1   :  { %4704 = vmatmul.mubr.msk.f32.vlgmr.msra.gmra.mrb[40].mxu0 %vm244_vm1, %v4036_v35 }
0x1f94   :  { %v4121_v39 = vpop.f32.mrb[40].mxu0 }
0x1f95   :  { %v4122_v28 = vadd.f32 %v4327_v45, %v4121_v39  ;;  %v4705_v47 = vpop.f32.mrb[41].mxu0 }
0x1f97   :  { %v4139_v43 = vsel %vm4138_vm3, %v4122_v28, -inf  ;;  %v4126_v61 = vsel %vm4125_vm4, %v4122_v28, -inf }
0x1f98   :  { %4140 = vmax.xlane.f32.xlu1 %v4139_v43  ;;  %4127 = vmax.xlane.f32.xlu0 %v4126_v61 }
0x2025   :  { %v4141_v54 = vpop.xlane.xlu1 %4140  ;;  %v4128_v40 = vpop.xlane.xlu0 %4127 }
0x2026   :  { %v4142_v0 = vsub.f32 %v4122_v28, %v4141_v54  ;;  %v4129_v41 = vsub.f32 %v4122_v28, %v4128_v40 }
0x2028   :  { %v4143_v46 = vmul.f32 1.442695, %v4142_v0  ;;  %v4130_v56 = vmul.f32 1.442695, %v4129_v41 }
0x202a   :  { %5159 = vpow2.f32 %v4143_v46 }
0x202b   :  { %5161 = vpow2.f32 %v4130_v56 }
0x2034   :  { %v5160_v13 = vpop.eup %5159 }
0x2035   :  { %v5162_v49 = vpop.eup %5161  ;;  %4146 = vrot.lane.b32.xlu0 %v5160_v13, %s5219_s14 }
0x2036   :  { %v4132_v7 = vsel %vm4125_vm4, %v5162_v49, 0.0 }
0x2037   :  { %4133 = vadd.xlane.f32.xlu1 %v4132_v7 }
0x20a7   :  { %v4147_v11 = vpop.permute.xlu0 %4146 }
0x20a8   :  { %v4149_v38 = vsel %vm4125_vm4, %v4147_v11, 0.0 }
0x20a9   :  { %4150 = vadd.xlane.f32.xlu1 %v4149_v38 }
0x20ba   :  { %4014 = vrot.lane.b32.xlu1 %v4005_v1, %s5217_s5 }
0x20bb   :  { %5178 = shalt.err (!%p5175_p4)
}
0x20bc   :  { %s5179_s2 = scalar_lea.hbm %s6289_s17, 128 }
0x20bd   :  { %p5180_p5 = scmp.ne.s32.totalorder %s6289_s17, %s5179_s2  ;;  %p5183_p6 = scmp.lt.u32.totalorder %s5179_s2, %s6289_s17 }
0x20bf   :  { %p5185_p7 = pnand %p5183_p6, %p5180_p5 }
0x20c1   :  { %5188 = shalt.err (!%p5185_p7)
}
0x20c2   :  { %4166 = dma.vmem_to_hbm [thread:$0]  %s4164_s9, 128, %s6289_s17, [#allocation9]  }
0x20c3   :  { %s5221_s10 = smov [#allocation10]  }
0x20c4   :  { %v4134_v51 = vpop.xlane.xlu1 %4133  ;;  %s4173_s11 = sshll.u32 %s5221_s10, 4  ;;  %s4174_s11 = int_to_ptr.vmem [resolvable:$true] %s4173_s11 }
0x20c5   :  { %5163 = vrcp.f32 %v4134_v51  ;;  %s5189_s21 = scalar_lea.vmem %s4174_s11, 128  ;;  %p5194_p9 = scmp.lt.s32.totalorder %s4174_s11, %s4174_s11 }
0x20c6   :  { %p5190_p8 = scmp.ne.s32.totalorder %s4174_s11, %s5189_s21  ;;  %p5195_p10 = scmp.lt.s32.totalorder %s5189_s21, %s5189_s21 }
0x20c8   :  { %p5196_p11 = por %p5195_p10, %p5194_p9 }
0x20ca   :  { %p5197_p12 = pnand %p5196_p11, %p5190_p8 }
0x20cf   :  { %v5164_v52 = vpop.eup %5163 }
0x20d0   :  { %v4136_v53 = vmul.f32 %v5164_v52, %v5162_v49 }
0x20d2   :  { %4137 = vst.msk [vmem:[#allocation10] sm:$0xff] %vm4125_vm4, %v4136_v53 }
0x2136   :  { %v4151_v59 = vpop.xlane.xlu1 %4150 }
0x2137   :  { %5165 = vrcp.f32 %v4151_v59 }
0x213a   :  { %v4015_v62 = vpop.permute.xlu1 %4014 }
0x213b   :  { %4017 = vst.msk [vmem:[#allocation3] sm:$0xff] %vm244_vm1, %v4015_v62 }
0x2141   :  { %v5166_v63 = vpop.eup %5165 }
0x2142   :  { %v4153_v2 = vmul.f32 %v5166_v63, %v5160_v13 }
0x2144   :  { %4154 = vst.msk [vmem:[#allocation10] sm:$0xff] %vm4138_vm3, %v4153_v2 }
0x2145   :  { %5200 = shalt.err (!%p5197_p12)
}
0x2146   :  { %s5201_s0 = scalar_lea.hbm %s6290_s18, 128 }
0x2147   :  { %p5202_p13 = scmp.ne.s32.totalorder %s6290_s18, %s5201_s0  ;;  %p5205_p0 = scmp.lt.u32.totalorder %s5201_s0, %s6290_s18 }
0x2149   :  { %p5207_p1 = pnand %p5205_p0, %p5202_p13 }
0x214b   :  { %5210 = shalt.err (!%p5207_p1)
}
0x214c   :  { %4176 = dma.vmem_to_hbm [thread:$0]  %s4174_s11, 128, %s6290_s18, [#allocation11]  }
0x214d   :  { %5211 = dma.done.wait [#allocation9], 128  }
0x214e   :  { %5212 = vsyncadd [#allocation9], 4294967168 }
0x214f   :  { %5213 = dma.done.wait [#allocation11], 128  }
0x2150   :  { %5214 = vsyncadd [#allocation11], 4294967168 }
0x2151   :  { %4185 = vsyncpa [#allocation9], 1 }
0x2152   :  { %4186 = vsyncpa [#allocation11], 1 }

</bundles_post_ra>
